<compile_context>
chip_gen: v7x
topology: tpu7x:2x2x1
jax: 0.10.0
libtpu: 0.0.40
codegen_flags: <defaults>
</compile_context>

<pallas_src>
import functools

import jax
import jax.numpy as jnp
from jax.experimental import pallas as pl
from jax.experimental.pallas import tpu as pltpu

_OUT_PAD = 128  # lane-dense final store; sliced back to dim_yt in the wrapper


# --------------------------------------------------------------------------- #
# Fused kernel: one grid step == one batch element                             #
# --------------------------------------------------------------------------- #
def _fused_tfs_dist_kernel(
        nhead, nlayers, dim_x, dim_h,
        ls_ref,                                     # (1,) log_strength in SMEM
        xc_ref, yc_ref, xt_ref,                     # per-batch activation blocks
        we1x_ref, we1y_ref, eb1_ref, we2_ref, eb2_ref, we3_ref, eb3_ref,   # encoder
        qw1_ref, qb1_ref, qw2_ref, qb2_ref, qw3_ref, qb3_ref,              # q_encoder
        wqh_ref, bqh_ref, wkh_ref, bkh_ref, wvh_ref, bvh_ref,              # block MHA
        woh_ref, bo_ref, g1_ref, bln1_ref, w1_ref, b1_ref, g2_ref, bln2_ref,
        dw1z_ref, dw1q_ref, db1_ref, dw2_ref, db2_ref, dw3_ref, db3_ref,   # decoder
        o_ref):
    f32 = jnp.float32
    xc = xc_ref[0]          # (Nc, dim_x)
    yc = yc_ref[0]          # (Nc, dim_yc)
    xt = xt_ref[0]          # (Nt, dim_x)

    def softmax_last(s):
        s = s - jnp.max(s, axis=-1, keepdims=True)
        e = jnp.exp(s)
        return e * pl.reciprocal(jnp.sum(e, axis=-1, keepdims=True), approx=True)

    def layernorm(x, g, b):
        mu = jnp.mean(x, axis=-1, keepdims=True)
        var = jnp.mean((x - mu) ** 2, axis=-1, keepdims=True)
        return (x - mu) * jax.lax.rsqrt(var + 1e-5) * g + b

    def dot_t(a, b):  # a @ b.T without an explicit transpose
        return jax.lax.dot_general(a, b, (((1,), (1,)), ((), ())),
                                   preferred_element_type=f32)

    # ---- encoder MLP on concat([xc, yc]) (concat folded into split matmul) ----
    h = (jnp.dot(xc, we1x_ref[...], preferred_element_type=f32)
         + jnp.dot(yc, we1y_ref[...], preferred_element_type=f32) + eb1_ref[...])
    h = jnp.maximum(h, 0.0)
    h = jnp.maximum(jnp.dot(h, we2_ref[...], preferred_element_type=f32) + eb2_ref[...], 0.0)
    lat = jnp.dot(h, we3_ref[...], preferred_element_type=f32) + eb3_ref[...]    # (Nc, dim_h)

    D = dim_x + dim_h
    hd = D // nhead
    scale = 1.0 / float(hd) ** 0.5

    # ---- nlayers TFSEncoder blocks (shared weights); latents never leave VMEM --
    def block_step(lat):
        x_in = jnp.concatenate([xc, lat], axis=-1)              # (Nc, D) VMEM-only concat
        attn = jnp.zeros_like(x_in)
        for hh in range(nhead):                                  # static & small
            q = jnp.dot(x_in, wqh_ref[hh], preferred_element_type=f32) + bqh_ref[hh]
            k = jnp.dot(x_in, wkh_ref[hh], preferred_element_type=f32) + bkh_ref[hh]
            v = jnp.dot(x_in, wvh_ref[hh], preferred_element_type=f32) + bvh_ref[hh]
            p = softmax_last(dot_t(q, k) * scale)                # (Nc, Nc)
            ctx = jnp.dot(p, v, preferred_element_type=f32)      # (Nc, hd)
            # concat(heads) @ Wo == sum_h ctx_h @ Wo[h*hd:(h+1)*hd, :]
            attn = attn + jnp.dot(ctx, woh_ref[hh], preferred_element_type=f32)
        attn = attn + bo_ref[...]
        y = layernorm(x_in + attn, g1_ref[...], bln1_ref[...])                   # norm1
        z = jnp.dot(y, w1_ref[...], preferred_element_type=f32) + b1_ref[...]    # linear1
        return layernorm(z, g2_ref[...], bln2_ref[...])                          # norm2

    # nlayers is a small static int with shared weights -> unrolled.
    # (switch to lax.fori_loop if nlayers grows large)
    for _ in range(nlayers):
        lat = block_step(lat)

    # ---- q_encoder MLP on xt ----
    qh = jnp.maximum(jnp.dot(xt, qw1_ref[...], preferred_element_type=f32) + qb1_ref[...], 0.0)
    qh = jnp.maximum(jnp.dot(qh, qw2_ref[...], preferred_element_type=f32) + qb2_ref[...], 0.0)
    qenc = jnp.dot(qh, qw3_ref[...], preferred_element_type=f32) + qb3_ref[...]   # (Nt, dim_h)

    # ---- scaled-dist attention over the context latents ----
    # NOTE: as in the PyTorch reference, the pairwise "distance" omits ||xt||^2.
    # That term is constant along the softmax axis, so the result is identical;
    # do not "fix" it.
    strength = jnp.exp(jnp.full((1, 1), ls_ref[0], dtype=f32))    # EUP exp on a (1,1) tile
    norm2 = jnp.sum(xc * xc, axis=-1)[None, :]                    # (1, Nc)
    pd = norm2 - 2.0 * dot_t(xt, xc)                              # (Nt, Nc)
    scores = softmax_last(-(strength * pd))
    z = jnp.dot(scores, lat, preferred_element_type=f32)          # (Nt, dim_h)

    # ---- decoder MLP on concat([z, qenc]) (concat folded into split matmul) ----
    d = (jnp.dot(z, dw1z_ref[...], preferred_element_type=f32)
         + jnp.dot(qenc, dw1q_ref[...], preferred_element_type=f32) + db1_ref[...])
    d = jnp.maximum(d, 0.0)
    d = jnp.maximum(jnp.dot(d, dw2_ref[...], preferred_element_type=f32) + db2_ref[...], 0.0)
    out = jnp.dot(d, dw3_ref[...], preferred_element_type=f32) + db3_ref[...]     # (Nt, 128)

    o_ref[0] = out.astype(o_ref.dtype)


def _full_block(a):
    """Whole-array BlockSpec with a constant index_map (same block every step)."""
    nd = a.ndim
    return pl.BlockSpec(a.shape, lambda b, _nd=nd: (0,) * _nd)


# --------------------------------------------------------------------------- #
# Wrapper: parameter re-layout + single pallas_call                            #
# --------------------------------------------------------------------------- #
def tfs_dist_forward(params, xc, yc, xt, *, nhead, nlayers):
    B, Nc, dim_x = xc.shape
    dim_yc = yc.shape[-1]
    _, Nt, _ = xt.shape

    (we1, eb1), (we2, eb2), (we3, eb3) = params["encoder"]
    (qw1, qb1), (qw2, qb2), (qw3, qb3) = params["q_encoder"]
    (dw1, db1), (dw2, db2), (dw3, db3) = params["decoder"]
    (wq, bq, wk, bk, wv, bv, wo, bo, g1, bln1, w1, b1, g2, bln2) = params["block"]

    dim_h = we3.shape[1]
    dim_yt = dw3.shape[1]
    D = dim_h + dim_x
    assert D % nhead == 0, "attention feature dim must be divisible by nhead"
    hd = D // nhead

    # --- wrapper-side parameter re-layout (tiny, done inside the same jit) ---
    # split first-layer weights so the kernel never needs an XLA concat:
    we1x, we1y = we1[:dim_x], we1[dim_x:]          # encoder:  xc@W + yc@W
    dw1z, dw1q = dw1[:dim_h], dw1[dim_h:]          # decoder:  z@W  + q@W
    # per-head MHA weights (avoids unaligned width-hd lane slices in-kernel):
    def head_cols(w):   # (D, D) -> (nhead, D, hd), [h] == w[:, h*hd:(h+1)*hd]
        return jnp.transpose(w.reshape(D, nhead, hd), (1, 0, 2))
    def head_bias(b):   # (1, D) -> (nhead, 1, hd)
        return jnp.transpose(b.reshape(1, nhead, hd), (1, 0, 2))
    wqh, wkh, wvh = head_cols(wq), head_cols(wk), head_cols(wv)
    bqh, bkh, bvh = head_bias(bq), head_bias(bk), head_bias(bv)
    woh = wo.reshape(nhead, hd, D)                 # [h] == wo[h*hd:(h+1)*hd, :]
    # lane-dense final projection (padded to 128 output lanes):
    dw3p = jnp.zeros((dim_h, _OUT_PAD), dw3.dtype).at[:, :dim_yt].set(dw3)
    db3p = jnp.zeros((1, _OUT_PAD), db3.dtype).at[:, :dim_yt].set(db3)

    weights = [we1x, we1y, eb1, we2, eb2, we3, eb3,
               qw1, qb1, qw2, qb2, qw3, qb3,
               wqh, bqh, wkh, bkh, wvh, bvh,
               woh, bo, g1, bln1, w1, b1, g2, bln2,
               dw1z, dw1q, db1, dw2, db2, dw3p, db3p]

    kernel = functools.partial(_fused_tfs_dist_kernel, nhead, nlayers, dim_x, dim_h)

    out = pl.pallas_call(
        kernel,
        out_shape=jax.ShapeDtypeStruct((B, Nt, _OUT_PAD), jnp.float32),
        grid=(B,),
        in_specs=[pl.BlockSpec(memory_space=pltpu.MemorySpace.SMEM),            # log_strength
                  pl.BlockSpec((1, Nc, dim_x), lambda b: (b, 0, 0)),            # xc
                  pl.BlockSpec((1, Nc, dim_yc), lambda b: (b, 0, 0)),           # yc
                  pl.BlockSpec((1, Nt, dim_x), lambda b: (b, 0, 0))]            # xt
                 + [_full_block(a) for a in weights],
        out_specs=pl.BlockSpec((1, Nt, _OUT_PAD), lambda b: (b, 0, 0)),
        compiler_params=pltpu.CompilerParams(dimension_semantics=("parallel",)),
    )(params["log_strength"], xc, yc, xt, *weights)

    return out[..., :dim_yt]


# --------------------------------------------------------------------------- #
# Parameter init (matches the assumed Net / TFSEncoder structure)              #
# --------------------------------------------------------------------------- #
def _init_linear(key, din, dout, scale=0.1):
    w = scale * jax.random.normal(key, (din, dout), jnp.float32)
    b = jnp.zeros((1, dout), jnp.float32)
    return w, b


def _init_net(key, dims):
    keys = jax.random.split(key, len(dims) - 1)
    return tuple(_init_linear(k, di, do) for k, di, do in zip(keys, dims[:-1], dims[1:]))


def _init_block(key, d_in, d_h):
    ks = jax.random.split(key, 5)
    wq, bq = _init_linear(ks[0], d_in, d_in)
    wk, bk = _init_linear(ks[1], d_in, d_in)
    wv, bv = _init_linear(ks[2], d_in, d_in)
    wo, bo = _init_linear(ks[3], d_in, d_in)
    g1, be1 = jnp.ones((1, d_in), jnp.float32), jnp.zeros((1, d_in), jnp.float32)
    w1, b1 = _init_linear(ks[4], d_in, d_h)
    g2, be2 = jnp.ones((1, d_h), jnp.float32), jnp.zeros((1, d_h), jnp.float32)
    return (wq, bq, wk, bk, wv, bv, wo, bo, g1, be1, w1, b1, g2, be2)


def init_tfs_dist(key, dim_x, dim_yc, dim_yt, dim_h):
    k_enc, k_dec, k_q, k_blk = jax.random.split(key, 4)
    return {
        "encoder": _init_net(k_enc, [dim_x + dim_yc, dim_h, dim_h, dim_h]),
        "decoder": _init_net(k_dec, [2 * dim_h, dim_h, dim_h, dim_yt]),
        "q_encoder": _init_net(k_q, [dim_x, dim_h, dim_h, dim_h]),
        "block": _init_block(k_blk, dim_h + dim_x, dim_h),   # share_blocks=True
        "log_strength": jnp.zeros((1,), jnp.float32),
    }


if __name__ == "__main__":
    dim_x, dim_yc, dim_yt = 4, 3, 2
    dim_h, nhead, nlayers = 32, 4, 2
    B, Nc, Nt = 2, 16, 8

    key = jax.random.PRNGKey(0)
    k_p, k_xc, k_yc, k_xt = jax.random.split(key, 4)
    params = init_tfs_dist(k_p, dim_x, dim_yc, dim_yt, dim_h)

    xc = jax.random.normal(k_xc, (B, Nc, dim_x), jnp.float32)
    yc = jax.random.normal(k_yc, (B, Nc, dim_yc), jnp.float32)
    xt = jax.random.normal(k_xt, (B, Nt, dim_x), jnp.float32)

    fwd = jax.jit(functools.partial(tfs_dist_forward, nhead=nhead, nlayers=nlayers))
    out = jax.block_until_ready(fwd(params, xc, yc, xt))

    assert out.shape == (B, Nt, dim_yt), out.shape
    assert bool(jnp.all(jnp.isfinite(out)))
    print("KERNEL_OK")
</pallas_src>

<mosaic_0001>
module attributes {stable_mosaic.version = 11 : i64} {
  func.func @_fused_tfs_dist_kernel(%arg0: i32, %arg1: memref<1xf32, #tpu.memory_space<smem>>, %arg2: memref<1x16x4xf32, #tpu.memory_space<vmem>>, %arg3: memref<1x16x3xf32, #tpu.memory_space<vmem>>, %arg4: memref<1x8x4xf32, #tpu.memory_space<vmem>>, %arg5: memref<4x32xf32, #tpu.memory_space<vmem>>, %arg6: memref<3x32xf32, #tpu.memory_space<vmem>>, %arg7: memref<1x32xf32, #tpu.memory_space<vmem>>, %arg8: memref<32x32xf32, #tpu.memory_space<vmem>>, %arg9: memref<1x32xf32, #tpu.memory_space<vmem>>, %arg10: memref<32x32xf32, #tpu.memory_space<vmem>>, %arg11: memref<1x32xf32, #tpu.memory_space<vmem>>, %arg12: memref<4x32xf32, #tpu.memory_space<vmem>>, %arg13: memref<1x32xf32, #tpu.memory_space<vmem>>, %arg14: memref<32x32xf32, #tpu.memory_space<vmem>>, %arg15: memref<1x32xf32, #tpu.memory_space<vmem>>, %arg16: memref<32x32xf32, #tpu.memory_space<vmem>>, %arg17: memref<1x32xf32, #tpu.memory_space<vmem>>, %arg18: memref<4x36x9xf32, #tpu.memory_space<vmem>>, %arg19: memref<4x1x9xf32, #tpu.memory_space<vmem>>, %arg20: memref<4x36x9xf32, #tpu.memory_space<vmem>>, %arg21: memref<4x1x9xf32, #tpu.memory_space<vmem>>, %arg22: memref<4x36x9xf32, #tpu.memory_space<vmem>>, %arg23: memref<4x1x9xf32, #tpu.memory_space<vmem>>, %arg24: memref<4x9x36xf32, #tpu.memory_space<vmem>>, %arg25: memref<1x36xf32, #tpu.memory_space<vmem>>, %arg26: memref<1x36xf32, #tpu.memory_space<vmem>>, %arg27: memref<1x36xf32, #tpu.memory_space<vmem>>, %arg28: memref<36x32xf32, #tpu.memory_space<vmem>>, %arg29: memref<1x32xf32, #tpu.memory_space<vmem>>, %arg30: memref<1x32xf32, #tpu.memory_space<vmem>>, %arg31: memref<1x32xf32, #tpu.memory_space<vmem>>, %arg32: memref<32x32xf32, #tpu.memory_space<vmem>>, %arg33: memref<32x32xf32, #tpu.memory_space<vmem>>, %arg34: memref<1x32xf32, #tpu.memory_space<vmem>>, %arg35: memref<32x32xf32, #tpu.memory_space<vmem>>, %arg36: memref<1x32xf32, #tpu.memory_space<vmem>>, %arg37: memref<32x128xf32, #tpu.memory_space<vmem>>, %arg38: memref<1x128xf32, #tpu.memory_space<vmem>>, %arg39: memref<1x8x128xf32, #tpu.memory_space<vmem>>) attributes {dimension_semantics = [#tpu.dimension_semantics<parallel>], iteration_bounds = array<i64: 2>, scalar_prefetch = 0 : i64, scratch_operands = 0 : i64, tpu.core_type = #tpu.core_type<tc>, window_params = [{transform_indices = @transform_0, window_bounds = array<i64: 1>}, {transform_indices = @transform_1, window_bounds = array<i64: 1, 16, 4>}, {transform_indices = @transform_2, window_bounds = array<i64: 1, 16, 3>}, {transform_indices = @transform_3, window_bounds = array<i64: 1, 8, 4>}, {pipeline_mode = #tpu.pipeline_mode<synchronous>, transform_indices = @transform_4, window_bounds = array<i64: 4, 32>}, {pipeline_mode = #tpu.pipeline_mode<synchronous>, transform_indices = @transform_5, window_bounds = array<i64: 3, 32>}, {pipeline_mode = #tpu.pipeline_mode<synchronous>, transform_indices = @transform_6, window_bounds = array<i64: 1, 32>}, {pipeline_mode = #tpu.pipeline_mode<synchronous>, transform_indices = @transform_7, window_bounds = array<i64: 32, 32>}, {pipeline_mode = #tpu.pipeline_mode<synchronous>, transform_indices = @transform_8, window_bounds = array<i64: 1, 32>}, {pipeline_mode = #tpu.pipeline_mode<synchronous>, transform_indices = @transform_9, window_bounds = array<i64: 32, 32>}, {pipeline_mode = #tpu.pipeline_mode<synchronous>, transform_indices = @transform_10, window_bounds = array<i64: 1, 32>}, {pipeline_mode = #tpu.pipeline_mode<synchronous>, transform_indices = @transform_11, window_bounds = array<i64: 4, 32>}, {pipeline_mode = #tpu.pipeline_mode<synchronous>, transform_indices = @transform_12, window_bounds = array<i64: 1, 32>}, {pipeline_mode = #tpu.pipeline_mode<synchronous>, transform_indices = @transform_13, window_bounds = array<i64: 32, 32>}, {pipeline_mode = #tpu.pipeline_mode<synchronous>, transform_indices = @transform_14, window_bounds = array<i64: 1, 32>}, {pipeline_mode = #tpu.pipeline_mode<synchronous>, transform_indices = @transform_15, window_bounds = array<i64: 32, 32>}, {pipeline_mode = #tpu.pipeline_mode<synchronous>, transform_indices = @transform_16, window_bounds = array<i64: 1, 32>}, {pipeline_mode = #tpu.pipeline_mode<synchronous>, transform_indices = @transform_17, window_bounds = array<i64: 4, 36, 9>}, {pipeline_mode = #tpu.pipeline_mode<synchronous>, transform_indices = @transform_18, window_bounds = array<i64: 4, 1, 9>}, {pipeline_mode = #tpu.pipeline_mode<synchronous>, transform_indices = @transform_19, window_bounds = array<i64: 4, 36, 9>}, {pipeline_mode = #tpu.pipeline_mode<synchronous>, transform_indices = @transform_20, window_bounds = array<i64: 4, 1, 9>}, {pipeline_mode = #tpu.pipeline_mode<synchronous>, transform_indices = @transform_21, window_bounds = array<i64: 4, 36, 9>}, {pipeline_mode = #tpu.pipeline_mode<synchronous>, transform_indices = @transform_22, window_bounds = array<i64: 4, 1, 9>}, {pipeline_mode = #tpu.pipeline_mode<synchronous>, transform_indices = @transform_23, window_bounds = array<i64: 4, 9, 36>}, {pipeline_mode = #tpu.pipeline_mode<synchronous>, transform_indices = @transform_24, window_bounds = array<i64: 1, 36>}, {pipeline_mode = #tpu.pipeline_mode<synchronous>, transform_indices = @transform_25, window_bounds = array<i64: 1, 36>}, {pipeline_mode = #tpu.pipeline_mode<synchronous>, transform_indices = @transform_26, window_bounds = array<i64: 1, 36>}, {pipeline_mode = #tpu.pipeline_mode<synchronous>, transform_indices = @transform_27, window_bounds = array<i64: 36, 32>}, {pipeline_mode = #tpu.pipeline_mode<synchronous>, transform_indices = @transform_28, window_bounds = array<i64: 1, 32>}, {pipeline_mode = #tpu.pipeline_mode<synchronous>, transform_indices = @transform_29, window_bounds = array<i64: 1, 32>}, {pipeline_mode = #tpu.pipeline_mode<synchronous>, transform_indices = @transform_30, window_bounds = array<i64: 1, 32>}, {pipeline_mode = #tpu.pipeline_mode<synchronous>, transform_indices = @transform_31, window_bounds = array<i64: 32, 32>}, {pipeline_mode = #tpu.pipeline_mode<synchronous>, transform_indices = @transform_32, window_bounds = array<i64: 32, 32>}, {pipeline_mode = #tpu.pipeline_mode<synchronous>, transform_indices = @transform_33, window_bounds = array<i64: 1, 32>}, {pipeline_mode = #tpu.pipeline_mode<synchronous>, transform_indices = @transform_34, window_bounds = array<i64: 32, 32>}, {pipeline_mode = #tpu.pipeline_mode<synchronous>, transform_indices = @transform_35, window_bounds = array<i64: 1, 32>}, {pipeline_mode = #tpu.pipeline_mode<synchronous>, transform_indices = @transform_36, window_bounds = array<i64: 32, 128>}, {pipeline_mode = #tpu.pipeline_mode<synchronous>, transform_indices = @transform_37, window_bounds = array<i64: 1, 128>}, {transform_indices = @transform_38, window_bounds = array<i64: 1, 8, 128>}]} {
    %c0 = arith.constant 0 : index
    %c0_0 = arith.constant 0 : index
    %c0_1 = arith.constant 0 : index
    %0 = vector.load %arg2[%c0, %c0_0, %c0_1] : memref<1x16x4xf32, #tpu.memory_space<vmem>>, vector<1x16x4xf32>
    %1 = vector.shape_cast %0 : vector<1x16x4xf32> to vector<16x4xf32>
    %c0_2 = arith.constant 0 : index
    %c0_3 = arith.constant 0 : index
    %c0_4 = arith.constant 0 : index
    %2 = vector.load %arg3[%c0_2, %c0_3, %c0_4] : memref<1x16x3xf32, #tpu.memory_space<vmem>>, vector<1x16x3xf32>
    %3 = vector.shape_cast %2 : vector<1x16x3xf32> to vector<16x3xf32>
    %c0_5 = arith.constant 0 : index
    %c0_6 = arith.constant 0 : index
    %c0_7 = arith.constant 0 : index
    %4 = vector.load %arg4[%c0_5, %c0_6, %c0_7] : memref<1x8x4xf32, #tpu.memory_space<vmem>>, vector<1x8x4xf32>
    %5 = vector.shape_cast %4 : vector<1x8x4xf32> to vector<8x4xf32>
    %c0_8 = arith.constant 0 : index
    %c0_9 = arith.constant 0 : index
    %6 = vector.load %arg5[%c0_8, %c0_9] : memref<4x32xf32, #tpu.memory_space<vmem>>, vector<4x32xf32>
    %cst = arith.constant dense<0.000000e+00> : vector<16x32xf32>
    %7 = tpu.matmul %1, %6, %cst {dimension_numbers = #tpu.dot_dimension_numbers<[1], [0], [0], [1], [0, 0, 1, 1], [], []>} : vector<16x4xf32>, vector<4x32xf32>, vector<16x32xf32> -> vector<16x32xf32>
    %c0_10 = arith.constant 0 : index
    %c0_11 = arith.constant 0 : index
    %8 = vector.load %arg6[%c0_10, %c0_11] : memref<3x32xf32, #tpu.memory_space<vmem>>, vector<3x32xf32>
    %cst_12 = arith.constant dense<0.000000e+00> : vector<16x32xf32>
    %9 = tpu.matmul %3, %8, %cst_12 {dimension_numbers = #tpu.dot_dimension_numbers<[1], [0], [0], [1], [0, 0, 1, 1], [], []>} : vector<16x3xf32>, vector<3x32xf32>, vector<16x32xf32> -> vector<16x32xf32>
    %10 = arith.addf %7, %9 : vector<16x32xf32>
    %c0_13 = arith.constant 0 : index
    %c0_14 = arith.constant 0 : index
    %11 = vector.load %arg7[%c0_13, %c0_14] : memref<1x32xf32, #tpu.memory_space<vmem>>, vector<1x32xf32>
    %12 = vector.broadcast %11 : vector<1x32xf32> to vector<16x32xf32>
    %13 = arith.addf %10, %12 : vector<16x32xf32>
    %cst_15 = arith.constant 0.000000e+00 : f32
    %14 = vector.broadcast %cst_15 : f32 to vector<16x32xf32>
    %15 = arith.maximumf %13, %14 : vector<16x32xf32>
    %c0_16 = arith.constant 0 : index
    %c0_17 = arith.constant 0 : index
    %16 = vector.load %arg8[%c0_16, %c0_17] : memref<32x32xf32, #tpu.memory_space<vmem>>, vector<32x32xf32>
    %cst_18 = arith.constant dense<0.000000e+00> : vector<16x32xf32>
    %17 = tpu.matmul %15, %16, %cst_18 {dimension_numbers = #tpu.dot_dimension_numbers<[1], [0], [0], [1], [0, 0, 1, 1], [], []>} : vector<16x32xf32>, vector<32x32xf32>, vector<16x32xf32> -> vector<16x32xf32>
    %c0_19 = arith.constant 0 : index
    %c0_20 = arith.constant 0 : index
    %18 = vector.load %arg9[%c0_19, %c0_20] : memref<1x32xf32, #tpu.memory_space<vmem>>, vector<1x32xf32>
    %19 = vector.broadcast %18 : vector<1x32xf32> to vector<16x32xf32>
    %20 = arith.addf %17, %19 : vector<16x32xf32>
    %cst_21 = arith.constant 0.000000e+00 : f32
    %21 = vector.broadcast %cst_21 : f32 to vector<16x32xf32>
    %22 = arith.maximumf %20, %21 : vector<16x32xf32>
    %c0_22 = arith.constant 0 : index
    %c0_23 = arith.constant 0 : index
    %23 = vector.load %arg10[%c0_22, %c0_23] : memref<32x32xf32, #tpu.memory_space<vmem>>, vector<32x32xf32>
    %cst_24 = arith.constant dense<0.000000e+00> : vector<16x32xf32>
    %24 = tpu.matmul %22, %23, %cst_24 {dimension_numbers = #tpu.dot_dimension_numbers<[1], [0], [0], [1], [0, 0, 1, 1], [], []>} : vector<16x32xf32>, vector<32x32xf32>, vector<16x32xf32> -> vector<16x32xf32>
    %c0_25 = arith.constant 0 : index
    %c0_26 = arith.constant 0 : index
    %25 = vector.load %arg11[%c0_25, %c0_26] : memref<1x32xf32, #tpu.memory_space<vmem>>, vector<1x32xf32>
    %26 = vector.broadcast %25 : vector<1x32xf32> to vector<16x32xf32>
    %27 = arith.addf %24, %26 : vector<16x32xf32>
    %28 = tpu.concatenate %1, %27 in 1 : vector<16x4xf32>, vector<16x32xf32> -> vector<16x36xf32>
    %cst_27 = arith.constant 0.000000e+00 : f32
    %29 = vector.broadcast %cst_27 : f32 to vector<16x36xf32>
    %c0_28 = arith.constant 0 : index
    %c0_29 = arith.constant 0 : index
    %c0_30 = arith.constant 0 : index
    %30 = vector.load %arg18[%c0_28, %c0_29, %c0_30] : memref<4x36x9xf32, #tpu.memory_space<vmem>>, vector<1x36x9xf32>
    %31 = vector.shape_cast %30 : vector<1x36x9xf32> to vector<36x9xf32>
    %cst_31 = arith.constant dense<0.000000e+00> : vector<16x9xf32>
    %32 = tpu.matmul %28, %31, %cst_31 {dimension_numbers = #tpu.dot_dimension_numbers<[1], [0], [0], [1], [0, 0, 1, 1], [], []>} : vector<16x36xf32>, vector<36x9xf32>, vector<16x9xf32> -> vector<16x9xf32>
    %c0_32 = arith.constant 0 : index
    %c0_33 = arith.constant 0 : index
    %c0_34 = arith.constant 0 : index
    %33 = vector.load %arg19[%c0_32, %c0_33, %c0_34] : memref<4x1x9xf32, #tpu.memory_space<vmem>>, vector<1x1x9xf32>
    %34 = vector.shape_cast %33 : vector<1x1x9xf32> to vector<1x9xf32>
    %35 = vector.broadcast %34 : vector<1x9xf32> to vector<16x9xf32>
    %36 = arith.addf %32, %35 : vector<16x9xf32>
    %c0_35 = arith.constant 0 : index
    %c0_36 = arith.constant 0 : index
    %c0_37 = arith.constant 0 : index
    %37 = vector.load %arg20[%c0_35, %c0_36, %c0_37] : memref<4x36x9xf32, #tpu.memory_space<vmem>>, vector<1x36x9xf32>
    %38 = vector.shape_cast %37 : vector<1x36x9xf32> to vector<36x9xf32>
    %cst_38 = arith.constant dense<0.000000e+00> : vector<16x9xf32>
    %39 = tpu.matmul %28, %38, %cst_38 {dimension_numbers = #tpu.dot_dimension_numbers<[1], [0], [0], [1], [0, 0, 1, 1], [], []>} : vector<16x36xf32>, vector<36x9xf32>, vector<16x9xf32> -> vector<16x9xf32>
    %c0_39 = arith.constant 0 : index
    %c0_40 = arith.constant 0 : index
    %c0_41 = arith.constant 0 : index
    %40 = vector.load %arg21[%c0_39, %c0_40, %c0_41] : memref<4x1x9xf32, #tpu.memory_space<vmem>>, vector<1x1x9xf32>
    %41 = vector.shape_cast %40 : vector<1x1x9xf32> to vector<1x9xf32>
    %42 = vector.broadcast %41 : vector<1x9xf32> to vector<16x9xf32>
    %43 = arith.addf %39, %42 : vector<16x9xf32>
    %c0_42 = arith.constant 0 : index
    %c0_43 = arith.constant 0 : index
    %c0_44 = arith.constant 0 : index
    %44 = vector.load %arg22[%c0_42, %c0_43, %c0_44] : memref<4x36x9xf32, #tpu.memory_space<vmem>>, vector<1x36x9xf32>
    %45 = vector.shape_cast %44 : vector<1x36x9xf32> to vector<36x9xf32>
    %cst_45 = arith.constant dense<0.000000e+00> : vector<16x9xf32>
    %46 = tpu.matmul %28, %45, %cst_45 {dimension_numbers = #tpu.dot_dimension_numbers<[1], [0], [0], [1], [0, 0, 1, 1], [], []>} : vector<16x36xf32>, vector<36x9xf32>, vector<16x9xf32> -> vector<16x9xf32>
    %c0_46 = arith.constant 0 : index
    %c0_47 = arith.constant 0 : index
    %c0_48 = arith.constant 0 : index
    %47 = vector.load %arg23[%c0_46, %c0_47, %c0_48] : memref<4x1x9xf32, #tpu.memory_space<vmem>>, vector<1x1x9xf32>
    %48 = vector.shape_cast %47 : vector<1x1x9xf32> to vector<1x9xf32>
    %49 = vector.broadcast %48 : vector<1x9xf32> to vector<16x9xf32>
    %50 = arith.addf %46, %49 : vector<16x9xf32>
    %cst_49 = arith.constant dense<0.000000e+00> : vector<16x16xf32>
    %51 = tpu.matmul %36, %43, %cst_49 {dimension_numbers = #tpu.dot_dimension_numbers<[1], [1], [0], [0], [0, 0, 1, 0], [], []>} : vector<16x9xf32>, vector<16x9xf32>, vector<16x16xf32> -> vector<16x16xf32>
    %cst_50 = arith.constant 0.333333343 : f32
    %52 = vector.broadcast %cst_50 : f32 to vector<16x16xf32>
    %53 = arith.mulf %51, %52 : vector<16x16xf32>
    %cst_51 = arith.constant dense<0xFF800000> : vector<16xf32>
    %54 = vector.multi_reduction <maximumf>, %53, %cst_51 [1] : vector<16x16xf32> to vector<16xf32>
    %55 = vector.shape_cast %54 : vector<16xf32> to vector<16x1xf32>
    %56 = vector.broadcast %55 : vector<16x1xf32> to vector<16x16xf32>
    %57 = arith.subf %53, %56 : vector<16x16xf32>
    %58 = math.exp %57 : vector<16x16xf32>
    %cst_52 = arith.constant dense<0.000000e+00> : vector<16xf32>
    %59 = vector.multi_reduction <add>, %58, %cst_52 [1] : vector<16x16xf32> to vector<16xf32>
    %60 = vector.shape_cast %59 : vector<16xf32> to vector<16x1xf32>
    %61 = tpu.reciprocal %60 {approx = true} : vector<16x1xf32> -> vector<16x1xf32>
    %62 = vector.broadcast %61 : vector<16x1xf32> to vector<16x16xf32>
    %63 = arith.mulf %58, %62 : vector<16x16xf32>
    %cst_53 = arith.constant dense<0.000000e+00> : vector<16x9xf32>
    %64 = tpu.matmul %63, %50, %cst_53 {dimension_numbers = #tpu.dot_dimension_numbers<[1], [0], [0], [1], [0, 0, 1, 1], [], []>} : vector<16x16xf32>, vector<16x9xf32>, vector<16x9xf32> -> vector<16x9xf32>
    %c0_54 = arith.constant 0 : index
    %c0_55 = arith.constant 0 : index
    %c0_56 = arith.constant 0 : index
    %65 = vector.load %arg24[%c0_54, %c0_55, %c0_56] : memref<4x9x36xf32, #tpu.memory_space<vmem>>, vector<1x9x36xf32>
    %66 = vector.shape_cast %65 : vector<1x9x36xf32> to vector<9x36xf32>
    %cst_57 = arith.constant dense<0.000000e+00> : vector<16x36xf32>
    %67 = tpu.matmul %64, %66, %cst_57 {dimension_numbers = #tpu.dot_dimension_numbers<[1], [0], [0], [1], [0, 0, 1, 1], [], []>} : vector<16x9xf32>, vector<9x36xf32>, vector<16x36xf32> -> vector<16x36xf32>
    %68 = arith.addf %29, %67 : vector<16x36xf32>
    %c1 = arith.constant 1 : index
    %c0_58 = arith.constant 0 : index
    %c0_59 = arith.constant 0 : index
    %69 = vector.load %arg18[%c1, %c0_58, %c0_59] : memref<4x36x9xf32, #tpu.memory_space<vmem>>, vector<1x36x9xf32>
    %70 = vector.shape_cast %69 : vector<1x36x9xf32> to vector<36x9xf32>
    %cst_60 = arith.constant dense<0.000000e+00> : vector<16x9xf32>
    %71 = tpu.matmul %28, %70, %cst_60 {dimension_numbers = #tpu.dot_dimension_numbers<[1], [0], [0], [1], [0, 0, 1, 1], [], []>} : vector<16x36xf32>, vector<36x9xf32>, vector<16x9xf32> -> vector<16x9xf32>
    %c1_61 = arith.constant 1 : index
    %c0_62 = arith.constant 0 : index
    %c0_63 = arith.constant 0 : index
    %72 = vector.load %arg19[%c1_61, %c0_62, %c0_63] : memref<4x1x9xf32, #tpu.memory_space<vmem>>, vector<1x1x9xf32>
    %73 = vector.shape_cast %72 : vector<1x1x9xf32> to vector<1x9xf32>
    %74 = vector.broadcast %73 : vector<1x9xf32> to vector<16x9xf32>
    %75 = arith.addf %71, %74 : vector<16x9xf32>
    %c1_64 = arith.constant 1 : index
    %c0_65 = arith.constant 0 : index
    %c0_66 = arith.constant 0 : index
    %76 = vector.load %arg20[%c1_64, %c0_65, %c0_66] : memref<4x36x9xf32, #tpu.memory_space<vmem>>, vector<1x36x9xf32>
    %77 = vector.shape_cast %76 : vector<1x36x9xf32> to vector<36x9xf32>
    %cst_67 = arith.constant dense<0.000000e+00> : vector<16x9xf32>
    %78 = tpu.matmul %28, %77, %cst_67 {dimension_numbers = #tpu.dot_dimension_numbers<[1], [0], [0], [1], [0, 0, 1, 1], [], []>} : vector<16x36xf32>, vector<36x9xf32>, vector<16x9xf32> -> vector<16x9xf32>
    %c1_68 = arith.constant 1 : index
    %c0_69 = arith.constant 0 : index
    %c0_70 = arith.constant 0 : index
    %79 = vector.load %arg21[%c1_68, %c0_69, %c0_70] : memref<4x1x9xf32, #tpu.memory_space<vmem>>, vector<1x1x9xf32>
    %80 = vector.shape_cast %79 : vector<1x1x9xf32> to vector<1x9xf32>
    %81 = vector.broadcast %80 : vector<1x9xf32> to vector<16x9xf32>
    %82 = arith.addf %78, %81 : vector<16x9xf32>
    %c1_71 = arith.constant 1 : index
    %c0_72 = arith.constant 0 : index
    %c0_73 = arith.constant 0 : index
    %83 = vector.load %arg22[%c1_71, %c0_72, %c0_73] : memref<4x36x9xf32, #tpu.memory_space<vmem>>, vector<1x36x9xf32>
    %84 = vector.shape_cast %83 : vector<1x36x9xf32> to vector<36x9xf32>
    %cst_74 = arith.constant dense<0.000000e+00> : vector<16x9xf32>
    %85 = tpu.matmul %28, %84, %cst_74 {dimension_numbers = #tpu.dot_dimension_numbers<[1], [0], [0], [1], [0, 0, 1, 1], [], []>} : vector<16x36xf32>, vector<36x9xf32>, vector<16x9xf32> -> vector<16x9xf32>
    %c1_75 = arith.constant 1 : index
    %c0_76 = arith.constant 0 : index
    %c0_77 = arith.constant 0 : index
    %86 = vector.load %arg23[%c1_75, %c0_76, %c0_77] : memref<4x1x9xf32, #tpu.memory_space<vmem>>, vector<1x1x9xf32>
    %87 = vector.shape_cast %86 : vector<1x1x9xf32> to vector<1x9xf32>
    %88 = vector.broadcast %87 : vector<1x9xf32> to vector<16x9xf32>
    %89 = arith.addf %85, %88 : vector<16x9xf32>
    %cst_78 = arith.constant dense<0.000000e+00> : vector<16x16xf32>
    %90 = tpu.matmul %75, %82, %cst_78 {dimension_numbers = #tpu.dot_dimension_numbers<[1], [1], [0], [0], [0, 0, 1, 0], [], []>} : vector<16x9xf32>, vector<16x9xf32>, vector<16x16xf32> -> vector<16x16xf32>
    %cst_79 = arith.constant 0.333333343 : f32
    %91 = vector.broadcast %cst_79 : f32 to vector<16x16xf32>
    %92 = arith.mulf %90, %91 : vector<16x16xf32>
    %cst_80 = arith.constant dense<0xFF800000> : vector<16xf32>
    %93 = vector.multi_reduction <maximumf>, %92, %cst_80 [1] : vector<16x16xf32> to vector<16xf32>
    %94 = vector.shape_cast %93 : vector<16xf32> to vector<16x1xf32>
    %95 = vector.broadcast %94 : vector<16x1xf32> to vector<16x16xf32>
    %96 = arith.subf %92, %95 : vector<16x16xf32>
    %97 = math.exp %96 : vector<16x16xf32>
    %cst_81 = arith.constant dense<0.000000e+00> : vector<16xf32>
    %98 = vector.multi_reduction <add>, %97, %cst_81 [1] : vector<16x16xf32> to vector<16xf32>
    %99 = vector.shape_cast %98 : vector<16xf32> to vector<16x1xf32>
    %100 = tpu.reciprocal %99 {approx = true} : vector<16x1xf32> -> vector<16x1xf32>
    %101 = vector.broadcast %100 : vector<16x1xf32> to vector<16x16xf32>
    %102 = arith.mulf %97, %101 : vector<16x16xf32>
    %cst_82 = arith.constant dense<0.000000e+00> : vector<16x9xf32>
    %103 = tpu.matmul %102, %89, %cst_82 {dimension_numbers = #tpu.dot_dimension_numbers<[1], [0], [0], [1], [0, 0, 1, 1], [], []>} : vector<16x16xf32>, vector<16x9xf32>, vector<16x9xf32> -> vector<16x9xf32>
    %c1_83 = arith.constant 1 : index
    %c0_84 = arith.constant 0 : index
    %c0_85 = arith.constant 0 : index
    %104 = vector.load %arg24[%c1_83, %c0_84, %c0_85] : memref<4x9x36xf32, #tpu.memory_space<vmem>>, vector<1x9x36xf32>
    %105 = vector.shape_cast %104 : vector<1x9x36xf32> to vector<9x36xf32>
    %cst_86 = arith.constant dense<0.000000e+00> : vector<16x36xf32>
    %106 = tpu.matmul %103, %105, %cst_86 {dimension_numbers = #tpu.dot_dimension_numbers<[1], [0], [0], [1], [0, 0, 1, 1], [], []>} : vector<16x9xf32>, vector<9x36xf32>, vector<16x36xf32> -> vector<16x36xf32>
    %107 = arith.addf %68, %106 : vector<16x36xf32>
    %c2 = arith.constant 2 : index
    %c0_87 = arith.constant 0 : index
    %c0_88 = arith.constant 0 : index
    %108 = vector.load %arg18[%c2, %c0_87, %c0_88] : memref<4x36x9xf32, #tpu.memory_space<vmem>>, vector<1x36x9xf32>
    %109 = vector.shape_cast %108 : vector<1x36x9xf32> to vector<36x9xf32>
    %cst_89 = arith.constant dense<0.000000e+00> : vector<16x9xf32>
    %110 = tpu.matmul %28, %109, %cst_89 {dimension_numbers = #tpu.dot_dimension_numbers<[1], [0], [0], [1], [0, 0, 1, 1], [], []>} : vector<16x36xf32>, vector<36x9xf32>, vector<16x9xf32> -> vector<16x9xf32>
    %c2_90 = arith.constant 2 : index
    %c0_91 = arith.constant 0 : index
    %c0_92 = arith.constant 0 : index
    %111 = vector.load %arg19[%c2_90, %c0_91, %c0_92] : memref<4x1x9xf32, #tpu.memory_space<vmem>>, vector<1x1x9xf32>
    %112 = vector.shape_cast %111 : vector<1x1x9xf32> to vector<1x9xf32>
    %113 = vector.broadcast %112 : vector<1x9xf32> to vector<16x9xf32>
    %114 = arith.addf %110, %113 : vector<16x9xf32>
    %c2_93 = arith.constant 2 : index
    %c0_94 = arith.constant 0 : index
    %c0_95 = arith.constant 0 : index
    %115 = vector.load %arg20[%c2_93, %c0_94, %c0_95] : memref<4x36x9xf32, #tpu.memory_space<vmem>>, vector<1x36x9xf32>
    %116 = vector.shape_cast %115 : vector<1x36x9xf32> to vector<36x9xf32>
    %cst_96 = arith.constant dense<0.000000e+00> : vector<16x9xf32>
    %117 = tpu.matmul %28, %116, %cst_96 {dimension_numbers = #tpu.dot_dimension_numbers<[1], [0], [0], [1], [0, 0, 1, 1], [], []>} : vector<16x36xf32>, vector<36x9xf32>, vector<16x9xf32> -> vector<16x9xf32>
    %c2_97 = arith.constant 2 : index
    %c0_98 = arith.constant 0 : index
    %c0_99 = arith.constant 0 : index
    %118 = vector.load %arg21[%c2_97, %c0_98, %c0_99] : memref<4x1x9xf32, #tpu.memory_space<vmem>>, vector<1x1x9xf32>
    %119 = vector.shape_cast %118 : vector<1x1x9xf32> to vector<1x9xf32>
    %120 = vector.broadcast %119 : vector<1x9xf32> to vector<16x9xf32>
    %121 = arith.addf %117, %120 : vector<16x9xf32>
    %c2_100 = arith.constant 2 : index
    %c0_101 = arith.constant 0 : index
    %c0_102 = arith.constant 0 : index
    %122 = vector.load %arg22[%c2_100, %c0_101, %c0_102] : memref<4x36x9xf32, #tpu.memory_space<vmem>>, vector<1x36x9xf32>
    %123 = vector.shape_cast %122 : vector<1x36x9xf32> to vector<36x9xf32>
    %cst_103 = arith.constant dense<0.000000e+00> : vector<16x9xf32>
    %124 = tpu.matmul %28, %123, %cst_103 {dimension_numbers = #tpu.dot_dimension_numbers<[1], [0], [0], [1], [0, 0, 1, 1], [], []>} : vector<16x36xf32>, vector<36x9xf32>, vector<16x9xf32> -> vector<16x9xf32>
    %c2_104 = arith.constant 2 : index
    %c0_105 = arith.constant 0 : index
    %c0_106 = arith.constant 0 : index
    %125 = vector.load %arg23[%c2_104, %c0_105, %c0_106] : memref<4x1x9xf32, #tpu.memory_space<vmem>>, vector<1x1x9xf32>
    %126 = vector.shape_cast %125 : vector<1x1x9xf32> to vector<1x9xf32>
    %127 = vector.broadcast %126 : vector<1x9xf32> to vector<16x9xf32>
    %128 = arith.addf %124, %127 : vector<16x9xf32>
    %cst_107 = arith.constant dense<0.000000e+00> : vector<16x16xf32>
    %129 = tpu.matmul %114, %121, %cst_107 {dimension_numbers = #tpu.dot_dimension_numbers<[1], [1], [0], [0], [0, 0, 1, 0], [], []>} : vector<16x9xf32>, vector<16x9xf32>, vector<16x16xf32> -> vector<16x16xf32>
    %cst_108 = arith.constant 0.333333343 : f32
    %130 = vector.broadcast %cst_108 : f32 to vector<16x16xf32>
    %131 = arith.mulf %129, %130 : vector<16x16xf32>
    %cst_109 = arith.constant dense<0xFF800000> : vector<16xf32>
    %132 = vector.multi_reduction <maximumf>, %131, %cst_109 [1] : vector<16x16xf32> to vector<16xf32>
    %133 = vector.shape_cast %132 : vector<16xf32> to vector<16x1xf32>
    %134 = vector.broadcast %133 : vector<16x1xf32> to vector<16x16xf32>
    %135 = arith.subf %131, %134 : vector<16x16xf32>
    %136 = math.exp %135 : vector<16x16xf32>
    %cst_110 = arith.constant dense<0.000000e+00> : vector<16xf32>
    %137 = vector.multi_reduction <add>, %136, %cst_110 [1] : vector<16x16xf32> to vector<16xf32>
    %138 = vector.shape_cast %137 : vector<16xf32> to vector<16x1xf32>
    %139 = tpu.reciprocal %138 {approx = true} : vector<16x1xf32> -> vector<16x1xf32>
    %140 = vector.broadcast %139 : vector<16x1xf32> to vector<16x16xf32>
    %141 = arith.mulf %136, %140 : vector<16x16xf32>
    %cst_111 = arith.constant dense<0.000000e+00> : vector<16x9xf32>
    %142 = tpu.matmul %141, %128, %cst_111 {dimension_numbers = #tpu.dot_dimension_numbers<[1], [0], [0], [1], [0, 0, 1, 1], [], []>} : vector<16x16xf32>, vector<16x9xf32>, vector<16x9xf32> -> vector<16x9xf32>
    %c2_112 = arith.constant 2 : index
    %c0_113 = arith.constant 0 : index
    %c0_114 = arith.constant 0 : index
    %143 = vector.load %arg24[%c2_112, %c0_113, %c0_114] : memref<4x9x36xf32, #tpu.memory_space<vmem>>, vector<1x9x36xf32>
    %144 = vector.shape_cast %143 : vector<1x9x36xf32> to vector<9x36xf32>
    %cst_115 = arith.constant dense<0.000000e+00> : vector<16x36xf32>
    %145 = tpu.matmul %142, %144, %cst_115 {dimension_numbers = #tpu.dot_dimension_numbers<[1], [0], [0], [1], [0, 0, 1, 1], [], []>} : vector<16x9xf32>, vector<9x36xf32>, vector<16x36xf32> -> vector<16x36xf32>
    %146 = arith.addf %107, %145 : vector<16x36xf32>
    %c3 = arith.constant 3 : index
    %c0_116 = arith.constant 0 : index
    %c0_117 = arith.constant 0 : index
    %147 = vector.load %arg18[%c3, %c0_116, %c0_117] : memref<4x36x9xf32, #tpu.memory_space<vmem>>, vector<1x36x9xf32>
    %148 = vector.shape_cast %147 : vector<1x36x9xf32> to vector<36x9xf32>
    %cst_118 = arith.constant dense<0.000000e+00> : vector<16x9xf32>
    %149 = tpu.matmul %28, %148, %cst_118 {dimension_numbers = #tpu.dot_dimension_numbers<[1], [0], [0], [1], [0, 0, 1, 1], [], []>} : vector<16x36xf32>, vector<36x9xf32>, vector<16x9xf32> -> vector<16x9xf32>
    %c3_119 = arith.constant 3 : index
    %c0_120 = arith.constant 0 : index
    %c0_121 = arith.constant 0 : index
    %150 = vector.load %arg19[%c3_119, %c0_120, %c0_121] : memref<4x1x9xf32, #tpu.memory_space<vmem>>, vector<1x1x9xf32>
    %151 = vector.shape_cast %150 : vector<1x1x9xf32> to vector<1x9xf32>
    %152 = vector.broadcast %151 : vector<1x9xf32> to vector<16x9xf32>
    %153 = arith.addf %149, %152 : vector<16x9xf32>
    %c3_122 = arith.constant 3 : index
    %c0_123 = arith.constant 0 : index
    %c0_124 = arith.constant 0 : index
    %154 = vector.load %arg20[%c3_122, %c0_123, %c0_124] : memref<4x36x9xf32, #tpu.memory_space<vmem>>, vector<1x36x9xf32>
    %155 = vector.shape_cast %154 : vector<1x36x9xf32> to vector<36x9xf32>
    %cst_125 = arith.constant dense<0.000000e+00> : vector<16x9xf32>
    %156 = tpu.matmul %28, %155, %cst_125 {dimension_numbers = #tpu.dot_dimension_numbers<[1], [0], [0], [1], [0, 0, 1, 1], [], []>} : vector<16x36xf32>, vector<36x9xf32>, vector<16x9xf32> -> vector<16x9xf32>
    %c3_126 = arith.constant 3 : index
    %c0_127 = arith.constant 0 : index
    %c0_128 = arith.constant 0 : index
    %157 = vector.load %arg21[%c3_126, %c0_127, %c0_128] : memref<4x1x9xf32, #tpu.memory_space<vmem>>, vector<1x1x9xf32>
    %158 = vector.shape_cast %157 : vector<1x1x9xf32> to vector<1x9xf32>
    %159 = vector.broadcast %158 : vector<1x9xf32> to vector<16x9xf32>
    %160 = arith.addf %156, %159 : vector<16x9xf32>
    %c3_129 = arith.constant 3 : index
    %c0_130 = arith.constant 0 : index
    %c0_131 = arith.constant 0 : index
    %161 = vector.load %arg22[%c3_129, %c0_130, %c0_131] : memref<4x36x9xf32, #tpu.memory_space<vmem>>, vector<1x36x9xf32>
    %162 = vector.shape_cast %161 : vector<1x36x9xf32> to vector<36x9xf32>
    %cst_132 = arith.constant dense<0.000000e+00> : vector<16x9xf32>
    %163 = tpu.matmul %28, %162, %cst_132 {dimension_numbers = #tpu.dot_dimension_numbers<[1], [0], [0], [1], [0, 0, 1, 1], [], []>} : vector<16x36xf32>, vector<36x9xf32>, vector<16x9xf32> -> vector<16x9xf32>
    %c3_133 = arith.constant 3 : index
    %c0_134 = arith.constant 0 : index
    %c0_135 = arith.constant 0 : index
    %164 = vector.load %arg23[%c3_133, %c0_134, %c0_135] : memref<4x1x9xf32, #tpu.memory_space<vmem>>, vector<1x1x9xf32>
    %165 = vector.shape_cast %164 : vector<1x1x9xf32> to vector<1x9xf32>
    %166 = vector.broadcast %165 : vector<1x9xf32> to vector<16x9xf32>
    %167 = arith.addf %163, %166 : vector<16x9xf32>
    %cst_136 = arith.constant dense<0.000000e+00> : vector<16x16xf32>
    %168 = tpu.matmul %153, %160, %cst_136 {dimension_numbers = #tpu.dot_dimension_numbers<[1], [1], [0], [0], [0, 0, 1, 0], [], []>} : vector<16x9xf32>, vector<16x9xf32>, vector<16x16xf32> -> vector<16x16xf32>
    %cst_137 = arith.constant 0.333333343 : f32
    %169 = vector.broadcast %cst_137 : f32 to vector<16x16xf32>
    %170 = arith.mulf %168, %169 : vector<16x16xf32>
    %cst_138 = arith.constant dense<0xFF800000> : vector<16xf32>
    %171 = vector.multi_reduction <maximumf>, %170, %cst_138 [1] : vector<16x16xf32> to vector<16xf32>
    %172 = vector.shape_cast %171 : vector<16xf32> to vector<16x1xf32>
    %173 = vector.broadcast %172 : vector<16x1xf32> to vector<16x16xf32>
    %174 = arith.subf %170, %173 : vector<16x16xf32>
    %175 = math.exp %174 : vector<16x16xf32>
    %cst_139 = arith.constant dense<0.000000e+00> : vector<16xf32>
    %176 = vector.multi_reduction <add>, %175, %cst_139 [1] : vector<16x16xf32> to vector<16xf32>
    %177 = vector.shape_cast %176 : vector<16xf32> to vector<16x1xf32>
    %178 = tpu.reciprocal %177 {approx = true} : vector<16x1xf32> -> vector<16x1xf32>
    %179 = vector.broadcast %178 : vector<16x1xf32> to vector<16x16xf32>
    %180 = arith.mulf %175, %179 : vector<16x16xf32>
    %cst_140 = arith.constant dense<0.000000e+00> : vector<16x9xf32>
    %181 = tpu.matmul %180, %167, %cst_140 {dimension_numbers = #tpu.dot_dimension_numbers<[1], [0], [0], [1], [0, 0, 1, 1], [], []>} : vector<16x16xf32>, vector<16x9xf32>, vector<16x9xf32> -> vector<16x9xf32>
    %c3_141 = arith.constant 3 : index
    %c0_142 = arith.constant 0 : index
    %c0_143 = arith.constant 0 : index
    %182 = vector.load %arg24[%c3_141, %c0_142, %c0_143] : memref<4x9x36xf32, #tpu.memory_space<vmem>>, vector<1x9x36xf32>
    %183 = vector.shape_cast %182 : vector<1x9x36xf32> to vector<9x36xf32>
    %cst_144 = arith.constant dense<0.000000e+00> : vector<16x36xf32>
    %184 = tpu.matmul %181, %183, %cst_144 {dimension_numbers = #tpu.dot_dimension_numbers<[1], [0], [0], [1], [0, 0, 1, 1], [], []>} : vector<16x9xf32>, vector<9x36xf32>, vector<16x36xf32> -> vector<16x36xf32>
    %185 = arith.addf %146, %184 : vector<16x36xf32>
    %c0_145 = arith.constant 0 : index
    %c0_146 = arith.constant 0 : index
    %186 = vector.load %arg25[%c0_145, %c0_146] : memref<1x36xf32, #tpu.memory_space<vmem>>, vector<1x36xf32>
    %187 = vector.broadcast %186 : vector<1x36xf32> to vector<16x36xf32>
    %188 = arith.addf %185, %187 : vector<16x36xf32>
    %189 = arith.addf %28, %188 : vector<16x36xf32>
    %c0_147 = arith.constant 0 : index
    %c0_148 = arith.constant 0 : index
    %190 = vector.load %arg26[%c0_147, %c0_148] : memref<1x36xf32, #tpu.memory_space<vmem>>, vector<1x36xf32>
    %c0_149 = arith.constant 0 : index
    %c0_150 = arith.constant 0 : index
    %191 = vector.load %arg27[%c0_149, %c0_150] : memref<1x36xf32, #tpu.memory_space<vmem>>, vector<1x36xf32>
    %cst_151 = arith.constant dense<0.000000e+00> : vector<16xf32>
    %192 = vector.multi_reduction <add>, %189, %cst_151 [1] : vector<16x36xf32> to vector<16xf32>
    %193 = vector.shape_cast %192 : vector<16xf32> to vector<16x1xf32>
    %cst_152 = arith.constant 3.600000e+01 : f32
    %194 = vector.broadcast %cst_152 : f32 to vector<16x1xf32>
    %195 = arith.divf %193, %194 : vector<16x1xf32>
    %196 = vector.broadcast %195 : vector<16x1xf32> to vector<16x36xf32>
    %197 = arith.subf %189, %196 : vector<16x36xf32>
    %198 = arith.mulf %197, %197 : vector<16x36xf32>
    %cst_153 = arith.constant dense<0.000000e+00> : vector<16xf32>
    %199 = vector.multi_reduction <add>, %198, %cst_153 [1] : vector<16x36xf32> to vector<16xf32>
    %200 = vector.shape_cast %199 : vector<16xf32> to vector<16x1xf32>
    %cst_154 = arith.constant 3.600000e+01 : f32
    %201 = vector.broadcast %cst_154 : f32 to vector<16x1xf32>
    %202 = arith.divf %200, %201 : vector<16x1xf32>
    %203 = vector.broadcast %195 : vector<16x1xf32> to vector<16x36xf32>
    %204 = arith.subf %189, %203 : vector<16x36xf32>
    %cst_155 = arith.constant 9.99999974E-6 : f32
    %205 = vector.broadcast %cst_155 : f32 to vector<16x1xf32>
    %206 = arith.addf %202, %205 : vector<16x1xf32>
    %207 = math.rsqrt %206 : vector<16x1xf32>
    %208 = vector.broadcast %207 : vector<16x1xf32> to vector<16x36xf32>
    %209 = arith.mulf %204, %208 : vector<16x36xf32>
    %210 = vector.broadcast %190 : vector<1x36xf32> to vector<16x36xf32>
    %211 = arith.mulf %209, %210 : vector<16x36xf32>
    %212 = vector.broadcast %191 : vector<1x36xf32> to vector<16x36xf32>
    %213 = arith.addf %211, %212 : vector<16x36xf32>
    %c0_156 = arith.constant 0 : index
    %c0_157 = arith.constant 0 : index
    %214 = vector.load %arg28[%c0_156, %c0_157] : memref<36x32xf32, #tpu.memory_space<vmem>>, vector<36x32xf32>
    %cst_158 = arith.constant dense<0.000000e+00> : vector<16x32xf32>
    %215 = tpu.matmul %213, %214, %cst_158 {dimension_numbers = #tpu.dot_dimension_numbers<[1], [0], [0], [1], [0, 0, 1, 1], [], []>} : vector<16x36xf32>, vector<36x32xf32>, vector<16x32xf32> -> vector<16x32xf32>
    %c0_159 = arith.constant 0 : index
    %c0_160 = arith.constant 0 : index
    %216 = vector.load %arg29[%c0_159, %c0_160] : memref<1x32xf32, #tpu.memory_space<vmem>>, vector<1x32xf32>
    %217 = vector.broadcast %216 : vector<1x32xf32> to vector<16x32xf32>
    %218 = arith.addf %215, %217 : vector<16x32xf32>
    %c0_161 = arith.constant 0 : index
    %c0_162 = arith.constant 0 : index
    %219 = vector.load %arg30[%c0_161, %c0_162] : memref<1x32xf32, #tpu.memory_space<vmem>>, vector<1x32xf32>
    %c0_163 = arith.constant 0 : index
    %c0_164 = arith.constant 0 : index
    %220 = vector.load %arg31[%c0_163, %c0_164] : memref<1x32xf32, #tpu.memory_space<vmem>>, vector<1x32xf32>
    %cst_165 = arith.constant dense<0.000000e+00> : vector<16xf32>
    %221 = vector.multi_reduction <add>, %218, %cst_165 [1] : vector<16x32xf32> to vector<16xf32>
    %222 = vector.shape_cast %221 : vector<16xf32> to vector<16x1xf32>
    %cst_166 = arith.constant 3.200000e+01 : f32
    %223 = vector.broadcast %cst_166 : f32 to vector<16x1xf32>
    %224 = arith.divf %222, %223 : vector<16x1xf32>
    %225 = vector.broadcast %224 : vector<16x1xf32> to vector<16x32xf32>
    %226 = arith.subf %218, %225 : vector<16x32xf32>
    %227 = arith.mulf %226, %226 : vector<16x32xf32>
    %cst_167 = arith.constant dense<0.000000e+00> : vector<16xf32>
    %228 = vector.multi_reduction <add>, %227, %cst_167 [1] : vector<16x32xf32> to vector<16xf32>
    %229 = vector.shape_cast %228 : vector<16xf32> to vector<16x1xf32>
    %cst_168 = arith.constant 3.200000e+01 : f32
    %230 = vector.broadcast %cst_168 : f32 to vector<16x1xf32>
    %231 = arith.divf %229, %230 : vector<16x1xf32>
    %232 = vector.broadcast %224 : vector<16x1xf32> to vector<16x32xf32>
    %233 = arith.subf %218, %232 : vector<16x32xf32>
    %cst_169 = arith.constant 9.99999974E-6 : f32
    %234 = vector.broadcast %cst_169 : f32 to vector<16x1xf32>
    %235 = arith.addf %231, %234 : vector<16x1xf32>
    %236 = math.rsqrt %235 : vector<16x1xf32>
    %237 = vector.broadcast %236 : vector<16x1xf32> to vector<16x32xf32>
    %238 = arith.mulf %233, %237 : vector<16x32xf32>
    %239 = vector.broadcast %219 : vector<1x32xf32> to vector<16x32xf32>
    %240 = arith.mulf %238, %239 : vector<16x32xf32>
    %241 = vector.broadcast %220 : vector<1x32xf32> to vector<16x32xf32>
    %242 = arith.addf %240, %241 : vector<16x32xf32>
    %243 = tpu.concatenate %1, %242 in 1 : vector<16x4xf32>, vector<16x32xf32> -> vector<16x36xf32>
    %cst_170 = arith.constant 0.000000e+00 : f32
    %244 = vector.broadcast %cst_170 : f32 to vector<16x36xf32>
    %c0_171 = arith.constant 0 : index
    %c0_172 = arith.constant 0 : index
    %c0_173 = arith.constant 0 : index
    %245 = vector.load %arg18[%c0_171, %c0_172, %c0_173] : memref<4x36x9xf32, #tpu.memory_space<vmem>>, vector<1x36x9xf32>
    %246 = vector.shape_cast %245 : vector<1x36x9xf32> to vector<36x9xf32>
    %cst_174 = arith.constant dense<0.000000e+00> : vector<16x9xf32>
    %247 = tpu.matmul %243, %246, %cst_174 {dimension_numbers = #tpu.dot_dimension_numbers<[1], [0], [0], [1], [0, 0, 1, 1], [], []>} : vector<16x36xf32>, vector<36x9xf32>, vector<16x9xf32> -> vector<16x9xf32>
    %c0_175 = arith.constant 0 : index
    %c0_176 = arith.constant 0 : index
    %c0_177 = arith.constant 0 : index
    %248 = vector.load %arg19[%c0_175, %c0_176, %c0_177] : memref<4x1x9xf32, #tpu.memory_space<vmem>>, vector<1x1x9xf32>
    %249 = vector.shape_cast %248 : vector<1x1x9xf32> to vector<1x9xf32>
    %250 = vector.broadcast %249 : vector<1x9xf32> to vector<16x9xf32>
    %251 = arith.addf %247, %250 : vector<16x9xf32>
    %c0_178 = arith.constant 0 : index
    %c0_179 = arith.constant 0 : index
    %c0_180 = arith.constant 0 : index
    %252 = vector.load %arg20[%c0_178, %c0_179, %c0_180] : memref<4x36x9xf32, #tpu.memory_space<vmem>>, vector<1x36x9xf32>
    %253 = vector.shape_cast %252 : vector<1x36x9xf32> to vector<36x9xf32>
    %cst_181 = arith.constant dense<0.000000e+00> : vector<16x9xf32>
    %254 = tpu.matmul %243, %253, %cst_181 {dimension_numbers = #tpu.dot_dimension_numbers<[1], [0], [0], [1], [0, 0, 1, 1], [], []>} : vector<16x36xf32>, vector<36x9xf32>, vector<16x9xf32> -> vector<16x9xf32>
    %c0_182 = arith.constant 0 : index
    %c0_183 = arith.constant 0 : index
    %c0_184 = arith.constant 0 : index
    %255 = vector.load %arg21[%c0_182, %c0_183, %c0_184] : memref<4x1x9xf32, #tpu.memory_space<vmem>>, vector<1x1x9xf32>
    %256 = vector.shape_cast %255 : vector<1x1x9xf32> to vector<1x9xf32>
    %257 = vector.broadcast %256 : vector<1x9xf32> to vector<16x9xf32>
    %258 = arith.addf %254, %257 : vector<16x9xf32>
    %c0_185 = arith.constant 0 : index
    %c0_186 = arith.constant 0 : index
    %c0_187 = arith.constant 0 : index
    %259 = vector.load %arg22[%c0_185, %c0_186, %c0_187] : memref<4x36x9xf32, #tpu.memory_space<vmem>>, vector<1x36x9xf32>
    %260 = vector.shape_cast %259 : vector<1x36x9xf32> to vector<36x9xf32>
    %cst_188 = arith.constant dense<0.000000e+00> : vector<16x9xf32>
    %261 = tpu.matmul %243, %260, %cst_188 {dimension_numbers = #tpu.dot_dimension_numbers<[1], [0], [0], [1], [0, 0, 1, 1], [], []>} : vector<16x36xf32>, vector<36x9xf32>, vector<16x9xf32> -> vector<16x9xf32>
    %c0_189 = arith.constant 0 : index
    %c0_190 = arith.constant 0 : index
    %c0_191 = arith.constant 0 : index
    %262 = vector.load %arg23[%c0_189, %c0_190, %c0_191] : memref<4x1x9xf32, #tpu.memory_space<vmem>>, vector<1x1x9xf32>
    %263 = vector.shape_cast %262 : vector<1x1x9xf32> to vector<1x9xf32>
    %264 = vector.broadcast %263 : vector<1x9xf32> to vector<16x9xf32>
    %265 = arith.addf %261, %264 : vector<16x9xf32>
    %cst_192 = arith.constant dense<0.000000e+00> : vector<16x16xf32>
    %266 = tpu.matmul %251, %258, %cst_192 {dimension_numbers = #tpu.dot_dimension_numbers<[1], [1], [0], [0], [0, 0, 1, 0], [], []>} : vector<16x9xf32>, vector<16x9xf32>, vector<16x16xf32> -> vector<16x16xf32>
    %cst_193 = arith.constant 0.333333343 : f32
    %267 = vector.broadcast %cst_193 : f32 to vector<16x16xf32>
    %268 = arith.mulf %266, %267 : vector<16x16xf32>
    %cst_194 = arith.constant dense<0xFF800000> : vector<16xf32>
    %269 = vector.multi_reduction <maximumf>, %268, %cst_194 [1] : vector<16x16xf32> to vector<16xf32>
    %270 = vector.shape_cast %269 : vector<16xf32> to vector<16x1xf32>
    %271 = vector.broadcast %270 : vector<16x1xf32> to vector<16x16xf32>
    %272 = arith.subf %268, %271 : vector<16x16xf32>
    %273 = math.exp %272 : vector<16x16xf32>
    %cst_195 = arith.constant dense<0.000000e+00> : vector<16xf32>
    %274 = vector.multi_reduction <add>, %273, %cst_195 [1] : vector<16x16xf32> to vector<16xf32>
    %275 = vector.shape_cast %274 : vector<16xf32> to vector<16x1xf32>
    %276 = tpu.reciprocal %275 {approx = true} : vector<16x1xf32> -> vector<16x1xf32>
    %277 = vector.broadcast %276 : vector<16x1xf32> to vector<16x16xf32>
    %278 = arith.mulf %273, %277 : vector<16x16xf32>
    %cst_196 = arith.constant dense<0.000000e+00> : vector<16x9xf32>
    %279 = tpu.matmul %278, %265, %cst_196 {dimension_numbers = #tpu.dot_dimension_numbers<[1], [0], [0], [1], [0, 0, 1, 1], [], []>} : vector<16x16xf32>, vector<16x9xf32>, vector<16x9xf32> -> vector<16x9xf32>
    %c0_197 = arith.constant 0 : index
    %c0_198 = arith.constant 0 : index
    %c0_199 = arith.constant 0 : index
    %280 = vector.load %arg24[%c0_197, %c0_198, %c0_199] : memref<4x9x36xf32, #tpu.memory_space<vmem>>, vector<1x9x36xf32>
    %281 = vector.shape_cast %280 : vector<1x9x36xf32> to vector<9x36xf32>
    %cst_200 = arith.constant dense<0.000000e+00> : vector<16x36xf32>
    %282 = tpu.matmul %279, %281, %cst_200 {dimension_numbers = #tpu.dot_dimension_numbers<[1], [0], [0], [1], [0, 0, 1, 1], [], []>} : vector<16x9xf32>, vector<9x36xf32>, vector<16x36xf32> -> vector<16x36xf32>
    %283 = arith.addf %244, %282 : vector<16x36xf32>
    %c1_201 = arith.constant 1 : index
    %c0_202 = arith.constant 0 : index
    %c0_203 = arith.constant 0 : index
    %284 = vector.load %arg18[%c1_201, %c0_202, %c0_203] : memref<4x36x9xf32, #tpu.memory_space<vmem>>, vector<1x36x9xf32>
    %285 = vector.shape_cast %284 : vector<1x36x9xf32> to vector<36x9xf32>
    %cst_204 = arith.constant dense<0.000000e+00> : vector<16x9xf32>
    %286 = tpu.matmul %243, %285, %cst_204 {dimension_numbers = #tpu.dot_dimension_numbers<[1], [0], [0], [1], [0, 0, 1, 1], [], []>} : vector<16x36xf32>, vector<36x9xf32>, vector<16x9xf32> -> vector<16x9xf32>
    %c1_205 = arith.constant 1 : index
    %c0_206 = arith.constant 0 : index
    %c0_207 = arith.constant 0 : index
    %287 = vector.load %arg19[%c1_205, %c0_206, %c0_207] : memref<4x1x9xf32, #tpu.memory_space<vmem>>, vector<1x1x9xf32>
    %288 = vector.shape_cast %287 : vector<1x1x9xf32> to vector<1x9xf32>
    %289 = vector.broadcast %288 : vector<1x9xf32> to vector<16x9xf32>
    %290 = arith.addf %286, %289 : vector<16x9xf32>
    %c1_208 = arith.constant 1 : index
    %c0_209 = arith.constant 0 : index
    %c0_210 = arith.constant 0 : index
    %291 = vector.load %arg20[%c1_208, %c0_209, %c0_210] : memref<4x36x9xf32, #tpu.memory_space<vmem>>, vector<1x36x9xf32>
    %292 = vector.shape_cast %291 : vector<1x36x9xf32> to vector<36x9xf32>
    %cst_211 = arith.constant dense<0.000000e+00> : vector<16x9xf32>
    %293 = tpu.matmul %243, %292, %cst_211 {dimension_numbers = #tpu.dot_dimension_numbers<[1], [0], [0], [1], [0, 0, 1, 1], [], []>} : vector<16x36xf32>, vector<36x9xf32>, vector<16x9xf32> -> vector<16x9xf32>
    %c1_212 = arith.constant 1 : index
    %c0_213 = arith.constant 0 : index
    %c0_214 = arith.constant 0 : index
    %294 = vector.load %arg21[%c1_212, %c0_213, %c0_214] : memref<4x1x9xf32, #tpu.memory_space<vmem>>, vector<1x1x9xf32>
    %295 = vector.shape_cast %294 : vector<1x1x9xf32> to vector<1x9xf32>
    %296 = vector.broadcast %295 : vector<1x9xf32> to vector<16x9xf32>
    %297 = arith.addf %293, %296 : vector<16x9xf32>
    %c1_215 = arith.constant 1 : index
    %c0_216 = arith.constant 0 : index
    %c0_217 = arith.constant 0 : index
    %298 = vector.load %arg22[%c1_215, %c0_216, %c0_217] : memref<4x36x9xf32, #tpu.memory_space<vmem>>, vector<1x36x9xf32>
    %299 = vector.shape_cast %298 : vector<1x36x9xf32> to vector<36x9xf32>
    %cst_218 = arith.constant dense<0.000000e+00> : vector<16x9xf32>
    %300 = tpu.matmul %243, %299, %cst_218 {dimension_numbers = #tpu.dot_dimension_numbers<[1], [0], [0], [1], [0, 0, 1, 1], [], []>} : vector<16x36xf32>, vector<36x9xf32>, vector<16x9xf32> -> vector<16x9xf32>
    %c1_219 = arith.constant 1 : index
    %c0_220 = arith.constant 0 : index
    %c0_221 = arith.constant 0 : index
    %301 = vector.load %arg23[%c1_219, %c0_220, %c0_221] : memref<4x1x9xf32, #tpu.memory_space<vmem>>, vector<1x1x9xf32>
    %302 = vector.shape_cast %301 : vector<1x1x9xf32> to vector<1x9xf32>
    %303 = vector.broadcast %302 : vector<1x9xf32> to vector<16x9xf32>
    %304 = arith.addf %300, %303 : vector<16x9xf32>
    %cst_222 = arith.constant dense<0.000000e+00> : vector<16x16xf32>
    %305 = tpu.matmul %290, %297, %cst_222 {dimension_numbers = #tpu.dot_dimension_numbers<[1], [1], [0], [0], [0, 0, 1, 0], [], []>} : vector<16x9xf32>, vector<16x9xf32>, vector<16x16xf32> -> vector<16x16xf32>
    %cst_223 = arith.constant 0.333333343 : f32
    %306 = vector.broadcast %cst_223 : f32 to vector<16x16xf32>
    %307 = arith.mulf %305, %306 : vector<16x16xf32>
    %cst_224 = arith.constant dense<0xFF800000> : vector<16xf32>
    %308 = vector.multi_reduction <maximumf>, %307, %cst_224 [1] : vector<16x16xf32> to vector<16xf32>
    %309 = vector.shape_cast %308 : vector<16xf32> to vector<16x1xf32>
    %310 = vector.broadcast %309 : vector<16x1xf32> to vector<16x16xf32>
    %311 = arith.subf %307, %310 : vector<16x16xf32>
    %312 = math.exp %311 : vector<16x16xf32>
    %cst_225 = arith.constant dense<0.000000e+00> : vector<16xf32>
    %313 = vector.multi_reduction <add>, %312, %cst_225 [1] : vector<16x16xf32> to vector<16xf32>
    %314 = vector.shape_cast %313 : vector<16xf32> to vector<16x1xf32>
    %315 = tpu.reciprocal %314 {approx = true} : vector<16x1xf32> -> vector<16x1xf32>
    %316 = vector.broadcast %315 : vector<16x1xf32> to vector<16x16xf32>
    %317 = arith.mulf %312, %316 : vector<16x16xf32>
    %cst_226 = arith.constant dense<0.000000e+00> : vector<16x9xf32>
    %318 = tpu.matmul %317, %304, %cst_226 {dimension_numbers = #tpu.dot_dimension_numbers<[1], [0], [0], [1], [0, 0, 1, 1], [], []>} : vector<16x16xf32>, vector<16x9xf32>, vector<16x9xf32> -> vector<16x9xf32>
    %c1_227 = arith.constant 1 : index
    %c0_228 = arith.constant 0 : index
    %c0_229 = arith.constant 0 : index
    %319 = vector.load %arg24[%c1_227, %c0_228, %c0_229] : memref<4x9x36xf32, #tpu.memory_space<vmem>>, vector<1x9x36xf32>
    %320 = vector.shape_cast %319 : vector<1x9x36xf32> to vector<9x36xf32>
    %cst_230 = arith.constant dense<0.000000e+00> : vector<16x36xf32>
    %321 = tpu.matmul %318, %320, %cst_230 {dimension_numbers = #tpu.dot_dimension_numbers<[1], [0], [0], [1], [0, 0, 1, 1], [], []>} : vector<16x9xf32>, vector<9x36xf32>, vector<16x36xf32> -> vector<16x36xf32>
    %322 = arith.addf %283, %321 : vector<16x36xf32>
    %c2_231 = arith.constant 2 : index
    %c0_232 = arith.constant 0 : index
    %c0_233 = arith.constant 0 : index
    %323 = vector.load %arg18[%c2_231, %c0_232, %c0_233] : memref<4x36x9xf32, #tpu.memory_space<vmem>>, vector<1x36x9xf32>
    %324 = vector.shape_cast %323 : vector<1x36x9xf32> to vector<36x9xf32>
    %cst_234 = arith.constant dense<0.000000e+00> : vector<16x9xf32>
    %325 = tpu.matmul %243, %324, %cst_234 {dimension_numbers = #tpu.dot_dimension_numbers<[1], [0], [0], [1], [0, 0, 1, 1], [], []>} : vector<16x36xf32>, vector<36x9xf32>, vector<16x9xf32> -> vector<16x9xf32>
    %c2_235 = arith.constant 2 : index
    %c0_236 = arith.constant 0 : index
    %c0_237 = arith.constant 0 : index
    %326 = vector.load %arg19[%c2_235, %c0_236, %c0_237] : memref<4x1x9xf32, #tpu.memory_space<vmem>>, vector<1x1x9xf32>
    %327 = vector.shape_cast %326 : vector<1x1x9xf32> to vector<1x9xf32>
    %328 = vector.broadcast %327 : vector<1x9xf32> to vector<16x9xf32>
    %329 = arith.addf %325, %328 : vector<16x9xf32>
    %c2_238 = arith.constant 2 : index
    %c0_239 = arith.constant 0 : index
    %c0_240 = arith.constant 0 : index
    %330 = vector.load %arg20[%c2_238, %c0_239, %c0_240] : memref<4x36x9xf32, #tpu.memory_space<vmem>>, vector<1x36x9xf32>
    %331 = vector.shape_cast %330 : vector<1x36x9xf32> to vector<36x9xf32>
    %cst_241 = arith.constant dense<0.000000e+00> : vector<16x9xf32>
    %332 = tpu.matmul %243, %331, %cst_241 {dimension_numbers = #tpu.dot_dimension_numbers<[1], [0], [0], [1], [0, 0, 1, 1], [], []>} : vector<16x36xf32>, vector<36x9xf32>, vector<16x9xf32> -> vector<16x9xf32>
    %c2_242 = arith.constant 2 : index
    %c0_243 = arith.constant 0 : index
    %c0_244 = arith.constant 0 : index
    %333 = vector.load %arg21[%c2_242, %c0_243, %c0_244] : memref<4x1x9xf32, #tpu.memory_space<vmem>>, vector<1x1x9xf32>
    %334 = vector.shape_cast %333 : vector<1x1x9xf32> to vector<1x9xf32>
    %335 = vector.broadcast %334 : vector<1x9xf32> to vector<16x9xf32>
    %336 = arith.addf %332, %335 : vector<16x9xf32>
    %c2_245 = arith.constant 2 : index
    %c0_246 = arith.constant 0 : index
    %c0_247 = arith.constant 0 : index
    %337 = vector.load %arg22[%c2_245, %c0_246, %c0_247] : memref<4x36x9xf32, #tpu.memory_space<vmem>>, vector<1x36x9xf32>
    %338 = vector.shape_cast %337 : vector<1x36x9xf32> to vector<36x9xf32>
    %cst_248 = arith.constant dense<0.000000e+00> : vector<16x9xf32>
    %339 = tpu.matmul %243, %338, %cst_248 {dimension_numbers = #tpu.dot_dimension_numbers<[1], [0], [0], [1], [0, 0, 1, 1], [], []>} : vector<16x36xf32>, vector<36x9xf32>, vector<16x9xf32> -> vector<16x9xf32>
    %c2_249 = arith.constant 2 : index
    %c0_250 = arith.constant 0 : index
    %c0_251 = arith.constant 0 : index
    %340 = vector.load %arg23[%c2_249, %c0_250, %c0_251] : memref<4x1x9xf32, #tpu.memory_space<vmem>>, vector<1x1x9xf32>
    %341 = vector.shape_cast %340 : vector<1x1x9xf32> to vector<1x9xf32>
    %342 = vector.broadcast %341 : vector<1x9xf32> to vector<16x9xf32>
    %343 = arith.addf %339, %342 : vector<16x9xf32>
    %cst_252 = arith.constant dense<0.000000e+00> : vector<16x16xf32>
    %344 = tpu.matmul %329, %336, %cst_252 {dimension_numbers = #tpu.dot_dimension_numbers<[1], [1], [0], [0], [0, 0, 1, 0], [], []>} : vector<16x9xf32>, vector<16x9xf32>, vector<16x16xf32> -> vector<16x16xf32>
    %cst_253 = arith.constant 0.333333343 : f32
    %345 = vector.broadcast %cst_253 : f32 to vector<16x16xf32>
    %346 = arith.mulf %344, %345 : vector<16x16xf32>
    %cst_254 = arith.constant dense<0xFF800000> : vector<16xf32>
    %347 = vector.multi_reduction <maximumf>, %346, %cst_254 [1] : vector<16x16xf32> to vector<16xf32>
    %348 = vector.shape_cast %347 : vector<16xf32> to vector<16x1xf32>
    %349 = vector.broadcast %348 : vector<16x1xf32> to vector<16x16xf32>
    %350 = arith.subf %346, %349 : vector<16x16xf32>
    %351 = math.exp %350 : vector<16x16xf32>
    %cst_255 = arith.constant dense<0.000000e+00> : vector<16xf32>
    %352 = vector.multi_reduction <add>, %351, %cst_255 [1] : vector<16x16xf32> to vector<16xf32>
    %353 = vector.shape_cast %352 : vector<16xf32> to vector<16x1xf32>
    %354 = tpu.reciprocal %353 {approx = true} : vector<16x1xf32> -> vector<16x1xf32>
    %355 = vector.broadcast %354 : vector<16x1xf32> to vector<16x16xf32>
    %356 = arith.mulf %351, %355 : vector<16x16xf32>
    %cst_256 = arith.constant dense<0.000000e+00> : vector<16x9xf32>
    %357 = tpu.matmul %356, %343, %cst_256 {dimension_numbers = #tpu.dot_dimension_numbers<[1], [0], [0], [1], [0, 0, 1, 1], [], []>} : vector<16x16xf32>, vector<16x9xf32>, vector<16x9xf32> -> vector<16x9xf32>
    %c2_257 = arith.constant 2 : index
    %c0_258 = arith.constant 0 : index
    %c0_259 = arith.constant 0 : index
    %358 = vector.load %arg24[%c2_257, %c0_258, %c0_259] : memref<4x9x36xf32, #tpu.memory_space<vmem>>, vector<1x9x36xf32>
    %359 = vector.shape_cast %358 : vector<1x9x36xf32> to vector<9x36xf32>
    %cst_260 = arith.constant dense<0.000000e+00> : vector<16x36xf32>
    %360 = tpu.matmul %357, %359, %cst_260 {dimension_numbers = #tpu.dot_dimension_numbers<[1], [0], [0], [1], [0, 0, 1, 1], [], []>} : vector<16x9xf32>, vector<9x36xf32>, vector<16x36xf32> -> vector<16x36xf32>
    %361 = arith.addf %322, %360 : vector<16x36xf32>
    %c3_261 = arith.constant 3 : index
    %c0_262 = arith.constant 0 : index
    %c0_263 = arith.constant 0 : index
    %362 = vector.load %arg18[%c3_261, %c0_262, %c0_263] : memref<4x36x9xf32, #tpu.memory_space<vmem>>, vector<1x36x9xf32>
    %363 = vector.shape_cast %362 : vector<1x36x9xf32> to vector<36x9xf32>
    %cst_264 = arith.constant dense<0.000000e+00> : vector<16x9xf32>
    %364 = tpu.matmul %243, %363, %cst_264 {dimension_numbers = #tpu.dot_dimension_numbers<[1], [0], [0], [1], [0, 0, 1, 1], [], []>} : vector<16x36xf32>, vector<36x9xf32>, vector<16x9xf32> -> vector<16x9xf32>
    %c3_265 = arith.constant 3 : index
    %c0_266 = arith.constant 0 : index
    %c0_267 = arith.constant 0 : index
    %365 = vector.load %arg19[%c3_265, %c0_266, %c0_267] : memref<4x1x9xf32, #tpu.memory_space<vmem>>, vector<1x1x9xf32>
    %366 = vector.shape_cast %365 : vector<1x1x9xf32> to vector<1x9xf32>
    %367 = vector.broadcast %366 : vector<1x9xf32> to vector<16x9xf32>
    %368 = arith.addf %364, %367 : vector<16x9xf32>
    %c3_268 = arith.constant 3 : index
    %c0_269 = arith.constant 0 : index
    %c0_270 = arith.constant 0 : index
    %369 = vector.load %arg20[%c3_268, %c0_269, %c0_270] : memref<4x36x9xf32, #tpu.memory_space<vmem>>, vector<1x36x9xf32>
    %370 = vector.shape_cast %369 : vector<1x36x9xf32> to vector<36x9xf32>
    %cst_271 = arith.constant dense<0.000000e+00> : vector<16x9xf32>
    %371 = tpu.matmul %243, %370, %cst_271 {dimension_numbers = #tpu.dot_dimension_numbers<[1], [0], [0], [1], [0, 0, 1, 1], [], []>} : vector<16x36xf32>, vector<36x9xf32>, vector<16x9xf32> -> vector<16x9xf32>
    %c3_272 = arith.constant 3 : index
    %c0_273 = arith.constant 0 : index
    %c0_274 = arith.constant 0 : index
    %372 = vector.load %arg21[%c3_272, %c0_273, %c0_274] : memref<4x1x9xf32, #tpu.memory_space<vmem>>, vector<1x1x9xf32>
    %373 = vector.shape_cast %372 : vector<1x1x9xf32> to vector<1x9xf32>
    %374 = vector.broadcast %373 : vector<1x9xf32> to vector<16x9xf32>
    %375 = arith.addf %371, %374 : vector<16x9xf32>
    %c3_275 = arith.constant 3 : index
    %c0_276 = arith.constant 0 : index
    %c0_277 = arith.constant 0 : index
    %376 = vector.load %arg22[%c3_275, %c0_276, %c0_277] : memref<4x36x9xf32, #tpu.memory_space<vmem>>, vector<1x36x9xf32>
    %377 = vector.shape_cast %376 : vector<1x36x9xf32> to vector<36x9xf32>
    %cst_278 = arith.constant dense<0.000000e+00> : vector<16x9xf32>
    %378 = tpu.matmul %243, %377, %cst_278 {dimension_numbers = #tpu.dot_dimension_numbers<[1], [0], [0], [1], [0, 0, 1, 1], [], []>} : vector<16x36xf32>, vector<36x9xf32>, vector<16x9xf32> -> vector<16x9xf32>
    %c3_279 = arith.constant 3 : index
    %c0_280 = arith.constant 0 : index
    %c0_281 = arith.constant 0 : index
    %379 = vector.load %arg23[%c3_279, %c0_280, %c0_281] : memref<4x1x9xf32, #tpu.memory_space<vmem>>, vector<1x1x9xf32>
    %380 = vector.shape_cast %379 : vector<1x1x9xf32> to vector<1x9xf32>
    %381 = vector.broadcast %380 : vector<1x9xf32> to vector<16x9xf32>
    %382 = arith.addf %378, %381 : vector<16x9xf32>
    %cst_282 = arith.constant dense<0.000000e+00> : vector<16x16xf32>
    %383 = tpu.matmul %368, %375, %cst_282 {dimension_numbers = #tpu.dot_dimension_numbers<[1], [1], [0], [0], [0, 0, 1, 0], [], []>} : vector<16x9xf32>, vector<16x9xf32>, vector<16x16xf32> -> vector<16x16xf32>
    %cst_283 = arith.constant 0.333333343 : f32
    %384 = vector.broadcast %cst_283 : f32 to vector<16x16xf32>
    %385 = arith.mulf %383, %384 : vector<16x16xf32>
    %cst_284 = arith.constant dense<0xFF800000> : vector<16xf32>
    %386 = vector.multi_reduction <maximumf>, %385, %cst_284 [1] : vector<16x16xf32> to vector<16xf32>
    %387 = vector.shape_cast %386 : vector<16xf32> to vector<16x1xf32>
    %388 = vector.broadcast %387 : vector<16x1xf32> to vector<16x16xf32>
    %389 = arith.subf %385, %388 : vector<16x16xf32>
    %390 = math.exp %389 : vector<16x16xf32>
    %cst_285 = arith.constant dense<0.000000e+00> : vector<16xf32>
    %391 = vector.multi_reduction <add>, %390, %cst_285 [1] : vector<16x16xf32> to vector<16xf32>
    %392 = vector.shape_cast %391 : vector<16xf32> to vector<16x1xf32>
    %393 = tpu.reciprocal %392 {approx = true} : vector<16x1xf32> -> vector<16x1xf32>
    %394 = vector.broadcast %393 : vector<16x1xf32> to vector<16x16xf32>
    %395 = arith.mulf %390, %394 : vector<16x16xf32>
    %cst_286 = arith.constant dense<0.000000e+00> : vector<16x9xf32>
    %396 = tpu.matmul %395, %382, %cst_286 {dimension_numbers = #tpu.dot_dimension_numbers<[1], [0], [0], [1], [0, 0, 1, 1], [], []>} : vector<16x16xf32>, vector<16x9xf32>, vector<16x9xf32> -> vector<16x9xf32>
    %c3_287 = arith.constant 3 : index
    %c0_288 = arith.constant 0 : index
    %c0_289 = arith.constant 0 : index
    %397 = vector.load %arg24[%c3_287, %c0_288, %c0_289] : memref<4x9x36xf32, #tpu.memory_space<vmem>>, vector<1x9x36xf32>
    %398 = vector.shape_cast %397 : vector<1x9x36xf32> to vector<9x36xf32>
    %cst_290 = arith.constant dense<0.000000e+00> : vector<16x36xf32>
    %399 = tpu.matmul %396, %398, %cst_290 {dimension_numbers = #tpu.dot_dimension_numbers<[1], [0], [0], [1], [0, 0, 1, 1], [], []>} : vector<16x9xf32>, vector<9x36xf32>, vector<16x36xf32> -> vector<16x36xf32>
    %400 = arith.addf %361, %399 : vector<16x36xf32>
    %c0_291 = arith.constant 0 : index
    %c0_292 = arith.constant 0 : index
    %401 = vector.load %arg25[%c0_291, %c0_292] : memref<1x36xf32, #tpu.memory_space<vmem>>, vector<1x36xf32>
    %402 = vector.broadcast %401 : vector<1x36xf32> to vector<16x36xf32>
    %403 = arith.addf %400, %402 : vector<16x36xf32>
    %404 = arith.addf %243, %403 : vector<16x36xf32>
    %c0_293 = arith.constant 0 : index
    %c0_294 = arith.constant 0 : index
    %405 = vector.load %arg26[%c0_293, %c0_294] : memref<1x36xf32, #tpu.memory_space<vmem>>, vector<1x36xf32>
    %c0_295 = arith.constant 0 : index
    %c0_296 = arith.constant 0 : index
    %406 = vector.load %arg27[%c0_295, %c0_296] : memref<1x36xf32, #tpu.memory_space<vmem>>, vector<1x36xf32>
    %cst_297 = arith.constant dense<0.000000e+00> : vector<16xf32>
    %407 = vector.multi_reduction <add>, %404, %cst_297 [1] : vector<16x36xf32> to vector<16xf32>
    %408 = vector.shape_cast %407 : vector<16xf32> to vector<16x1xf32>
    %cst_298 = arith.constant 3.600000e+01 : f32
    %409 = vector.broadcast %cst_298 : f32 to vector<16x1xf32>
    %410 = arith.divf %408, %409 : vector<16x1xf32>
    %411 = vector.broadcast %410 : vector<16x1xf32> to vector<16x36xf32>
    %412 = arith.subf %404, %411 : vector<16x36xf32>
    %413 = arith.mulf %412, %412 : vector<16x36xf32>
    %cst_299 = arith.constant dense<0.000000e+00> : vector<16xf32>
    %414 = vector.multi_reduction <add>, %413, %cst_299 [1] : vector<16x36xf32> to vector<16xf32>
    %415 = vector.shape_cast %414 : vector<16xf32> to vector<16x1xf32>
    %cst_300 = arith.constant 3.600000e+01 : f32
    %416 = vector.broadcast %cst_300 : f32 to vector<16x1xf32>
    %417 = arith.divf %415, %416 : vector<16x1xf32>
    %418 = vector.broadcast %410 : vector<16x1xf32> to vector<16x36xf32>
    %419 = arith.subf %404, %418 : vector<16x36xf32>
    %cst_301 = arith.constant 9.99999974E-6 : f32
    %420 = vector.broadcast %cst_301 : f32 to vector<16x1xf32>
    %421 = arith.addf %417, %420 : vector<16x1xf32>
    %422 = math.rsqrt %421 : vector<16x1xf32>
    %423 = vector.broadcast %422 : vector<16x1xf32> to vector<16x36xf32>
    %424 = arith.mulf %419, %423 : vector<16x36xf32>
    %425 = vector.broadcast %405 : vector<1x36xf32> to vector<16x36xf32>
    %426 = arith.mulf %424, %425 : vector<16x36xf32>
    %427 = vector.broadcast %406 : vector<1x36xf32> to vector<16x36xf32>
    %428 = arith.addf %426, %427 : vector<16x36xf32>
    %c0_302 = arith.constant 0 : index
    %c0_303 = arith.constant 0 : index
    %429 = vector.load %arg28[%c0_302, %c0_303] : memref<36x32xf32, #tpu.memory_space<vmem>>, vector<36x32xf32>
    %cst_304 = arith.constant dense<0.000000e+00> : vector<16x32xf32>
    %430 = tpu.matmul %428, %429, %cst_304 {dimension_numbers = #tpu.dot_dimension_numbers<[1], [0], [0], [1], [0, 0, 1, 1], [], []>} : vector<16x36xf32>, vector<36x32xf32>, vector<16x32xf32> -> vector<16x32xf32>
    %c0_305 = arith.constant 0 : index
    %c0_306 = arith.constant 0 : index
    %431 = vector.load %arg29[%c0_305, %c0_306] : memref<1x32xf32, #tpu.memory_space<vmem>>, vector<1x32xf32>
    %432 = vector.broadcast %431 : vector<1x32xf32> to vector<16x32xf32>
    %433 = arith.addf %430, %432 : vector<16x32xf32>
    %c0_307 = arith.constant 0 : index
    %c0_308 = arith.constant 0 : index
    %434 = vector.load %arg30[%c0_307, %c0_308] : memref<1x32xf32, #tpu.memory_space<vmem>>, vector<1x32xf32>
    %c0_309 = arith.constant 0 : index
    %c0_310 = arith.constant 0 : index
    %435 = vector.load %arg31[%c0_309, %c0_310] : memref<1x32xf32, #tpu.memory_space<vmem>>, vector<1x32xf32>
    %cst_311 = arith.constant dense<0.000000e+00> : vector<16xf32>
    %436 = vector.multi_reduction <add>, %433, %cst_311 [1] : vector<16x32xf32> to vector<16xf32>
    %437 = vector.shape_cast %436 : vector<16xf32> to vector<16x1xf32>
    %cst_312 = arith.constant 3.200000e+01 : f32
    %438 = vector.broadcast %cst_312 : f32 to vector<16x1xf32>
    %439 = arith.divf %437, %438 : vector<16x1xf32>
    %440 = vector.broadcast %439 : vector<16x1xf32> to vector<16x32xf32>
    %441 = arith.subf %433, %440 : vector<16x32xf32>
    %442 = arith.mulf %441, %441 : vector<16x32xf32>
    %cst_313 = arith.constant dense<0.000000e+00> : vector<16xf32>
    %443 = vector.multi_reduction <add>, %442, %cst_313 [1] : vector<16x32xf32> to vector<16xf32>
    %444 = vector.shape_cast %443 : vector<16xf32> to vector<16x1xf32>
    %cst_314 = arith.constant 3.200000e+01 : f32
    %445 = vector.broadcast %cst_314 : f32 to vector<16x1xf32>
    %446 = arith.divf %444, %445 : vector<16x1xf32>
    %447 = vector.broadcast %439 : vector<16x1xf32> to vector<16x32xf32>
    %448 = arith.subf %433, %447 : vector<16x32xf32>
    %cst_315 = arith.constant 9.99999974E-6 : f32
    %449 = vector.broadcast %cst_315 : f32 to vector<16x1xf32>
    %450 = arith.addf %446, %449 : vector<16x1xf32>
    %451 = math.rsqrt %450 : vector<16x1xf32>
    %452 = vector.broadcast %451 : vector<16x1xf32> to vector<16x32xf32>
    %453 = arith.mulf %448, %452 : vector<16x32xf32>
    %454 = vector.broadcast %434 : vector<1x32xf32> to vector<16x32xf32>
    %455 = arith.mulf %453, %454 : vector<16x32xf32>
    %456 = vector.broadcast %435 : vector<1x32xf32> to vector<16x32xf32>
    %457 = arith.addf %455, %456 : vector<16x32xf32>
    %c0_316 = arith.constant 0 : index
    %c0_317 = arith.constant 0 : index
    %458 = vector.load %arg12[%c0_316, %c0_317] : memref<4x32xf32, #tpu.memory_space<vmem>>, vector<4x32xf32>
    %cst_318 = arith.constant dense<0.000000e+00> : vector<8x32xf32>
    %459 = tpu.matmul %5, %458, %cst_318 {dimension_numbers = #tpu.dot_dimension_numbers<[1], [0], [0], [1], [0, 0, 1, 1], [], []>} : vector<8x4xf32>, vector<4x32xf32>, vector<8x32xf32> -> vector<8x32xf32>
    %c0_319 = arith.constant 0 : index
    %c0_320 = arith.constant 0 : index
    %460 = vector.load %arg13[%c0_319, %c0_320] : memref<1x32xf32, #tpu.memory_space<vmem>>, vector<1x32xf32>
    %461 = vector.broadcast %460 : vector<1x32xf32> to vector<8x32xf32>
    %462 = arith.addf %459, %461 : vector<8x32xf32>
    %cst_321 = arith.constant 0.000000e+00 : f32
    %463 = vector.broadcast %cst_321 : f32 to vector<8x32xf32>
    %464 = arith.maximumf %462, %463 : vector<8x32xf32>
    %c0_322 = arith.constant 0 : index
    %c0_323 = arith.constant 0 : index
    %465 = vector.load %arg14[%c0_322, %c0_323] : memref<32x32xf32, #tpu.memory_space<vmem>>, vector<32x32xf32>
    %cst_324 = arith.constant dense<0.000000e+00> : vector<8x32xf32>
    %466 = tpu.matmul %464, %465, %cst_324 {dimension_numbers = #tpu.dot_dimension_numbers<[1], [0], [0], [1], [0, 0, 1, 1], [], []>} : vector<8x32xf32>, vector<32x32xf32>, vector<8x32xf32> -> vector<8x32xf32>
    %c0_325 = arith.constant 0 : index
    %c0_326 = arith.constant 0 : index
    %467 = vector.load %arg15[%c0_325, %c0_326] : memref<1x32xf32, #tpu.memory_space<vmem>>, vector<1x32xf32>
    %468 = vector.broadcast %467 : vector<1x32xf32> to vector<8x32xf32>
    %469 = arith.addf %466, %468 : vector<8x32xf32>
    %cst_327 = arith.constant 0.000000e+00 : f32
    %470 = vector.broadcast %cst_327 : f32 to vector<8x32xf32>
    %471 = arith.maximumf %469, %470 : vector<8x32xf32>
    %c0_328 = arith.constant 0 : index
    %c0_329 = arith.constant 0 : index
    %472 = vector.load %arg16[%c0_328, %c0_329] : memref<32x32xf32, #tpu.memory_space<vmem>>, vector<32x32xf32>
    %cst_330 = arith.constant dense<0.000000e+00> : vector<8x32xf32>
    %473 = tpu.matmul %471, %472, %cst_330 {dimension_numbers = #tpu.dot_dimension_numbers<[1], [0], [0], [1], [0, 0, 1, 1], [], []>} : vector<8x32xf32>, vector<32x32xf32>, vector<8x32xf32> -> vector<8x32xf32>
    %c0_331 = arith.constant 0 : index
    %c0_332 = arith.constant 0 : index
    %474 = vector.load %arg17[%c0_331, %c0_332] : memref<1x32xf32, #tpu.memory_space<vmem>>, vector<1x32xf32>
    %475 = vector.broadcast %474 : vector<1x32xf32> to vector<8x32xf32>
    %476 = arith.addf %473, %475 : vector<8x32xf32>
    %c0_333 = arith.constant 0 : index
    %477 = memref.load %arg1[%c0_333] : memref<1xf32, #tpu.memory_space<smem>>
    %478 = vector.broadcast %477 : f32 to vector<1x1xf32>
    %479 = math.exp %478 : vector<1x1xf32>
    %480 = arith.mulf %1, %1 : vector<16x4xf32>
    %cst_334 = arith.constant dense<0.000000e+00> : vector<16xf32>
    %481 = vector.multi_reduction <add>, %480, %cst_334 [1] : vector<16x4xf32> to vector<16xf32>
    %482 = vector.shape_cast %481 : vector<16xf32> to vector<1x16xf32>
    %cst_335 = arith.constant dense<0.000000e+00> : vector<8x16xf32>
    %483 = tpu.matmul %5, %1, %cst_335 {dimension_numbers = #tpu.dot_dimension_numbers<[1], [1], [0], [0], [0, 0, 1, 0], [], []>} : vector<8x4xf32>, vector<16x4xf32>, vector<8x16xf32> -> vector<8x16xf32>
    %cst_336 = arith.constant 2.000000e+00 : f32
    %484 = vector.broadcast %cst_336 : f32 to vector<8x16xf32>
    %485 = arith.mulf %484, %483 : vector<8x16xf32>
    %486 = vector.broadcast %482 : vector<1x16xf32> to vector<8x16xf32>
    %487 = arith.subf %486, %485 : vector<8x16xf32>
    %488 = vector.broadcast %479 : vector<1x1xf32> to vector<8x16xf32>
    %489 = arith.mulf %488, %487 : vector<8x16xf32>
    %cst_337 = arith.constant 0.000000e+00 : f32
    %490 = vector.broadcast %cst_337 : f32 to vector<8x16xf32>
    %491 = arith.subf %490, %489 : vector<8x16xf32>
    %cst_338 = arith.constant dense<0xFF800000> : vector<8xf32>
    %492 = vector.multi_reduction <maximumf>, %491, %cst_338 [1] : vector<8x16xf32> to vector<8xf32>
    %493 = vector.shape_cast %492 : vector<8xf32> to vector<8x1xf32>
    %494 = vector.broadcast %493 : vector<8x1xf32> to vector<8x16xf32>
    %495 = arith.subf %491, %494 : vector<8x16xf32>
    %496 = math.exp %495 : vector<8x16xf32>
    %cst_339 = arith.constant dense<0.000000e+00> : vector<8xf32>
    %497 = vector.multi_reduction <add>, %496, %cst_339 [1] : vector<8x16xf32> to vector<8xf32>
    %498 = vector.shape_cast %497 : vector<8xf32> to vector<8x1xf32>
    %499 = tpu.reciprocal %498 {approx = true} : vector<8x1xf32> -> vector<8x1xf32>
    %500 = vector.broadcast %499 : vector<8x1xf32> to vector<8x16xf32>
    %501 = arith.mulf %496, %500 : vector<8x16xf32>
    %cst_340 = arith.constant dense<0.000000e+00> : vector<8x32xf32>
    %502 = tpu.matmul %501, %457, %cst_340 {dimension_numbers = #tpu.dot_dimension_numbers<[1], [0], [0], [1], [0, 0, 1, 1], [], []>} : vector<8x16xf32>, vector<16x32xf32>, vector<8x32xf32> -> vector<8x32xf32>
    %c0_341 = arith.constant 0 : index
    %c0_342 = arith.constant 0 : index
    %503 = vector.load %arg32[%c0_341, %c0_342] : memref<32x32xf32, #tpu.memory_space<vmem>>, vector<32x32xf32>
    %cst_343 = arith.constant dense<0.000000e+00> : vector<8x32xf32>
    %504 = tpu.matmul %502, %503, %cst_343 {dimension_numbers = #tpu.dot_dimension_numbers<[1], [0], [0], [1], [0, 0, 1, 1], [], []>} : vector<8x32xf32>, vector<32x32xf32>, vector<8x32xf32> -> vector<8x32xf32>
    %c0_344 = arith.constant 0 : index
    %c0_345 = arith.constant 0 : index
    %505 = vector.load %arg33[%c0_344, %c0_345] : memref<32x32xf32, #tpu.memory_space<vmem>>, vector<32x32xf32>
    %cst_346 = arith.constant dense<0.000000e+00> : vector<8x32xf32>
    %506 = tpu.matmul %476, %505, %cst_346 {dimension_numbers = #tpu.dot_dimension_numbers<[1], [0], [0], [1], [0, 0, 1, 1], [], []>} : vector<8x32xf32>, vector<32x32xf32>, vector<8x32xf32> -> vector<8x32xf32>
    %507 = arith.addf %504, %506 : vector<8x32xf32>
    %c0_347 = arith.constant 0 : index
    %c0_348 = arith.constant 0 : index
    %508 = vector.load %arg34[%c0_347, %c0_348] : memref<1x32xf32, #tpu.memory_space<vmem>>, vector<1x32xf32>
    %509 = vector.broadcast %508 : vector<1x32xf32> to vector<8x32xf32>
    %510 = arith.addf %507, %509 : vector<8x32xf32>
    %cst_349 = arith.constant 0.000000e+00 : f32
    %511 = vector.broadcast %cst_349 : f32 to vector<8x32xf32>
    %512 = arith.maximumf %510, %511 : vector<8x32xf32>
    %c0_350 = arith.constant 0 : index
    %c0_351 = arith.constant 0 : index
    %513 = vector.load %arg35[%c0_350, %c0_351] : memref<32x32xf32, #tpu.memory_space<vmem>>, vector<32x32xf32>
    %cst_352 = arith.constant dense<0.000000e+00> : vector<8x32xf32>
    %514 = tpu.matmul %512, %513, %cst_352 {dimension_numbers = #tpu.dot_dimension_numbers<[1], [0], [0], [1], [0, 0, 1, 1], [], []>} : vector<8x32xf32>, vector<32x32xf32>, vector<8x32xf32> -> vector<8x32xf32>
    %c0_353 = arith.constant 0 : index
    %c0_354 = arith.constant 0 : index
    %515 = vector.load %arg36[%c0_353, %c0_354] : memref<1x32xf32, #tpu.memory_space<vmem>>, vector<1x32xf32>
    %516 = vector.broadcast %515 : vector<1x32xf32> to vector<8x32xf32>
    %517 = arith.addf %514, %516 : vector<8x32xf32>
    %cst_355 = arith.constant 0.000000e+00 : f32
    %518 = vector.broadcast %cst_355 : f32 to vector<8x32xf32>
    %519 = arith.maximumf %517, %518 : vector<8x32xf32>
    %c0_356 = arith.constant 0 : index
    %c0_357 = arith.constant 0 : index
    %520 = vector.load %arg37[%c0_356, %c0_357] : memref<32x128xf32, #tpu.memory_space<vmem>>, vector<32x128xf32>
    %cst_358 = arith.constant dense<0.000000e+00> : vector<8x128xf32>
    %521 = tpu.matmul %519, %520, %cst_358 {dimension_numbers = #tpu.dot_dimension_numbers<[1], [0], [0], [1], [0, 0, 1, 1], [], []>} : vector<8x32xf32>, vector<32x128xf32>, vector<8x128xf32> -> vector<8x128xf32>
    %c0_359 = arith.constant 0 : index
    %c0_360 = arith.constant 0 : index
    %522 = vector.load %arg38[%c0_359, %c0_360] : memref<1x128xf32, #tpu.memory_space<vmem>>, vector<1x128xf32>
    %523 = vector.broadcast %522 : vector<1x128xf32> to vector<8x128xf32>
    %524 = arith.addf %521, %523 : vector<8x128xf32>
    %c0_361 = arith.constant 0 : index
    %c0_362 = arith.constant 0 : index
    %c0_363 = arith.constant 0 : index
    %525 = vector.load %arg39[%c0_361, %c0_362, %c0_363] : memref<1x8x128xf32, #tpu.memory_space<vmem>>, vector<1x8x128xf32>
    %526 = vector.shape_cast %525 : vector<1x8x128xf32> to vector<8x128xf32>
    %527 = vector.shape_cast %524 : vector<8x128xf32> to vector<1x8x128xf32>
    tpu.vector_store %arg39[%c0_361, %c0_362, %c0_363], %527 {strides = array<i32>} : memref<1x8x128xf32, #tpu.memory_space<vmem>>, vector<1x8x128xf32>,
    return
  }
  func.func @transform_0(%arg0: i32) -> i32 {
    %c0_i32 = arith.constant 0 : i32
    %c0_i32_0 = arith.constant 0 : i32
    return %c0_i32 : i32
  }
  func.func @transform_1(%arg0: i32) -> (i32, i32, i32) {
    %c0_i32 = arith.constant 0 : i32
    %c0_i32_0 = arith.constant 0 : i32
    %c0_i32_1 = arith.constant 0 : i32
    return %arg0, %c0_i32, %c0_i32_0 : i32, i32, i32
  }
  func.func @transform_2(%arg0: i32) -> (i32, i32, i32) {
    %c0_i32 = arith.constant 0 : i32
    %c0_i32_0 = arith.constant 0 : i32
    %c0_i32_1 = arith.constant 0 : i32
    return %arg0, %c0_i32, %c0_i32_0 : i32, i32, i32
  }
  func.func @transform_3(%arg0: i32) -> (i32, i32, i32) {
    %c0_i32 = arith.constant 0 : i32
    %c0_i32_0 = arith.constant 0 : i32
    %c0_i32_1 = arith.constant 0 : i32
    return %arg0, %c0_i32, %c0_i32_0 : i32, i32, i32
  }
  func.func @transform_4(%arg0: i32) -> (i32, i32) {
    %c0_i32 = arith.constant 0 : i32
    %c0_i32_0 = arith.constant 0 : i32
    %c0_i32_1 = arith.constant 0 : i32
    return %c0_i32, %c0_i32_0 : i32, i32
  }
  func.func @transform_5(%arg0: i32) -> (i32, i32) {
    %c0_i32 = arith.constant 0 : i32
    %c0_i32_0 = arith.constant 0 : i32
    %c0_i32_1 = arith.constant 0 : i32
    return %c0_i32, %c0_i32_0 : i32, i32
  }
  func.func @transform_6(%arg0: i32) -> (i32, i32) {
    %c0_i32 = arith.constant 0 : i32
    %c0_i32_0 = arith.constant 0 : i32
    %c0_i32_1 = arith.constant 0 : i32
    return %c0_i32, %c0_i32_0 : i32, i32
  }
  func.func @transform_7(%arg0: i32) -> (i32, i32) {
    %c0_i32 = arith.constant 0 : i32
    %c0_i32_0 = arith.constant 0 : i32
    %c0_i32_1 = arith.constant 0 : i32
    return %c0_i32, %c0_i32_0 : i32, i32
  }
  func.func @transform_8(%arg0: i32) -> (i32, i32) {
    %c0_i32 = arith.constant 0 : i32
    %c0_i32_0 = arith.constant 0 : i32
    %c0_i32_1 = arith.constant 0 : i32
    return %c0_i32, %c0_i32_0 : i32, i32
  }
  func.func @transform_9(%arg0: i32) -> (i32, i32) {
    %c0_i32 = arith.constant 0 : i32
    %c0_i32_0 = arith.constant 0 : i32
    %c0_i32_1 = arith.constant 0 : i32
    return %c0_i32, %c0_i32_0 : i32, i32
  }
  func.func @transform_10(%arg0: i32) -> (i32, i32) {
    %c0_i32 = arith.constant 0 : i32
    %c0_i32_0 = arith.constant 0 : i32
    %c0_i32_1 = arith.constant 0 : i32
    return %c0_i32, %c0_i32_0 : i32, i32
  }
  func.func @transform_11(%arg0: i32) -> (i32, i32) {
    %c0_i32 = arith.constant 0 : i32
    %c0_i32_0 = arith.constant 0 : i32
    %c0_i32_1 = arith.constant 0 : i32
    return %c0_i32, %c0_i32_0 : i32, i32
  }
  func.func @transform_12(%arg0: i32) -> (i32, i32) {
    %c0_i32 = arith.constant 0 : i32
    %c0_i32_0 = arith.constant 0 : i32
    %c0_i32_1 = arith.constant 0 : i32
    return %c0_i32, %c0_i32_0 : i32, i32
  }
  func.func @transform_13(%arg0: i32) -> (i32, i32) {
    %c0_i32 = arith.constant 0 : i32
    %c0_i32_0 = arith.constant 0 : i32
    %c0_i32_1 = arith.constant 0 : i32
    return %c0_i32, %c0_i32_0 : i32, i32
  }
  func.func @transform_14(%arg0: i32) -> (i32, i32) {
    %c0_i32 = arith.constant 0 : i32
    %c0_i32_0 = arith.constant 0 : i32
    %c0_i32_1 = arith.constant 0 : i32
    return %c0_i32, %c0_i32_0 : i32, i32
  }
  func.func @transform_15(%arg0: i32) -> (i32, i32) {
    %c0_i32 = arith.constant 0 : i32
    %c0_i32_0 = arith.constant 0 : i32
    %c0_i32_1 = arith.constant 0 : i32
    return %c0_i32, %c0_i32_0 : i32, i32
  }
  func.func @transform_16(%arg0: i32) -> (i32, i32) {
    %c0_i32 = arith.constant 0 : i32
    %c0_i32_0 = arith.constant 0 : i32
    %c0_i32_1 = arith.constant 0 : i32
    return %c0_i32, %c0_i32_0 : i32, i32
  }
  func.func @transform_17(%arg0: i32) -> (i32, i32, i32) {
    %c0_i32 = arith.constant 0 : i32
    %c0_i32_0 = arith.constant 0 : i32
    %c0_i32_1 = arith.constant 0 : i32
    %c0_i32_2 = arith.constant 0 : i32
    return %c0_i32, %c0_i32_0, %c0_i32_1 : i32, i32, i32
  }
  func.func @transform_18(%arg0: i32) -> (i32, i32, i32) {
    %c0_i32 = arith.constant 0 : i32
    %c0_i32_0 = arith.constant 0 : i32
    %c0_i32_1 = arith.constant 0 : i32
    %c0_i32_2 = arith.constant 0 : i32
    return %c0_i32, %c0_i32_0, %c0_i32_1 : i32, i32, i32
  }
  func.func @transform_19(%arg0: i32) -> (i32, i32, i32) {
    %c0_i32 = arith.constant 0 : i32
    %c0_i32_0 = arith.constant 0 : i32
    %c0_i32_1 = arith.constant 0 : i32
    %c0_i32_2 = arith.constant 0 : i32
    return %c0_i32, %c0_i32_0, %c0_i32_1 : i32, i32, i32
  }
  func.func @transform_20(%arg0: i32) -> (i32, i32, i32) {
    %c0_i32 = arith.constant 0 : i32
    %c0_i32_0 = arith.constant 0 : i32
    %c0_i32_1 = arith.constant 0 : i32
    %c0_i32_2 = arith.constant 0 : i32
    return %c0_i32, %c0_i32_0, %c0_i32_1 : i32, i32, i32
  }
  func.func @transform_21(%arg0: i32) -> (i32, i32, i32) {
    %c0_i32 = arith.constant 0 : i32
    %c0_i32_0 = arith.constant 0 : i32
    %c0_i32_1 = arith.constant 0 : i32
    %c0_i32_2 = arith.constant 0 : i32
    return %c0_i32, %c0_i32_0, %c0_i32_1 : i32, i32, i32
  }
  func.func @transform_22(%arg0: i32) -> (i32, i32, i32) {
    %c0_i32 = arith.constant 0 : i32
    %c0_i32_0 = arith.constant 0 : i32
    %c0_i32_1 = arith.constant 0 : i32
    %c0_i32_2 = arith.constant 0 : i32
    return %c0_i32, %c0_i32_0, %c0_i32_1 : i32, i32, i32
  }
  func.func @transform_23(%arg0: i32) -> (i32, i32, i32) {
    %c0_i32 = arith.constant 0 : i32
    %c0_i32_0 = arith.constant 0 : i32
    %c0_i32_1 = arith.constant 0 : i32
    %c0_i32_2 = arith.constant 0 : i32
    return %c0_i32, %c0_i32_0, %c0_i32_1 : i32, i32, i32
  }
  func.func @transform_24(%arg0: i32) -> (i32, i32) {
    %c0_i32 = arith.constant 0 : i32
    %c0_i32_0 = arith.constant 0 : i32
    %c0_i32_1 = arith.constant 0 : i32
    return %c0_i32, %c0_i32_0 : i32, i32
  }
  func.func @transform_25(%arg0: i32) -> (i32, i32) {
    %c0_i32 = arith.constant 0 : i32
    %c0_i32_0 = arith.constant 0 : i32
    %c0_i32_1 = arith.constant 0 : i32
    return %c0_i32, %c0_i32_0 : i32, i32
  }
  func.func @transform_26(%arg0: i32) -> (i32, i32) {
    %c0_i32 = arith.constant 0 : i32
    %c0_i32_0 = arith.constant 0 : i32
    %c0_i32_1 = arith.constant 0 : i32
    return %c0_i32, %c0_i32_0 : i32, i32
  }
  func.func @transform_27(%arg0: i32) -> (i32, i32) {
    %c0_i32 = arith.constant 0 : i32
    %c0_i32_0 = arith.constant 0 : i32
    %c0_i32_1 = arith.constant 0 : i32
    return %c0_i32, %c0_i32_0 : i32, i32
  }
  func.func @transform_28(%arg0: i32) -> (i32, i32) {
    %c0_i32 = arith.constant 0 : i32
    %c0_i32_0 = arith.constant 0 : i32
    %c0_i32_1 = arith.constant 0 : i32
    return %c0_i32, %c0_i32_0 : i32, i32
  }
  func.func @transform_29(%arg0: i32) -> (i32, i32) {
    %c0_i32 = arith.constant 0 : i32
    %c0_i32_0 = arith.constant 0 : i32
    %c0_i32_1 = arith.constant 0 : i32
    return %c0_i32, %c0_i32_0 : i32, i32
  }
  func.func @transform_30(%arg0: i32) -> (i32, i32) {
    %c0_i32 = arith.constant 0 : i32
    %c0_i32_0 = arith.constant 0 : i32
    %c0_i32_1 = arith.constant 0 : i32
    return %c0_i32, %c0_i32_0 : i32, i32
  }
  func.func @transform_31(%arg0: i32) -> (i32, i32) {
    %c0_i32 = arith.constant 0 : i32
    %c0_i32_0 = arith.constant 0 : i32
    %c0_i32_1 = arith.constant 0 : i32
    return %c0_i32, %c0_i32_0 : i32, i32
  }
  func.func @transform_32(%arg0: i32) -> (i32, i32) {
    %c0_i32 = arith.constant 0 : i32
    %c0_i32_0 = arith.constant 0 : i32
    %c0_i32_1 = arith.constant 0 : i32
    return %c0_i32, %c0_i32_0 : i32, i32
  }
  func.func @transform_33(%arg0: i32) -> (i32, i32) {
    %c0_i32 = arith.constant 0 : i32
    %c0_i32_0 = arith.constant 0 : i32
    %c0_i32_1 = arith.constant 0 : i32
    return %c0_i32, %c0_i32_0 : i32, i32
  }
  func.func @transform_34(%arg0: i32) -> (i32, i32) {
    %c0_i32 = arith.constant 0 : i32
    %c0_i32_0 = arith.constant 0 : i32
    %c0_i32_1 = arith.constant 0 : i32
    return %c0_i32, %c0_i32_0 : i32, i32
  }
  func.func @transform_35(%arg0: i32) -> (i32, i32) {
    %c0_i32 = arith.constant 0 : i32
    %c0_i32_0 = arith.constant 0 : i32
    %c0_i32_1 = arith.constant 0 : i32
    return %c0_i32, %c0_i32_0 : i32, i32
  }
  func.func @transform_36(%arg0: i32) -> (i32, i32) {
    %c0_i32 = arith.constant 0 : i32
    %c0_i32_0 = arith.constant 0 : i32
    %c0_i32_1 = arith.constant 0 : i32
    return %c0_i32, %c0_i32_0 : i32, i32
  }
  func.func @transform_37(%arg0: i32) -> (i32, i32) {
    %c0_i32 = arith.constant 0 : i32
    %c0_i32_0 = arith.constant 0 : i32
    %c0_i32_1 = arith.constant 0 : i32
    return %c0_i32, %c0_i32_0 : i32, i32
  }
  func.func @transform_38(%arg0: i32) -> (i32, i32, i32) {
    %c0_i32 = arith.constant 0 : i32
    %c0_i32_0 = arith.constant 0 : i32
    %c0_i32_1 = arith.constant 0 : i32
    return %arg0, %c0_i32, %c0_i32_0 : i32, i32, i32
  }
}

</mosaic_0001>

<bundles_post_ra>
// kernel: tfs_dist_forward.1
= control target key start
LH: loop header
LB: loop body
LE: loop exit
PB: predicated region body
PF: predicated region fallthrough
CT: control target
= control target key end

     0   :  { %s9594_s6 = smov 1   ;;  %s9595_s10 = smov 2   ;;  %s11117_s0 = inlined_call_operand.smem [shape: u32[39], index: -1, kind: input, shape index: {}] }
   0x1   :  { %s9646_s5 = sld [smem:[%s11117_s0]]   ;;  %s9596_s14 = smov 3  }
   0x2   :  { %s9651_s9 = sld [smem:[%s11117_s0 + %s9594_s6]]   ;;  %s9597_s18 = smov 4  }
   0x3   :  { %s9656_s13 = sld [smem:[%s11117_s0 + %s9595_s10]]   ;;  %s9598_s22 = smov 5  }
   0x4   :  { %s9661_s17 = sld [smem:[%s11117_s0 + %s9596_s14]]   ;;  %s9599_s26 = smov 6  }
   0x5   :  { %s9666_s21 = sld [smem:[%s11117_s0 + %s9597_s18]]   ;;  %s9600_s30 = smov 7  }
   0x6   :  { %s9671_s25 = sld [smem:[%s11117_s0 + %s9598_s22]]   ;;  %s9601_s4 = smov 8  }
   0x7   :  { %s9676_s29 = sld [smem:[%s11117_s0 + %s9599_s26]]   ;;  %s9602_s10 = smov 9  }
   0x8   :  { %s9681_s3 = sld [smem:[%s11117_s0 + %s9600_s30]]   ;;  %s9603_s15 = smov 10  }
   0x9   :  { %s9686_s8 = sld [smem:[%s11117_s0 + %s9601_s4]]   ;;  %s9604_s20 = smov 11  }
   0xa   :  { %11139 = sst [smem:[#allocation3_spill]] %s9661_s17  ;;  %s9605_s26 = smov 12  }
   0xb   :  { %s9691_s14 = sld [smem:[%s11117_s0 + %s9602_s10]]   ;;  %s9606_s1 = smov 13  }
   0xc   :  { %s9696_s19 = sld [smem:[%s11117_s0 + %s9603_s15]]   ;;  %s9607_s7 = smov 14  }
   0xd   :  { %s9701_s24 = sld [smem:[%s11117_s0 + %s9604_s20]]   ;;  %s9608_s15 = smov 15  }
   0xe   :  { %s9706_s30 = sld [smem:[%s11117_s0 + %s9605_s26]]   ;;  %s9609_s22 = smov 16  }
   0xf   :  { %s9711_s6 = sld [smem:[%s11117_s0 + %s9606_s1]]   ;;  %s9610_s28 = smov 17  }
  0x10   :  { %s9716_s12 = sld [smem:[%s11117_s0 + %s9607_s7]]   ;;  %s9611_s7 = smov 18  }
  0x11   :  { %s9721_s20 = sld [smem:[%s11117_s0 + %s9608_s15]]   ;;  %s9612_s15 = smov 19  }
  0x12   :  { %s9726_s27 = sld [smem:[%s11117_s0 + %s9609_s22]]   ;;  %s9613_s22 = smov 20  }
  0x13   :  { %11140 = sst [smem:[#allocation4_spill]] %s9701_s24 }
  0x14   :  { %11141 = sst [smem:[#allocation5_spill]] %s9706_s30 }
  0x15   :  { %11142 = sst [smem:[#allocation6_spill]] %s9711_s6 }
  0x16   :  { %11143 = sst [smem:[#allocation7_spill]] %s9716_s12 }
  0x17   :  { %11144 = sst [smem:[#allocation8_spill]] %s9721_s20 }
  0x18   :  { %11145 = sst [smem:[#allocation9_spill]] %s9726_s27 }
  0x19   :  { %s9731_s4 = sld [smem:[%s11117_s0 + %s9610_s28]]   ;;  %s9614_s28 = smov 21  }
  0x1a   :  { %s9736_s12 = sld [smem:[%s11117_s0 + %s9611_s7]]   ;;  %s9615_s7 = smov 22  }
  0x1b   :  { %s9741_s20 = sld [smem:[%s11117_s0 + %s9612_s15]]   ;;  %s9616_s15 = smov 23  }
  0x1c   :  { %s9746_s27 = sld [smem:[%s11117_s0 + %s9613_s22]]   ;;  %s9617_s22 = smov 24  }
  0x1d   :  { %s9751_s30 = sld [smem:[%s11117_s0 + %s9614_s28]]   ;;  %s9618_s28 = smov 25  }
  0x1e   :  { %s9756_s6 = sld [smem:[%s11117_s0 + %s9615_s7]]   ;;  %s9619_s7 = smov 26  }
  0x1f   :  { %s9761_s17 = sld [smem:[%s11117_s0 + %s9616_s15]]   ;;  %s9620_s15 = smov 27  }
  0x20   :  { %11146 = sst [smem:[#allocation10_spill]] %s9736_s12 }
  0x21   :  { %s9766_s24 = sld [smem:[%s11117_s0 + %s9617_s22]]   ;;  %s9621_s22 = smov 28  }
  0x22   :  { %s9771_s12 = sld [smem:[%s11117_s0 + %s9618_s28]]   ;;  %s9622_s28 = smov 29  }
  0x23   :  { %82 = sst [smem:[#allocation2]] %s9646_s5 }
  0x24   :  { %11147 = sst [smem:[#allocation11_spill]] %s9756_s6 }
  0x25   :  { %11148 = sst [smem:[#allocation12_spill]] %s9761_s17 }
  0x26   :  { %s9776_s6 = sld [smem:[%s11117_s0 + %s9619_s7]]   ;;  %s9623_s7 = smov 30  }
  0x27   :  { %11149 = sst [smem:[#allocation13_spill]] %s9766_s24 }
  0x28   :  { %11150 = sst [smem:[#allocation14_spill]] %s9771_s12 }
  0x29   :  { %s9781_s17 = sld [smem:[%s11117_s0 + %s9620_s15]]   ;;  %s9624_s15 = smov 31  }
  0x2a   :  { %s9786_s24 = sld [smem:[%s11117_s0 + %s9621_s22]]   ;;  %s9625_s22 = smov 32  }
  0x2b   :  { %s9791_s12 = sld [smem:[%s11117_s0 + %s9622_s28]]   ;;  %s9626_s28 = smov 33  }
  0x2c   :  { %11151 = sst [smem:[#allocation15_spill]] %s9776_s6 }
  0x2d   :  { %s9796_s6 = sld [smem:[%s11117_s0 + %s9623_s7]]   ;;  %s9627_s7 = smov 34  }
  0x2e   :  { %s9801_s23 = sld [smem:[%s11117_s0 + %s9624_s15]]   ;;  %s9628_s15 = smov 35  }
  0x2f   :  { %11152 = sst [smem:[#allocation16_spill]] %s9781_s17 }
  0x30   :  { %11153 = sst [smem:[#allocation17_spill]] %s9786_s24  ;;  %s9629_s24 = smov 36  }
  0x31   :  { %11154 = sst [smem:[#allocation18_spill]] %s9791_s12  ;;  %s9630_s12 = smov 37  }
  0x32   :  { %s9806_s1 = sld [smem:[%s11117_s0 + %s9625_s22]]  }
  0x33   :  { %11155 = sst [smem:[#allocation19_spill]] %s9796_s6  ;;  %s9631_s6 = smov 38  }
  0x34   :  { %11156 = sst [smem:[#allocation20_spill]] %s9801_s23  ;;  %s9839_s23 = smov 0  }
  0x35   :  { %s9811_s10 = sld [smem:[%s11117_s0 + %s9626_s28]]  }
  0x36   :  { %s9816_s16 = sld [smem:[%s11117_s0 + %s9627_s7]]  }
  0x37   :  { %s9821_s17 = sld [smem:[%s11117_s0 + %s9628_s15]]  }
  0x38   :  { %11157 = sst [smem:[#allocation21_spill]] %s9806_s1 }
  0x39   :  { %s9826_s1 = sld [smem:[%s11117_s0 + %s9629_s24]]  }
  0x3b   :  { %11158 = sst [smem:[#allocation22_spill]] %s9811_s10 }
  0x3c   :  { %11159 = sst [smem:[#allocation23_spill]] %s9816_s16 }
  0x3d   :  { %s9831_s10 = sld [smem:[%s11117_s0 + %s9630_s12]]  }
  0x3e   :  { %s9836_s16 = sld [smem:[%s11117_s0 + %s9631_s6]]  }
  0x3f LB: > { %s7764_s15 = sadd.s32 4294967295, %s9592_s23   ;;  %p7768_p0 = scmp.ge.s32.totalorder %s9592_s23, 1  ;;  %s9592_s23 = sphi %s9839_s23, %s88_s23  }
  0x40   : > { %p1071_p1 = scmp.lt.s32.totalorder %s9592_s23, 3 }
  0x42   : > { %p1072_p2 = pnand %p7768_p0, %p1071_p1 }
  0x44   : > { %1075 = sbr.rel (%p1072_p2) target bundleno = 11694 (0x2dae), region = 172 }
  0x4b   : > { %v1197_v0 = vld [vmem:[%s9671_s25] sm:$0x7]  ;;  %vm1205_vm0 = vcmask 1042432   ;;  %p1173_p3 = scmp.lt.s32.totalorder %s7764_s15, 1  ;;  %vm1291_vm1 = vcmask 1043456   ;;  %v1382_v3 = vld [vmem:[%s9681_s3 + $0x8] sm:$0xff] }
  0x4c   : > { %8372 = vmatprep.subr.msk.mxu0 %vm1205_vm0, %v1197_v0  ;;  %v1196_v1 = vld [vmem:[%s9666_s21] sm:$0xf]  ;;  %vm1198_vm2 = vcmask 23552   ;;  %vm1284_vm3 = vcmask 31744   ;;  %v1383_v9 = vld [vmem:[%s9681_s3 + $0x10] sm:$0xff]  ;;  %v1384_v10 = vld [vmem:[%s9681_s3 + $0x18] sm:$0xff] }
  0x4d   : > { %v1381_v2 = vld [vmem:[%s9681_s3] sm:$0xff]  ;;  %8373 = vmatpush3.msk.msra.mxu0 %vm1205_vm0, %v1197_v0  ;;  %s11192_s15 = smov (!%p1173_p3, %s7764_s15), 1  ;;  %v8999_v11 = vpack.c.bf16 %v1384_v10, %v1383_v9  ;;  %v1477_v13 = vld [vmem:[%s9691_s14 + $0x8] sm:$0xff]  ;;  %vm1392_vm4 = vcmask 261120   ;;  %v1478_v22 = vld [vmem:[%s9691_s14 + $0x10] sm:$0xff]  ;;  %s9632_s24 = smov 4  }
  0x4e   : > { %v8995_v4 = vpack.c.bf16 %v1382_v3, %v1381_v2  ;;  %8377 = vmatprep.subr.msk.mxu0 %vm1291_vm1, %v1196_v1  ;;  %s8036_s0 = sshll.u32 %s11192_s15, 4  ;;  %v1476_v12 = vld [vmem:[%s9691_s14] sm:$0xff]  ;;  %v1479_v23 = vld [vmem:[%s9691_s14 + $0x18] sm:$0xff]  ;;  %v1579_v33 = vld [vmem:[%s9731_s4 + $0x8] sm:$0xff]  ;;  %vm1590_vm5 = vcmask 293888   ;;  %s11160_s22 = sld [smem:[#allocation10_spill]] }
  0x4f   : > { %s9856_s5 = scalar_lea.vmem %s9651_s9, %s8036_s0  ;;  %s1182_s18 = scalar_lea.vmem %s9656_s13, %s8036_s0  ;;  %v9003_v14 = vpack.c.bf16 %v1477_v13, %v1476_v12  ;;  %v7781_v15 = vld [vmem:[%s9676_s29] ss:$0 sm:$0xff]  ;;  %v9007_v24 = vpack.c.bf16 %v1479_v23, %v1478_v22  ;;  %v1676_v36 = vld [vmem:[%s9741_s20 + $0x8] sm:$0xff]  ;;  %v1580_v37 = vld [vmem:[%s9731_s4 + $0x10] sm:$0xff]  ;;  %vm1855_vm6 = vcmask 72704   ;;  %vm1945_vm8 = vcmask 130048  }
  0x50   : > { %8996 = vmatprep.subr.bf16.mxu1 %v8995_v4  ;;  %v9860_v5 = vld [vmem:[%s9856_s5] sm:$0xff]  ;;  %v1194_v7 = vld [vmem:[%s1182_s18 + $0x8] sm:$0xff]  ;;  %v1581_v38 = vld [vmem:[%s9731_s4 + $0x18] sm:$0xff]  ;;  %s11161_s26 = sld [smem:[#allocation11_spill]]  ;;  %s11164_s12 = sld [smem:[#allocation12_spill]]  ;;  %vm2528_vm9 = vcmask 1040384  }
  0x51   : > { %8998 = vmatpush3.bf16.msra.mxu1 %v8995_v4  ;;  %v1193_v6 = vld [vmem:[%s1182_s18] sm:$0xff]  ;;  %v9866_v8 = vld [vmem:[%s9856_s5 + $0x8] sm:$0xff]  ;;  %v9892_v40 = vpack.c.bf16 %v1581_v38, %v1580_v37  ;;  %v1677_v41 = vld [vmem:[%s9741_s20 + $0x10] sm:$0xff]  ;;  %vm9633_vm10 = vmmov 1   ;;  %s11167_s28 = sld [smem:[#allocation13_spill]]  ;;  %s11168_s2 = sld [smem:[#allocation16_spill]] }
  0x52   : > { %8374 = vmatprep.mubr.msk.f32.mxu0 %vm1198_vm2, %v1193_v6  ;;  %9000 = vmatprep.subr.bf16.mxu1 %v8999_v11  ;;  %v7782_v25 = vld [vmem:[%s9686_s8] ss:$0 sm:$0xff]  ;;  %v1678_v42 = vld [vmem:[%s9741_s20 + $0x18] sm:$0xff]  ;;  %v1766_v47 = vld [vmem:[%s9751_s30 + $0x8] sm:$0xff]  ;;  %s11169_s6 = sld [smem:[#allocation14_spill]]  ;;  %s11170_s7 = sld [smem:[#allocation15_spill]] }
  0x53   : > { %8375 = vmatmul.mubr.msk.f32.vlgmr.msra.gmra.mrb[0].mxu0 %vm1198_vm2, %v1194_v7  ;;  %v1578_v32 = vld [vmem:[%s9731_s4] sm:$0xff]  ;;  %v9897_v43 = vpack.c.bf16 %v1678_v42, %v1677_v41  ;;  %v1767_v56 = vld [vmem:[%s9751_s30 + $0x10] sm:$0xff]  ;;  %v1768_v57 = vld [vmem:[%s9751_s30 + $0x18] sm:$0xff]  ;;  %s11171_s11 = sld [smem:[#allocation17_spill]]  ;;  %s11173_s0 = sld [smem:[#allocation18_spill]]  ;;  %vm9636_vm12 = vmmov 0  }
  0x54   : > { %8378 = vmatpush3.msk.msra.mxu0 %vm1291_vm1, %v1196_v1  ;;  %8379 = vmatprep.mubr.msk.f32.mxu0 %vm1284_vm3, %v9860_v5  ;;  %v1675_v34 = vld [vmem:[%s9741_s20] sm:$0xff]  ;;  %v9885_v35 = vpack.c.bf16 %v1579_v33, %v1578_v32  ;;  %v9938_v59 = vpack.c.bf16 %v1768_v57, %v1767_v56  ;;  %v7807_v6 = vld [vmem:[%s9731_s4 + $0x30] sm:$0xff]  ;;  %vm9964_vm7 = vmpackc.low %vm1855_vm6, %vm1855_vm6  ;;  %s11174_s18 = sld [smem:[#allocation19_spill]]  ;;  %vm6724_vm14 = vcmask 130112   ;;  %vm6789_vm15 = vcmask 1041409  }
  0x55   : > { %9002 = vmatpush3.bf16.msra.mxu1 %v8999_v11  ;;  %9004 = vmatprep.subr.bf16.mxu0 %v9003_v14  ;;  %v9890_v39 = vpack.c.bf16 %v1676_v36, %v1675_v34  ;;  %v9907_v44 = vld [vmem:[%s9731_s4 + $0x20] sm:$0xf]  ;;  %v7808_v13 = vld [vmem:[%s9731_s4 + $0x38] sm:$0xff]  ;;  %v7810_v22 = vld [vmem:[%s9731_s4 + $0x48] sm:$0xf]  ;;  %vm6791_vm0 = vcmask 1042434  }
  0x56   : > { %9012 = vmatprep.subr.bf16.mxu1 %v9885_v35  ;;  %v9910_v45 = vld [vmem:[%s9741_s20 + $0x20] sm:$0xf]  ;;  %v7826_v23 = vld [vmem:[%s9751_s30 + $0x28] sm:$0xff]  ;;  %vm10074_vm11 = vmpackc.low %vm2528_vm9, %vm9633_vm10  ;;  %vm6795_vm2 = vcmask 1044484  }
  0x57   : > { %v1765_v46 = vld [vmem:[%s9751_s30] sm:$0xff]  ;;  %vm9361_vm13 = vmpackc.low %vm1284_vm3, %vm1284_vm3 }
  0x58   : > { %v9922_v48 = vpack.c.bf16 %v1766_v47, %v1765_v46  ;;  %v7785_v49 = vld [vmem:[%s9696_s19] ss:$0 sm:$0xff]  ;;  %v7832_v41 = vld [vmem:[%s11161_s26 + $0x1] ss:$0 sm:$0xff] }
  0x59   : > { %v1769_v61 = vld [vmem:[%s9751_s30 + $0x20] sm:$0xf] }
  0x5a   : > { %v7792_v62 = vld [vmem:[%s9746_s27] ss:$0 sm:$0xff] }
  0x5b   : > { %8380 = vmatmul.mubr.msk.f32.vlgmr.msra.gmra.mrb[0].mxu0 %vm1284_vm3, %v9866_v8  ;;  %v7788_v63 = vld [vmem:[%s11160_s22] ss:$0 sm:$0xff] }
  0x5c   : > { %9006 = vmatpush3.bf16.msra.mxu0 %v9003_v14  ;;  %v7796_v12 = vld [vmem:[%s11161_s26] ss:$0 sm:$0xff] }
  0x5d   : > { %9008 = vmatprep.subr.bf16.mxu0 %v9007_v24  ;;  %v7809_v14 = vld [vmem:[%s9731_s4 + $0x40] sm:$0xff] }
  0x60   : > { %9010 = vmatpush3.bf16.msra.mxu0 %v9007_v24  ;;  %v7827_v24 = vld [vmem:[%s9751_s30 + $0x30] sm:$0xff] }
  0x61   : > { %9020 = vmatprep.subr.bf16.mxu0 %v9890_v39 }
 0x12e   : > { %v8381_v16 = vpop.f32.mrb[0].mxu0 }
 0x12f   : > { %v1378_v17 = vadd.f32 %v8381_v16, %v7781_v15  ;;  %v1361_v18 = vpop.f32.mrb[1].mxu0 }
 0x130   : > { %v1377_v19 = vadd.f32 %v7781_v15, %v1361_v18 }
 0x131   : > { %v1380_v21 = vmax.f32 %v1378_v17, 0.0 }
 0x132   : > { %v1379_v20 = vmax.f32 %v1377_v19, 0.0 }
 0x134   : > { %8390 = vmatprep.mubr.msk.f32.mxu1 %vm1392_vm4, %v1379_v20  ;;  %v9979_v20 = vpack.c.bf16 %v7809_v14, %v7808_v13  ;;  %v10032_v14 = vld [vmem:[%s9741_s20 + $0x48] sm:$0xf] }
 0x135   : > { %8391 = vmatmul.mubr.msk.f32.vlgmr.msra.gmra.mrb[0].mxu1 %vm1392_vm4, %v1380_v21 }
 0x136   : > { %9014 = vmatpush3.bf16.msra.mxu1 %v9885_v35 }
 0x137   : > { %9016 = vmatprep.subr.bf16.mxu1 %v9892_v40 }
 0x13a   : > { %9018 = vmatpush3.bf16.msra.mxu1 %v9892_v40 }
 0x13b   : > { %8412 = vmatprep.subr.msk.mxu1 %vm1291_vm1, %v9907_v44 }
 0x13e   : > { %8413 = vmatpush3.msk.msra.mxu1 %vm1291_vm1, %v9907_v44 }
 0x13f   : > { %9028 = vmatprep.subr.bf16.mxu1 %v9922_v48 }
 0x208   : > { %v8392_v26 = vpop.f32.mrb[0].mxu1 }
 0x209   : > { %v1471_v27 = vadd.f32 %v8392_v26, %v7782_v25  ;;  %v1465_v28 = vpop.f32.mrb[1].mxu1  ;;  %v7829_v26 = vld [vmem:[%s9751_s30 + $0x40] sm:$0xff] }
 0x20a   : > { %v1466_v29 = vadd.f32 %v7782_v25, %v1465_v28  ;;  %v7828_v25 = vld [vmem:[%s9751_s30 + $0x38] sm:$0xff] }
 0x20b   : > { %v1475_v31 = vmax.f32 %v1471_v27, 0.0  ;;  %v9993_v27 = vpack.c.bf16 %v7827_v24, %v7826_v23  ;;  %v9995_v28 = vpack.c.bf16 %v7829_v26, %v7828_v25 }
 0x20c   : > { %v1474_v30 = vmax.f32 %v1466_v29, 0.0  ;;  %v7830_v29 = vld [vmem:[%s9751_s30 + $0x48] sm:$0xf] }
 0x20e   : > { %8401 = vmatprep.mubr.msk.f32.mxu0 %vm1392_vm4, %v1474_v30 }
 0x20f   : > { %8402 = vmatmul.mubr.msk.f32.vlgmr.msra.gmra.mrb[2].mxu0 %vm1392_vm4, %v1475_v31 }
 0x210   : > { %9022 = vmatpush3.bf16.msra.mxu0 %v9890_v39 }
 0x211   : > { %9024 = vmatprep.subr.bf16.mxu0 %v9897_v43 }
 0x214   : > { %9026 = vmatpush3.bf16.msra.mxu0 %v9897_v43 }
 0x215   : > { %8425 = vmatprep.subr.msk.mxu0 %vm1291_vm1, %v9910_v45 }
 0x218   : > { %8426 = vmatpush3.msk.msra.mxu0 %vm1291_vm1, %v9910_v45 }
 0x2e2   : > { %v8403_v50 = vpop.f32.mrb[2].mxu0 }
 0x2e3   : > { %v1559_v51 = vpop.f32.mrb[3].mxu0  ;;  %v1565_v53 = vadd.f32 %v8403_v50, %v7785_v49 }
 0x2e4   : > { %v1560_v52 = vadd.f32 %v7785_v49, %v1559_v51 }
 0x2e6   : > { %1570 = vrot.lane.b32.xlu0 %v1560_v52, %s9632_s24 }
 0x2ea   : > { %1572 = vrot.lane.b32.xlu0 %v1565_v53, %s9632_s24 }
 0x358   : > { %v1571_v54 = vpop.permute.xlu0 %1570 }
 0x359   : > { %v9930_v55 = vsel %vm1284_vm3, %v9860_v5, %v1571_v54  ;;  %v7806_v5 = vld [vmem:[%s9731_s4 + $0x28] sm:$0xff] }
 0x35a   : > { %8414 = vmatprep.mubr.msk.f32.mxu1 %vm1590_vm5, %v9930_v55  ;;  %8427 = vmatprep.mubr.msk.f32.mxu0 %vm1590_vm5, %v9930_v55  ;;  %v9969_v11 = vpack.c.bf16 %v7807_v6, %v7806_v5 }
 0x35c   : > { %v1573_v58 = vpop.permute.xlu0 %1572 }
 0x35d   : > { %v9942_v60 = vsel %vm1284_vm3, %v9866_v8, %v1573_v58 }
 0x35e   : > { %8415 = vmatmul.mubr.msk.f32.vlgmr.msra.gmra.mrb[2].mxu1 %vm1590_vm5, %v9942_v60  ;;  %8428 = vmatmul.mubr.msk.f32.vlgmr.msra.gmra.mrb[4].mxu0 %vm1590_vm5, %v9942_v60 }
 0x35f   : > { %9030 = vmatpush3.bf16.msra.mxu1 %v9922_v48  ;;  %8440 = vmatprep.mubr.msk.f32.mxu1 %vm1590_vm5, %v9930_v55 }
 0x360   : > { %9032 = vmatprep.subr.bf16.mxu1 %v9938_v59 }
 0x363   : > { %9034 = vmatpush3.bf16.msra.mxu1 %v9938_v59 }
 0x364   : > { %8438 = vmatprep.subr.msk.mxu1 %vm1291_vm1, %v1769_v61 }
 0x367   : > { %8439 = vmatpush3.msk.msra.mxu1 %vm1291_vm1, %v1769_v61 }
 0x368   : > { %8441 = vmatmul.mubr.msk.f32.vlgmr.msra.gmra.mrb[4].mxu1 %vm1590_vm5, %v9942_v60 }
 0x431   : > { %v8416_v0 = vpop.f32.mrb[2].mxu1  ;;  %v8429_v1 = vpop.f32.mrb[4].mxu0 }
 0x432   : > { %v1762_v2 = vadd.f32 %v8429_v1, %v7792_v62  ;;  %v1666_v3 = vpop.f32.mrb[3].mxu1  ;;  %v1756_v4 = vpop.f32.mrb[5].mxu0  ;;  %v1672_v18 = vadd.f32 %v8416_v0, %v7788_v63  ;;  %v7816_v0 = vld [vmem:[%s9741_s20 + $0x28] sm:$0xff]  ;;  %v7817_v1 = vld [vmem:[%s9741_s20 + $0x30] sm:$0xff] }
 0x433   : > { %v1667_v7 = vadd.f32 %v7788_v63, %v1666_v3  ;;  %v1757_v8 = vadd.f32 %v7792_v62, %v1756_v4 }
 0x435   : > { %v9035_v10 = vpack.c.bf16 %v1762_v2, %v1757_v8  ;;  %8447 = vmatprep.mubr.msk.f32.mxu0 %vm1855_vm6, %v1667_v7  ;;  %v10018_v2 = vpack.c.bf16 %v7817_v1, %v7816_v0  ;;  %v7818_v7 = vld [vmem:[%s9741_s20 + $0x38] sm:$0xff]  ;;  %v7819_v8 = vld [vmem:[%s9741_s20 + $0x40] sm:$0xff] }
 0x436   : > { %v10024_v13 = vpack.c.bf16 %v7819_v8, %v7818_v7  ;;  %v10095_v8 = vld [vmem:[%s9731_s4 + $0x70] sm:$0xf] }
 0x437   : > { %9037 = vmatprep.subr.msk.bf16.mxu0 %vm9964_vm7, %v9035_v10 }
 0x438   : > { %9040 = vmatpush3.bf16.xpose.msk.msra.mxu0 %vm9964_vm7, %v9035_v10 }
 0x439   : > { %9046 = vmatprep.subr.bf16.mxu0 %v9969_v11 }
 0x43b   : > { %v8442_v15 = vpop.f32.mrb[4].mxu1 }
 0x43c   : > { %v1852_v16 = vadd.f32 %v8442_v15, %v7796_v12  ;;  %v1846_v17 = vpop.f32.mrb[5].mxu1  ;;  %v10036_v15 = vld [vmem:[%s11160_s22 + $0x1] ss:$0 sm:$0xff] }
 0x43d   : > { %v1847_v19 = vadd.f32 %v7796_v12, %v1846_v17 }
 0x43f   : > { %v9041_v21 = vpack.c.bf16 %v1852_v16, %v1847_v19  ;;  %8448 = vmatmul.mubr.msk.f32.vlgmr.msra.gmra.mrb[6].mxu0 %vm1855_vm6, %v1672_v18  ;;  %v10051_v19 = vld [vmem:[%s9746_s27 + $0x1] ss:$0 sm:$0xff] }
 0x440   : > { %9048 = vmatpush3.bf16.msra.mxu0 %v9969_v11  ;;  %8467 = vmatprep.mubr.msk.f32.mxu0 %vm1590_vm5, %v9930_v55 }
 0x441   : > { %9042 = vmatprep.subr.bf16.mxu1 %v9041_v21  ;;  %9050 = vmatprep.subr.bf16.mxu0 %v9979_v20 }
 0x442   : > { %9044 = vmatpush3.bf16.msra.mxu1 %v9041_v21 }
 0x443   : > { %9054 = vmatprep.subr.bf16.mxu1 %v10018_v2 }
 0x444   : > { %9052 = vmatpush3.bf16.msra.mxu0 %v9979_v20 }
 0x445   : > { %8465 = vmatprep.subr.msk.mxu0 %vm1291_vm1, %v7810_v22 }
 0x448   : > { %8466 = vmatpush3.msk.msra.mxu0 %vm1291_vm1, %v7810_v22 }
 0x449   : > { %8468 = vmatmul.mubr.msk.f32.vlgmr.msra.gmra.mrb[8].mxu0 %vm1590_vm5, %v9942_v60  ;;  %9062 = vmatprep.subr.bf16.mxu0 %v9993_v27 }
 0x44a   : > { %9064 = vmatpush3.bf16.msra.mxu0 %v9993_v27  ;;  %8493 = vmatprep.mubr.msk.f32.mxu0 %vm1590_vm5, %v9930_v55 }
 0x44b   : > { %9066 = vmatprep.subr.bf16.mxu0 %v9995_v28 }
 0x44e   : > { %9068 = vmatpush3.bf16.msra.mxu0 %v9995_v28 }
 0x44f   : > { %8491 = vmatprep.subr.msk.mxu0 %vm1291_vm1, %v7830_v29 }
 0x452   : > { %8492 = vmatpush3.msk.msra.mxu0 %vm1291_vm1, %v7830_v29 }
 0x453   : > { %8494 = vmatmul.mubr.msk.f32.vlgmr.msra.gmra.mrb[10].mxu0 %vm1590_vm5, %v9942_v60 }
 0x512   : > { %v8449_v30 = vpop.f32.mrb[6].mxu0 }
 0x513   : > { %v1934_v31 = vpop.f32.mrb[7].mxu0  ;;  %v1944_v33 = vmul.f32 0.33333334, %v8449_v30 }
 0x514   : > { %v1943_v32 = vmul.f32 0.33333334, %v1934_v31 }
 0x515   : > { %v1949_v36 = vsel %vm1945_vm8, %v1944_v33, -inf }
 0x516   : > { %v1946_v34 = vsel %vm1945_vm8, %v1943_v32, -inf }
 0x517   : > { %1947 = vmax.xlane.f32.xlu1 %v1946_v34 }
 0x51b   : > { %1950 = vmax.xlane.f32.xlu1 %v1949_v36 }
 0x51c   : > { %v8469_v37 = vpop.f32.mrb[8].mxu0 }
 0x51d   : > { %v2134_v38 = vpop.f32.mrb[9].mxu0  ;;  %v2140_v26 = vadd.f32 %v8469_v37, %v10036_v15 }
 0x51e   : > { %v2135_v16 = vadd.f32 %v10036_v15, %v2134_v38 }
 0x526   : > { %v8495_v42 = vpop.f32.mrb[10].mxu0 }
 0x527   : > { %v2324_v46 = vadd.f32 %v8495_v42, %v7832_v41  ;;  %v2318_v47 = vpop.f32.mrb[11].mxu0 }
 0x528   : > { %v2319_v49 = vadd.f32 %v7832_v41, %v2318_v47 }
 0x52a   : > { %v9075_v50 = vpack.c.bf16 %v2324_v46, %v2319_v49 }
 0x5a4   : > { %v1948_v51 = vpop.xlane.xlu1 %1947 }
 0x5a5   : > { %v1952_v52 = vsub.f32 %v1943_v32, %v1948_v51 }
 0x5a7   : > { %v1954_v53 = vmul.f32 1.442695, %v1952_v52  ;;  %v7850_v52 = vld [vmem:[%s9731_s4 + $0x50] sm:$0xff] }
 0x5a8   : > { %v1951_v54 = vpop.xlane.xlu1 %1950 }
 0x5a9   : > { %9458 = vpow2.f32 %v1954_v53  ;;  %v1953_v56 = vsub.f32 %v1944_v33, %v1951_v54  ;;  %v7851_v53 = vld [vmem:[%s9731_s4 + $0x58] sm:$0xff] }
 0x5aa   : > { %v10067_v54 = vpack.c.bf16 %v7851_v53, %v7850_v52 }
 0x5ab   : > { %v1956_v57 = vmul.f32 1.442695, %v1953_v56  ;;  %v7842_v56 = vld [vmem:[%s11164_s12 + $0x10] sm:$0xff] }
 0x5ad   : > { %9460 = vpow2.f32 %v1956_v57  ;;  %v7843_v57 = vld [vmem:[%s11164_s12 + $0x18] sm:$0x1] }
 0x5b3   : > { %v9459_v58 = vpop.eup %9458 }
 0x5b4   : > { %v1958_v61 = vsel %vm1945_vm8, %v9459_v58, 0.0 }
 0x5b5   : > { %1959 = vadd.xlane.f32.xlu0 %v1958_v61 }
 0x5b7   : > { %v9461_v62 = vpop.eup %9460 }
 0x5b8   : > { %v1961_v63 = vsel %vm1945_vm8, %v9461_v62, 0.0 }
 0x5b9   : > { %1962 = vadd.xlane.f32.xlu1 %v1961_v63 }
 0x642   : > { %v1960_v3 = vpop.xlane.xlu0 %1959 }
 0x643   : > { %9462 = vrcp.f32 %v1960_v3  ;;  %v7852_v3 = vld [vmem:[%s9731_s4 + $0x60] sm:$0xff] }
 0x646   : > { %v1963_v4 = vpop.xlane.xlu1 %1962 }
 0x647   : > { %9464 = vrcp.f32 %v1963_v4  ;;  %v7853_v4 = vld [vmem:[%s9731_s4 + $0x68] sm:$0xff] }
 0x648   : > { %v10087_v7 = vpack.c.bf16 %v7853_v4, %v7852_v3 }
 0x64d   : > { %v9463_v5 = vpop.eup %9462 }
 0x64e   : > { %v1966_v6 = vmul.f32 %v9463_v5, %v9459_v58  ;;  %v10072_v58 = vpack.c.bf16 %v7843_v57, %v7842_v56  ;;  %v10177_v56 = vld [vmem:[%s9746_s27 + $0x2] ss:$0 sm:$0xff] }
 0x650   : > { %8454 = vmatprep.mubr.msk.f32.mxu1 %vm1945_vm8, %v1966_v6  ;;  %9081 = vmatprep.subr.msk.bf16.mxu0 %vm10074_vm11, %v10072_v58 }
 0x651   : > { %v9465_v10 = vpop.eup %9464  ;;  %9084 = vmatpush3.bf16.msk.msra.mxu0 %vm10074_vm11, %v10072_v58 }
 0x652   : > { %v1967_v12 = vmul.f32 %v9465_v10, %v9461_v62  ;;  %v7870_v10 = vld [vmem:[%s9751_s30 + $0x50] sm:$0xff] }
 0x654   : > { %8455 = vmatmul.mubr.msk.f32.vlgmr.msra.gmra.mrb[6].mxu1 %vm1945_vm8, %v1967_v12  ;;  %v7871_v12 = vld [vmem:[%s9751_s30 + $0x58] sm:$0xff] }
 0x655   : > { %9056 = vmatpush3.bf16.msra.mxu1 %v10018_v2  ;;  %8480 = vmatprep.mubr.msk.f32.mxu1 %vm1590_vm5, %v9930_v55 }
 0x656   : > { %9058 = vmatprep.subr.bf16.mxu1 %v10024_v13 }
 0x659   : > { %9060 = vmatpush3.bf16.msra.mxu1 %v10024_v13 }
 0x65a   : > { %8478 = vmatprep.subr.msk.mxu1 %vm1291_vm1, %v10032_v14 }
 0x65d   : > { %8479 = vmatpush3.msk.msra.mxu1 %vm1291_vm1, %v10032_v14 }
 0x65e   : > { %8481 = vmatmul.mubr.msk.f32.vlgmr.msra.gmra.mrb[8].mxu1 %vm1590_vm5, %v9942_v60 }
 0x65f   : > { %8500 = vmatprep.mubr.msk.f32.mxu1 %vm1855_vm6, %v2135_v16  ;;  %v7872_v16 = vld [vmem:[%s9751_s30 + $0x60] sm:$0xff] }
 0x727   : > { %v10046_v17 = vpop.f32.mrb[6].mxu1 }
 0x728   : > { %v10048_v18 = vpop.f32.mrb[7].mxu1 }
 0x731   : > { %v8482_v21 = vpop.f32.mrb[8].mxu1 }
 0x732   : > { %v2232_v22 = vadd.f32 %v8482_v21, %v10051_v19  ;;  %v2226_v23 = vpop.f32.mrb[9].mxu1  ;;  %v7873_v21 = vld [vmem:[%s9751_s30 + $0x68] sm:$0xff] }
 0x733   : > { %v2227_v24 = vadd.f32 %v10051_v19, %v2226_v23  ;;  %v10106_v23 = vpack.c.bf16 %v7873_v21, %v7872_v16 }
 0x735   : > { %v9069_v25 = vpack.c.bf16 %v2232_v22, %v2227_v24  ;;  %v10104_v22 = vpack.c.bf16 %v7871_v12, %v7870_v10  ;;  %v10118_v24 = vld [vmem:[%s9751_s30 + $0x70] sm:$0xf] }
 0x737   : > { %9071 = vmatprep.subr.msk.bf16.mxu1 %vm9964_vm7, %v9069_v25 }
 0x738   : > { %9074 = vmatpush3.bf16.xpose.msk.msra.mxu1 %vm9964_vm7, %v9069_v25  ;;  %v2049_v25 = vld [vmem:[%s11164_s12] sm:$0xff] }
 0x739   : > { %9076 = vmatprep.subr.bf16.mxu1 %v9075_v50 }
 0x73f   : > { %8501 = vmatmul.mubr.msk.f32.vlgmr.msra.gmra.mrb[10].mxu1 %vm1855_vm6, %v2140_v26  ;;  %v2050_v26 = vld [vmem:[%s11164_s12 + $0x8] sm:$0x1] }
 0x740   : > { %9078 = vmatpush3.bf16.msra.mxu1 %v9075_v50 }
 0x741   : > { %9092 = vmatprep.subr.bf16.mxu1 %v10067_v54 }
 0x812   : > { %v8502_v29 = vpop.f32.mrb[10].mxu1 }
 0x813   : > { %v2405_v30 = vpop.f32.mrb[11].mxu1  ;;  %v2415_v32 = vmul.f32 0.33333334, %v8502_v29  ;;  %v10129_v29 = vpack.c.bf16 %v2050_v26, %v2049_v25 }
 0x814   : > { %v2414_v31 = vmul.f32 0.33333334, %v2405_v30  ;;  %v7860_v30 = vld [vmem:[%s9741_s20 + $0x50] sm:$0xff] }
 0x815   : > { %v2419_v34 = vsel %vm1945_vm8, %v2415_v32, -inf  ;;  %9087 = vmatprep.subr.msk.bf16.mxu0 %vm10074_vm11, %v10129_v29 }
 0x816   : > { %v2416_v33 = vsel %vm1945_vm8, %v2414_v31, -inf }
 0x817   : > { %2417 = vmax.xlane.f32.xlu1 %v2416_v33 }
 0x81b   : > { %2420 = vmax.xlane.f32.xlu1 %v2419_v34 }
 0x8a4   : > { %v2418_v36 = vpop.xlane.xlu1 %2417 }
 0x8a5   : > { %v2422_v38 = vsub.f32 %v2414_v31, %v2418_v36  ;;  %v7861_v31 = vld [vmem:[%s9741_s20 + $0x58] sm:$0xff]  ;;  %v7862_v36 = vld [vmem:[%s9741_s20 + $0x60] sm:$0xff] }
 0x8a6   : > { %v10136_v34 = vpack.c.bf16 %v7861_v31, %v7860_v30 }
 0x8a7   : > { %v2424_v41 = vmul.f32 1.442695, %v2422_v38  ;;  %v7863_v38 = vld [vmem:[%s9741_s20 + $0x68] sm:$0xff] }
 0x8a8   : > { %v2421_v37 = vpop.xlane.xlu1 %2420 }
 0x8a9   : > { %9466 = vpow2.f32 %v2424_v41  ;;  %v2423_v42 = vsub.f32 %v2415_v32, %v2421_v37  ;;  %v10148_v41 = vpack.c.bf16 %v7863_v38, %v7862_v36 }
 0x8ab   : > { %v2426_v46 = vmul.f32 1.442695, %v2423_v42 }
 0x8ad   : > { %9468 = vpow2.f32 %v2426_v46  ;;  %v10157_v46 = vld [vmem:[%s9741_s20 + $0x70] sm:$0xf] }
 0x8b3   : > { %v9467_v47 = vpop.eup %9466 }
 0x8b4   : > { %v2428_v49 = vsel %vm1945_vm8, %v9467_v47, 0.0 }
 0x8b5   : > { %2429 = vadd.xlane.f32.xlu1 %v2428_v49 }
 0x8b7   : > { %v9469_v50 = vpop.eup %9468 }
 0x8b8   : > { %v2431_v51 = vsel %vm1945_vm8, %v9469_v50, 0.0 }
 0x8b9   : > { %2432 = vadd.xlane.f32.xlu1 %v2431_v51 }
 0x942   : > { %v2430_v62 = vpop.xlane.xlu1 %2429 }
 0x943   : > { %9470 = vrcp.f32 %v2430_v62 }
 0x946   : > { %v2433_v63 = vpop.xlane.xlu1 %2432 }
 0x947   : > { %9472 = vrcp.f32 %v2433_v63 }
 0x94d   : > { %v9471_v0 = vpop.eup %9470 }
 0x94e   : > { %v2436_v1 = vmul.f32 %v9471_v0, %v9467_v47  ;;  %v10166_v47 = vld [vmem:[%s11161_s26 + $0x2] ss:$0 sm:$0xff] }
 0x950   : > { %8507 = vmatprep.mubr.msk.f32.mxu1 %vm1945_vm8, %v2436_v1 }
 0x951   : > { %v9473_v5 = vpop.eup %9472 }
 0x952   : > { %v2437_v6 = vmul.f32 %v9473_v5, %v9469_v50 }
 0x954   : > { %8508 = vmatmul.mubr.msk.f32.vlgmr.msra.gmra.mrb[12].mxu1 %vm1945_vm8, %v2437_v6 }
 0x955   : > { %9094 = vmatpush3.bf16.msra.mxu1 %v10067_v54  ;;  %8534 = vmatprep.mubr.msk.f32.mxu1 %vm1590_vm5, %v9930_v55 }
 0x956   : > { %9096 = vmatprep.subr.bf16.mxu1 %v10087_v7 }
 0x959   : > { %9098 = vmatpush3.bf16.msra.mxu1 %v10087_v7 }
 0x95a   : > { %8532 = vmatprep.subr.msk.mxu1 %vm1291_vm1, %v10095_v8 }
 0x95d   : > { %8533 = vmatpush3.msk.msra.mxu1 %vm1291_vm1, %v10095_v8 }
 0x95e   : > { %8535 = vmatmul.mubr.msk.f32.vlgmr.msra.gmra.mrb[14].mxu1 %vm1590_vm5, %v9942_v60  ;;  %9108 = vmatprep.subr.bf16.mxu1 %v10104_v22 }
 0x95f   : > { %9110 = vmatpush3.bf16.msra.mxu1 %v10104_v22  ;;  %8560 = vmatprep.mubr.msk.f32.mxu1 %vm1590_vm5, %v9930_v55 }
 0x960   : > { %9112 = vmatprep.subr.bf16.mxu1 %v10106_v23 }
 0x963   : > { %9114 = vmatpush3.bf16.msra.mxu1 %v10106_v23 }
 0x964   : > { %8558 = vmatprep.subr.msk.mxu1 %vm1291_vm1, %v10118_v24 }
 0x967   : > { %8559 = vmatpush3.msk.msra.mxu1 %vm1291_vm1, %v10118_v24 }
 0x968   : > { %8561 = vmatmul.mubr.msk.f32.vlgmr.msra.gmra.mrb[16].mxu1 %vm1590_vm5, %v9942_v60 }
 0xa27   : > { %v8509_v32 = vpop.f32.mrb[12].mxu1 }
 0xa28   : > { %v2510_v33 = vpop.f32.mrb[13].mxu1 }
 0xa29   : > { %8514 = vmatprep.mubr.msk.f32.mxu0 %vm1855_vm6, %v2510_v33 }
 0xa2a   : > { %8515 = vmatmul.mubr.msk.f32.vlgmr.msra.gmra.mrb[12].mxu0 %vm1855_vm6, %v8509_v32 }
 0xa2b   : > { %9090 = vmatpush3.bf16.msk.msra.mxu0 %vm10074_vm11, %v10129_v29  ;;  %8521 = vmatprep.mubr.msk.f32.mxu0 %vm1855_vm6, %v10048_v18  ;;  %v10161_v18 = vld [vmem:[%s11160_s22 + $0x2] ss:$0 sm:$0xff] }
 0xa2c   : > { %9100 = vmatprep.subr.bf16.mxu0 %v10136_v34 }
 0xa31   : > { %v8536_v37 = vpop.f32.mrb[14].mxu1 }
 0xa32   : > { %v2774_v42 = vpop.f32.mrb[15].mxu1  ;;  %8522 = vmatmul.mubr.msk.f32.vlgmr.msra.gmra.mrb[12].mxu0 %vm1855_vm6, %v10046_v17  ;;  %v2780_v3 = vadd.f32 %v8536_v37, %v10161_v18 }
 0xa33   : > { %9102 = vmatpush3.bf16.msra.mxu0 %v10136_v34  ;;  %8547 = vmatprep.mubr.msk.f32.mxu0 %vm1590_vm5, %v9930_v55  ;;  %v2775_v17 = vadd.f32 %v10161_v18, %v2774_v42  ;;  %v7891_v42 = vld [vmem:[%s9731_s4 + $0x78] sm:$0xff] }
 0xa34   : > { %9104 = vmatprep.subr.bf16.mxu0 %v10148_v41 }
 0xa37   : > { %9106 = vmatpush3.bf16.msra.mxu0 %v10148_v41 }
 0xa38   : > { %8545 = vmatprep.subr.msk.mxu0 %vm1291_vm1, %v10157_v46 }
 0xa3b   : > { %8546 = vmatpush3.msk.msra.mxu0 %vm1291_vm1, %v10157_v46  ;;  %v8562_v49 = vpop.f32.mrb[16].mxu1 }
 0xa3c   : > { %v2964_v50 = vadd.f32 %v8562_v49, %v10166_v47  ;;  %8548 = vmatmul.mubr.msk.f32.vlgmr.msra.gmra.mrb[14].mxu0 %vm1590_vm5, %v9942_v60  ;;  %v2958_v51 = vpop.f32.mrb[17].mxu1 }
 0xa3d   : > { %v2959_v52 = vadd.f32 %v10166_v47, %v2958_v51  ;;  %8567 = vmatprep.mubr.msk.f32.mxu0 %vm1855_vm6, %v2775_v17  ;;  %v7892_v17 = vld [vmem:[%s9731_s4 + $0x80] sm:$0xff]  ;;  %v7887_v51 = vld [vmem:[%s11164_s12 + $0x28] sm:$0x1] }
 0xa3e   : > { %v10193_v49 = vpack.c.bf16 %v7892_v17, %v7891_v42 }
 0xa3f   : > { %v9121_v53 = vpack.c.bf16 %v2964_v50, %v2959_v52  ;;  %v7886_v50 = vld [vmem:[%s11164_s12 + $0x20] sm:$0xff] }
 0xa40   : > { %v10198_v52 = vpack.c.bf16 %v7887_v51, %v7886_v50  ;;  %v10265_v50 = vld [vmem:[%s9741_s20 + $0x98] sm:$0xf]  ;;  %v10269_v51 = vld [vmem:[%s11160_s22 + $0x3] ss:$0 sm:$0xff] }
 0xa41   : > { %9122 = vmatprep.subr.bf16.mxu1 %v9121_v53 }
 0xa42   : > { %9124 = vmatpush3.bf16.msra.mxu1 %v9121_v53 }
 0xa43   : > { %9132 = vmatprep.subr.bf16.mxu1 %v10193_v49 }
 0xb0f   : > { %v8549_v57 = vpop.f32.mrb[14].mxu0 }
 0xb10   : > { %v2872_v62 = vadd.f32 %v8549_v57, %v10177_v56  ;;  %v2866_v63 = vpop.f32.mrb[15].mxu0 }
 0xb11   : > { %v2867_v0 = vadd.f32 %v10177_v56, %v2866_v63 }
 0xb13   : > { %v9115_v1 = vpack.c.bf16 %v2872_v62, %v2867_v0  ;;  %v7893_v0 = vld [vmem:[%s9731_s4 + $0x88] sm:$0xff] }
 0xb15   : > { %9117 = vmatprep.subr.msk.bf16.mxu0 %vm9964_vm7, %v9115_v1 }
 0xb16   : > { %9120 = vmatpush3.bf16.xpose.msk.msra.mxu0 %vm9964_vm7, %v9115_v1  ;;  %v7894_v1 = vld [vmem:[%s9731_s4 + $0x90] sm:$0xff] }
 0xb17   : > { %9127 = vmatprep.subr.msk.bf16.mxu0 %vm10074_vm11, %v10198_v52 }
 0xb1d   : > { %8568 = vmatmul.mubr.msk.f32.vlgmr.msra.gmra.mrb[16].mxu0 %vm1855_vm6, %v2780_v3 }
 0xb1e   : > { %9130 = vmatpush3.bf16.msk.msra.mxu0 %vm10074_vm11, %v10198_v52 }
 0xbf0   : > { %v8569_v4 = vpop.f32.mrb[16].mxu0 }
 0xbf1   : > { %v3045_v5 = vpop.f32.mrb[17].mxu0  ;;  %v3055_v10 = vmul.f32 0.33333334, %v8569_v4 }
 0xbf2   : > { %v3054_v6 = vmul.f32 0.33333334, %v3045_v5  ;;  %v10209_v5 = vpack.c.bf16 %v7894_v1, %v7893_v0 }
 0xbf3   : > { %v3059_v16 = vsel %vm1945_vm8, %v3055_v10, -inf }
 0xbf4   : > { %v3056_v12 = vsel %vm1945_vm8, %v3054_v6, -inf }
 0xbf5   : > { %3057 = vmax.xlane.f32.xlu1 %v3056_v12  ;;  %v7912_v12 = vld [vmem:[%s9751_s30 + $0x80] sm:$0xff] }
 0xbf9   : > { %3060 = vmax.xlane.f32.xlu1 %v3059_v16  ;;  %v7913_v16 = vld [vmem:[%s9751_s30 + $0x88] sm:$0xff] }
 0xc82   : > { %v3058_v21 = vpop.xlane.xlu1 %3057 }
 0xc83   : > { %v3062_v25 = vsub.f32 %v3054_v6, %v3058_v21  ;;  %v10217_v6 = vld [vmem:[%s9731_s4 + $0x98] sm:$0xf]  ;;  %v7914_v21 = vld [vmem:[%s9751_s30 + $0x90] sm:$0xff] }
 0xc85   : > { %v3064_v26 = vmul.f32 1.442695, %v3062_v25 }
 0xc86   : > { %v3061_v30 = vpop.xlane.xlu1 %3060 }
 0xc87   : > { %9474 = vpow2.f32 %v3064_v26  ;;  %v3063_v31 = vsub.f32 %v3055_v10, %v3061_v30  ;;  %v7911_v10 = vld [vmem:[%s9751_s30 + $0x78] sm:$0xff]  ;;  %v10228_v26 = vpack.c.bf16 %v7914_v21, %v7913_v16 }
 0xc88   : > { %v10226_v25 = vpack.c.bf16 %v7912_v12, %v7911_v10  ;;  %v10240_v30 = vld [vmem:[%s9751_s30 + $0x98] sm:$0xf]  ;;  %v10285_v12 = vld [vmem:[%s9746_s27 + $0x3] ss:$0 sm:$0xff] }
 0xc89   : > { %v3066_v32 = vmul.f32 1.442695, %v3063_v31  ;;  %v7901_v31 = vld [vmem:[%s9741_s20 + $0x78] sm:$0xff] }
 0xc8b   : > { %9476 = vpow2.f32 %v3066_v32  ;;  %v7902_v32 = vld [vmem:[%s9741_s20 + $0x80] sm:$0xff] }
 0xc91   : > { %v9475_v33 = vpop.eup %9474 }
 0xc92   : > { %v3068_v36 = vsel %vm1945_vm8, %v9475_v33, 0.0 }
 0xc93   : > { %3069 = vadd.xlane.f32.xlu1 %v3068_v36  ;;  %v7903_v36 = vld [vmem:[%s9741_s20 + $0x88] sm:$0xff] }
 0xc95   : > { %v9477_v38 = vpop.eup %9476 }
 0xc96   : > { %v3071_v37 = vsel %vm1945_vm8, %v9477_v38, 0.0 }
 0xc97   : > { %3072 = vadd.xlane.f32.xlu0 %v3071_v37 }
 0xd20   : > { %v3070_v53 = vpop.xlane.xlu1 %3069 }
 0xd21   : > { %9478 = vrcp.f32 %v3070_v53 }
 0xd24   : > { %v3073_v57 = vpop.xlane.xlu0 %3072 }
 0xd25   : > { %9480 = vrcp.f32 %v3073_v57 }
 0xd2b   : > { %v9479_v62 = vpop.eup %9478 }
 0xd2c   : > { %v3076_v63 = vmul.f32 %v9479_v62, %v9475_v33  ;;  %v10251_v33 = vpack.c.bf16 %v7902_v32, %v7901_v31 }
 0xd2e   : > { %8574 = vmatprep.mubr.msk.f32.mxu1 %vm1945_vm8, %v3076_v63  ;;  %9140 = vmatprep.subr.bf16.mxu0 %v10251_v33  ;;  %v10280_v63 = vld [vmem:[%s11161_s26 + $0x3] ss:$0 sm:$0xff] }
 0xd2f   : > { %v9481_v3 = vpop.eup %9480 }
 0xd30   : > { %v3077_v4 = vmul.f32 %v9481_v3, %v9477_v38  ;;  %v7904_v38 = vld [vmem:[%s9741_s20 + $0x90] sm:$0xff] }
 0xd31   : > { %v10256_v17 = vpack.c.bf16 %v7904_v38, %v7903_v36 }
 0xd32   : > { %8575 = vmatmul.mubr.msk.f32.vlgmr.msra.gmra.mrb[18].mxu1 %vm1945_vm8, %v3077_v4 }
 0xd33   : > { %9134 = vmatpush3.bf16.msra.mxu1 %v10193_v49  ;;  %8594 = vmatprep.mubr.msk.f32.mxu1 %vm1590_vm5, %v9930_v55 }
 0xd34   : > { %9136 = vmatprep.subr.bf16.mxu1 %v10209_v5 }
 0xd37   : > { %9138 = vmatpush3.bf16.msra.mxu1 %v10209_v5 }
 0xd38   : > { %8592 = vmatprep.subr.msk.mxu1 %vm1291_vm1, %v10217_v6 }
 0xd3b   : > { %8593 = vmatpush3.msk.msra.mxu1 %vm1291_vm1, %v10217_v6 }
 0xd3c   : > { %8595 = vmatmul.mubr.msk.f32.vlgmr.msra.gmra.mrb[20].mxu1 %vm1590_vm5, %v9942_v60  ;;  %9148 = vmatprep.subr.bf16.mxu1 %v10226_v25 }
 0xd3d   : > { %9150 = vmatpush3.bf16.msra.mxu1 %v10226_v25  ;;  %8620 = vmatprep.mubr.msk.f32.mxu1 %vm1590_vm5, %v9930_v55 }
 0xd3e   : > { %9152 = vmatprep.subr.bf16.mxu1 %v10228_v26 }
 0xd41   : > { %9154 = vmatpush3.bf16.msra.mxu1 %v10228_v26 }
 0xd42   : > { %8618 = vmatprep.subr.msk.mxu1 %vm1291_vm1, %v10240_v30 }
 0xd45   : > { %8619 = vmatpush3.msk.msra.mxu1 %vm1291_vm1, %v10240_v30 }
 0xd46   : > { %8621 = vmatmul.mubr.msk.f32.vlgmr.msra.gmra.mrb[22].mxu1 %vm1590_vm5, %v9942_v60 }
 0xe05   : > { %v8576_v37 = vpop.f32.mrb[18].mxu1 }
 0xe06   : > { %v3150_v42 = vpop.f32.mrb[19].mxu1 }
 0xe07   : > { %8581 = vmatprep.mubr.msk.f32.mxu0 %vm1855_vm6, %v3150_v42 }
 0xe08   : > { %8582 = vmatmul.mubr.msk.f32.vlgmr.msra.gmra.mrb[12].mxu0 %vm1855_vm6, %v8576_v37 }
 0xe09   : > { %9142 = vmatpush3.bf16.msra.mxu0 %v10251_v33  ;;  %8607 = vmatprep.mubr.msk.f32.mxu0 %vm1590_vm5, %v9930_v55 }
 0xe0a   : > { %9144 = vmatprep.subr.bf16.mxu0 %v10256_v17 }
 0xe0d   : > { %9146 = vmatpush3.bf16.msra.mxu0 %v10256_v17 }
 0xe0e   : > { %8605 = vmatprep.subr.msk.mxu0 %vm1291_vm1, %v10265_v50 }
 0xe0f   : > { %v8596_v53 = vpop.f32.mrb[20].mxu1 }
 0xe10   : > { %v3331_v57 = vpop.f32.mrb[21].mxu1  ;;  %v3337_v38 = vadd.f32 %v8596_v53, %v10269_v51 }
 0xe11   : > { %v3332_v62 = vadd.f32 %v10269_v51, %v3331_v57  ;;  %8606 = vmatpush3.msk.msra.mxu0 %vm1291_vm1, %v10265_v50 }
 0xe12   : > { %8608 = vmatmul.mubr.msk.f32.vlgmr.msra.gmra.mrb[18].mxu0 %vm1590_vm5, %v9942_v60 }
 0xe13   : > { %8627 = vmatprep.mubr.msk.f32.mxu0 %vm1855_vm6, %v3332_v62 }
 0xe19   : > { %v8622_v0 = vpop.f32.mrb[22].mxu1 }
 0xe1a   : > { %v3521_v1 = vadd.f32 %v8622_v0, %v10280_v63  ;;  %v3515_v3 = vpop.f32.mrb[23].mxu1 }
 0xe1b   : > { %v3516_v4 = vadd.f32 %v10280_v63, %v3515_v3 }
 0xe1d   : > { %v9161_v10 = vpack.c.bf16 %v3521_v1, %v3516_v4 }
 0xe1f   : > { %9162 = vmatprep.subr.bf16.mxu1 %v9161_v10 }
 0xe20   : > { %9164 = vmatpush3.bf16.msra.mxu1 %v9161_v10 }
 0xee5   : > { %v8609_v16 = vpop.f32.mrb[18].mxu0 }
 0xee6   : > { %v3429_v21 = vadd.f32 %v8609_v16, %v10285_v12  ;;  %v3423_v31 = vpop.f32.mrb[19].mxu0 }
 0xee7   : > { %v3424_v32 = vadd.f32 %v10285_v12, %v3423_v31 }
 0xee9   : > { %v9155_v36 = vpack.c.bf16 %v3429_v21, %v3424_v32 }
 0xeeb   : > { %9157 = vmatprep.subr.msk.bf16.mxu0 %vm9964_vm7, %v9155_v36 }
 0xeec   : > { %9160 = vmatpush3.bf16.xpose.msk.msra.mxu0 %vm9964_vm7, %v9155_v36 }
 0xef3   : > { %8628 = vmatmul.mubr.msk.f32.vlgmr.msra.gmra.mrb[20].mxu0 %vm1855_vm6, %v3337_v38 }
 0xfc6   : > { %v8629_v37 = vpop.f32.mrb[20].mxu0 }
 0xfc7   : > { %v3612_v42 = vmul.f32 0.33333334, %v8629_v37  ;;  %v3602_v57 = vpop.f32.mrb[21].mxu0  ;;  %v7927_v37 = vld [vmem:[%s11164_s12 + $0x30] sm:$0xff] }
 0xfc8   : > { %v3611_v62 = vmul.f32 0.33333334, %v3602_v57  ;;  %v7928_v57 = vld [vmem:[%s11164_s12 + $0x38] sm:$0x1] }
 0xfc9   : > { %v3616_v0 = vsel %vm1945_vm8, %v3612_v42, -inf }
 0xfca   : > { %3617 = vmax.xlane.f32.xlu0 %v3616_v0  ;;  %v3613_v1 = vsel %vm1945_vm8, %v3611_v62, -inf  ;;  %v10301_v0 = vpack.c.bf16 %v7928_v57, %v7927_v37 }
 0xfcb   : > { %3614 = vmax.xlane.f32.xlu1 %v3613_v1 }
 0xfcc   : > { %9167 = vmatprep.subr.msk.bf16.mxu0 %vm10074_vm11, %v10301_v0 }
 0xfcd   : > { %9170 = vmatpush3.bf16.msk.msra.mxu0 %vm10074_vm11, %v10301_v0 }
 0xfce   : > { %9180 = vmatprep.subr.bf16.mxu0 %v9885_v35 }
0x1057   : > { %v3618_v3 = vpop.xlane.xlu0 %3617 }
0x1058   : > { %v3620_v4 = vsub.f32 %v3612_v42, %v3618_v3  ;;  %v3615_v10 = vpop.xlane.xlu1 %3614 }
0x1059   : > { %v3619_v16 = vsub.f32 %v3611_v62, %v3615_v10 }
0x105a   : > { %v3623_v21 = vmul.f32 1.442695, %v3620_v4 }
0x105b   : > { %v3621_v53 = vmul.f32 1.442695, %v3619_v16 }
0x105c   : > { %9482 = vpow2.f32 %v3623_v21 }
0x105d   : > { %9484 = vpow2.f32 %v3621_v53  ;;  %v10323_v53 = vld [vmem:[%s11167_s28] ss:$0 sm:$0xff]  ;;  %s11177_s28 = sld [smem:[#allocation6_spill]] }
0x1066   : > { %v9483_v31 = vpop.eup %9482 }
0x1067   : > { %v9485_v32 = vpop.eup %9484  ;;  %v3628_v36 = vsel %vm1945_vm8, %v9483_v31, 0.0 }
0x1068   : > { %3629 = vadd.xlane.f32.xlu0 %v3628_v36  ;;  %v3625_v38 = vsel %vm1945_vm8, %v9485_v32, 0.0 }
0x1069   : > { %3626 = vadd.xlane.f32.xlu1 %v3625_v38 }
0x10f5   : > { %v3630_v42 = vpop.xlane.xlu0 %3629 }
0x10f6   : > { %9486 = vrcp.f32 %v3630_v42  ;;  %v3627_v62 = vpop.xlane.xlu1 %3626 }
0x10f7   : > { %9488 = vrcp.f32 %v3627_v62 }
0x1100   : > { %v9487_v1 = vpop.eup %9486 }
0x1101   : > { %v9489_v3 = vpop.eup %9488  ;;  %v3634_v10 = vmul.f32 %v9487_v1, %v9483_v31 }
0x1102   : > { %v3633_v4 = vmul.f32 %v9489_v3, %v9485_v32 }
0x1104   : > { %8634 = vmatprep.mubr.msk.f32.mxu1 %vm1945_vm8, %v3633_v4 }
0x1105   : > { %8635 = vmatmul.mubr.msk.f32.vlgmr.msra.gmra.mrb[24].mxu1 %vm1945_vm8, %v3634_v10 }
0x11d8   : > { %v8636_v16 = vpop.f32.mrb[24].mxu1 }
0x11d9   : > { %v3707_v21 = vpop.f32.mrb[25].mxu1 }
0x11da   : > { %8641 = vmatprep.mubr.msk.f32.mxu0 %vm1855_vm6, %v3707_v21  ;;  %v3861_v21 = vld [vmem:[%s11168_s2] sm:$0xff] }
0x11db   : > { %8642 = vmatmul.mubr.msk.f32.vlgmr.msra.gmra.mrb[12].mxu0 %vm1855_vm6, %v8636_v16 }
0x11dc   : > { %9182 = vmatpush3.bf16.msra.mxu0 %v9885_v35 }
0x11dd   : > { %9184 = vmatprep.subr.bf16.mxu0 %v9892_v40 }
0x11e0   : > { %9186 = vmatpush3.bf16.msra.mxu0 %v9892_v40 }
0x11e1   : > { %8665 = vmatprep.subr.msk.mxu0 %vm1291_vm1, %v9907_v44 }
0x11e4   : > { %8666 = vmatpush3.msk.msra.mxu0 %vm1291_vm1, %v9907_v44 }
0x11e5   : > { %9196 = vmatprep.subr.bf16.mxu0 %v9922_v48 }
0x12ae   : > { %v8643_v31 = vpop.f32.mrb[12].mxu0 }
0x12af   : > { %v3813_v32 = vadd.f32 %v8643_v31, %v10323_v53  ;;  %v3794_v36 = vpop.f32.mrb[13].mxu0  ;;  %v3862_v31 = vld [vmem:[%s11168_s2 + $0x8] sm:$0xff] }
0x12b0   : > { %v3812_v35 = vadd.f32 %v10323_v53, %v3794_v36  ;;  %v3863_v36 = vld [vmem:[%s11168_s2 + $0x10] sm:$0xff] }
0x12b1   : > { %v3815_v38 = vadd.f32 %v3813_v32, %v9942_v60  ;;  %v10335_v32 = vpack.c.bf16 %v3862_v31, %v3861_v21  ;;  %v10357_v31 = vld [vmem:[%s11170_s7] ss:$0 sm:$0xff] }
0x12b2   : > { %v3814_v40 = vadd.f32 %v3812_v35, %v9930_v55  ;;  %v3864_v35 = vld [vmem:[%s11168_s2 + $0x18] sm:$0xff]  ;;  %11172 = vst [vmem:[#allocation24_spill] sm:$0xff] %v10357_v31 }
0x12b3   : > { %v3821_v37 = vsel %vm1590_vm5, %v3815_v38, 0.0  ;;  %9172 = vmatprep.subr.bf16.mxu1 %v10335_v32 }
0x12b4   : > { %3822 = vadd.xlane.f32.xlu0 %v3821_v37  ;;  %v3818_v44 = vsel %vm1590_vm5, %v3814_v40, 0.0  ;;  %9174 = vmatpush3.bf16.msra.mxu1 %v10335_v32 }
0x12b5   : > { %3819 = vadd.xlane.f32.xlu1 %v3818_v44 }
0x1341   : > { %v3823_v57 = vpop.xlane.xlu0 %3822 }
0x1342   : > { %v3826_v42 = vmul.f32 0.027777778, %v3823_v57  ;;  %v3820_v62 = vpop.xlane.xlu1 %3819 }
0x1343   : > { %v3825_v1 = vmul.f32 0.027777778, %v3820_v62 }
0x1344   : > { %v3828_v3 = vsub.f32 %v3815_v38, %v3826_v42  ;;  %v10341_v38 = vpack.c.bf16 %v3864_v35, %v3863_v36 }
0x1345   : > { %v3827_v4 = vsub.f32 %v3814_v40, %v3825_v1  ;;  %v10344_v40 = vld [vmem:[%s11168_s2 + $0x20] sm:$0xf]  ;;  %s11178_s2 = sld [smem:[#allocation5_spill]] }
0x1346   : > { %v3830_v60 = vmul.f32 %v3828_v3, %v3828_v3  ;;  %9176 = vmatprep.subr.bf16.mxu1 %v10341_v38 }
0x1347   : > { %v3829_v10 = vmul.f32 %v3827_v4, %v3827_v4  ;;  %9178 = vmatpush3.bf16.msra.mxu1 %v10341_v38 }
0x1348   : > { %v3834_v55 = vsel %vm1590_vm5, %v3830_v60, 0.0  ;;  %8652 = vmatprep.subr.msk.mxu1 %vm1291_vm1, %v10344_v40 }
0x1349   : > { %3835 = vadd.xlane.f32.xlu0 %v3834_v55  ;;  %v3831_v16 = vsel %vm1590_vm5, %v3829_v10, 0.0  ;;  %v10354_v10 = vld [vmem:[%s11169_s6] ss:$0 sm:$0xff]  ;;  %s11137_s6 = sshll.u32 %s11192_s15, 3 }
0x134a   : > { %3832 = vadd.xlane.f32.xlu1 %v3831_v16 }
0x134b   : > { %8653 = vmatpush3.msk.msra.mxu1 %vm1291_vm1, %v10344_v40 }
0x134c   : > { %9188 = vmatprep.subr.bf16.mxu1 %v9890_v39 }
0x13d6   : > { %v3836_v37 = vpop.xlane.xlu0 %3835 }
0x13d7   : > { %v3838_v44 = vmul.f32 0.027777778, %v3836_v37  ;;  %v3833_v57 = vpop.xlane.xlu1 %3832 }
0x13d8   : > { %v3837_v42 = vmul.f32 0.027777778, %v3833_v57 }
0x13d9   : > { %v3840_v62 = vadd.f32 1e-05, %v3838_v44 }
0x13da   : > { %v3839_v1 = vadd.f32 1e-05, %v3837_v42 }
0x13db   : > { %9490 = vrsqrt.f32 %v3840_v62 }
0x13dc   : > { %9492 = vrsqrt.f32 %v3839_v1 }
0x13e5   : > { %v9491_v60 = vpop.eup %9490 }
0x13e6   : > { %v9493_v55 = vpop.eup %9492  ;;  %v3844_v16 = vmul.f32 %v9491_v60, %v3828_v3  ;;  %v7935_v3 = vld [vmem:[%s11171_s11] ss:$0 sm:$0xff] }
0x13e7   : > { %v3843_v21 = vmul.f32 %v9493_v55, %v3827_v4 }
0x13e8   : > { %v3852_v36 = vmul.f32 %v10354_v10, %v3844_v16 }
0x13e9   : > { %v3851_v35 = vmul.f32 %v10354_v10, %v3843_v21 }
0x13ea   : > { %v3860_v44 = vadd.f32 %v10357_v31, %v3852_v36 }
0x13eb   : > { %v3859_v37 = vadd.f32 %v10357_v31, %v3851_v35 }
0x13ed   : > { %8654 = vmatprep.mubr.msk.f32.mxu1 %vm1590_vm5, %v3859_v37 }
0x13ee   : > { %8655 = vmatmul.mubr.msk.f32.vlgmr.msra.gmra.mrb[26].mxu1 %vm1590_vm5, %v3860_v44 }
0x13ef   : > { %9190 = vmatpush3.bf16.msra.mxu1 %v9890_v39 }
0x13f0   : > { %9192 = vmatprep.subr.bf16.mxu1 %v9897_v43 }
0x13f3   : > { %9194 = vmatpush3.bf16.msra.mxu1 %v9897_v43 }
0x13f4   : > { %8678 = vmatprep.subr.msk.mxu1 %vm1291_vm1, %v9910_v45 }
0x13f7   : > { %8679 = vmatpush3.msk.msra.mxu1 %vm1291_vm1, %v9910_v45 }
0x14c1   : > { %v8656_v4 = vpop.f32.mrb[26].mxu1 }
0x14c2   : > { %v3954_v57 = vadd.f32 %v8656_v4, %v7935_v3  ;;  %v3948_v42 = vpop.f32.mrb[27].mxu1 }
0x14c3   : > { %v3949_v62 = vadd.f32 %v7935_v3, %v3948_v42 }
0x14c4   : > { %v3962_v1 = vsel %vm1392_vm4, %v3954_v57, 0.0 }
0x14c5   : > { %3963 = vadd.xlane.f32.xlu0 %v3962_v1  ;;  %v3959_v39 = vsel %vm1392_vm4, %v3949_v62, 0.0 }
0x14c6   : > { %3960 = vadd.xlane.f32.xlu1 %v3959_v39 }
0x1552   : > { %v3964_v60 = vpop.xlane.xlu0 %3963 }
0x1553   : > { %v3967_v55 = vmul.f32 0.03125, %v3964_v60  ;;  %v3961_v43 = vpop.xlane.xlu1 %3960 }
0x1554   : > { %v3966_v16 = vmul.f32 0.03125, %v3961_v43 }
0x1555   : > { %v3969_v21 = vsub.f32 %v3954_v57, %v3967_v55 }
0x1556   : > { %v3968_v36 = vsub.f32 %v3949_v62, %v3966_v16  ;;  %v7939_v62 = vld [vmem:[%s11173_s0] ss:$0 sm:$0xff] }
0x1557   : > { %v3971_v35 = vmul.f32 %v3969_v21, %v3969_v21  ;;  %v7940_v16 = vld [vmem:[%s11174_s18] ss:$0 sm:$0xff] }
0x1558   : > { %v3970_v45 = vmul.f32 %v3968_v36, %v3968_v36 }
0x1559   : > { %v3975_v37 = vsel %vm1392_vm4, %v3971_v35, 0.0 }
0x155a   : > { %3976 = vadd.xlane.f32.xlu0 %v3975_v37  ;;  %v3972_v44 = vsel %vm1392_vm4, %v3970_v45, 0.0 }
0x155b   : > { %3973 = vadd.xlane.f32.xlu1 %v3972_v44 }
0x15e7   : > { %v3977_v3 = vpop.xlane.xlu0 %3976 }
0x15e8   : > { %v3979_v4 = vmul.f32 0.03125, %v3977_v3  ;;  %v3974_v42 = vpop.xlane.xlu1 %3973 }
0x15e9   : > { %v3978_v1 = vmul.f32 0.03125, %v3974_v42  ;;  %v10382_v42 = vld [vmem:[%s9856_s5] sm:$0xff] }
0x15ea   : > { %v3981_v39 = vadd.f32 1e-05, %v3979_v4 }
0x15eb   : > { %v3980_v60 = vadd.f32 1e-05, %v3978_v1 }
0x15ec   : > { %9494 = vrsqrt.f32 %v3981_v39 }
0x15ed   : > { %9496 = vrsqrt.f32 %v3980_v60 }
0x15f6   : > { %v9495_v57 = vpop.eup %9494 }
0x15f7   : > { %v9497_v55 = vpop.eup %9496  ;;  %v3985_v43 = vmul.f32 %v9495_v57, %v3969_v21  ;;  %v10389_v21 = vld [vmem:[%s9856_s5 + $0x8] sm:$0xff]  ;;  %v9577_v57 = vld [vmem:[%s9746_s27] ss:$0 sm:$0xff]  ;;  %s11175_s5 = sld [smem:[#allocation4_spill]] }
0x15f8   : > { %v3984_v35 = vmul.f32 %v9497_v55, %v3968_v36 }
0x15f9   : > { %v3993_v37 = vmul.f32 %v7939_v62, %v3985_v43  ;;  %v9578_v43 = vld [vmem:[%s11160_s22] ss:$0 sm:$0xff] }
0x15fa   : > { %v3992_v31 = vmul.f32 %v7939_v62, %v3984_v35 }
0x15fb   : > { %v4001_v45 = vadd.f32 %v7940_v16, %v3993_v37 }
0x15fc   : > { %v4000_v44 = vadd.f32 %v7940_v16, %v3992_v31  ;;  %v9576_v31 = vld [vmem:[%s9751_s30 + $0x20] sm:$0xf] }
0x15fd   : > { %4006 = vrot.lane.b32.xlu0 %v4001_v45, %s9632_s24  ;;  %v9579_v45 = vld [vmem:[%s11161_s26] ss:$0 sm:$0xff] }
0x15fe   : > { %4004 = vrot.lane.b32.xlu1 %v4000_v44, %s9632_s24  ;;  %s11176_s24 = sld [smem:[#allocation3_spill]] }
0x1604   : > { %s1186_s7 = scalar_lea.vmem %s11176_s24, %s11137_s6  ;;  %s6413_s24 = sld [smem:[#allocation2]] }
0x1605   : > { %s11189_s6 = sld [smem:[#allocation22_spill]] }
0x166f   : > { %v4007_v3 = vpop.permute.xlu0 %4006 }
0x1670   : > { %v4005_v4 = vpop.permute.xlu1 %4004  ;;  %v10393_v36 = vsel %vm1284_vm3, %v10389_v21, %v4007_v3 }
0x1671   : > { %v10386_v1 = vsel %vm1284_vm3, %v10382_v42, %v4005_v4 }
0x1672   : > { %8667 = vmatprep.mubr.msk.f32.mxu0 %vm1590_vm5, %v10386_v1  ;;  %8680 = vmatprep.mubr.msk.f32.mxu1 %vm1590_vm5, %v10386_v1 }
0x1673   : > { %8668 = vmatmul.mubr.msk.f32.vlgmr.msra.gmra.mrb[22].mxu0 %vm1590_vm5, %v10393_v36  ;;  %8681 = vmatmul.mubr.msk.f32.vlgmr.msra.gmra.mrb[28].mxu1 %vm1590_vm5, %v10393_v36 }
0x1674   : > { %9198 = vmatpush3.bf16.msra.mxu0 %v9922_v48  ;;  %8693 = vmatprep.mubr.msk.f32.mxu0 %vm1590_vm5, %v10386_v1 }
0x1675   : > { %9200 = vmatprep.subr.bf16.mxu0 %v9938_v59 }
0x1678   : > { %9202 = vmatpush3.bf16.msra.mxu0 %v9938_v59 }
0x1679   : > { %8691 = vmatprep.subr.msk.mxu0 %vm1291_vm1, %v9576_v31 }
0x167c   : > { %8692 = vmatpush3.msk.msra.mxu0 %vm1291_vm1, %v9576_v31 }
0x167d   : > { %8694 = vmatmul.mubr.msk.f32.vlgmr.msra.gmra.mrb[24].mxu0 %vm1590_vm5, %v10393_v36 }
0x1746   : > { %v8669_v39 = vpop.f32.mrb[22].mxu0  ;;  %v8682_v60 = vpop.f32.mrb[28].mxu1 }
0x1747   : > { %v4165_v48 = vadd.f32 %v9577_v57, %v8682_v60  ;;  %v4084_v62 = vpop.f32.mrb[23].mxu0  ;;  %v4159_v55 = vpop.f32.mrb[29].mxu1  ;;  %v4090_v4 = vadd.f32 %v9578_v43, %v8669_v39 }
0x1748   : > { %v4085_v16 = vadd.f32 %v9578_v43, %v4084_v62  ;;  %v4160_v35 = vadd.f32 %v9577_v57, %v4159_v55 }
0x174a   : > { %v9203_v37 = vpack.c.bf16 %v4165_v48, %v4160_v35  ;;  %8700 = vmatprep.mubr.msk.f32.mxu1 %vm1855_vm6, %v4085_v16 }
0x174c   : > { %9205 = vmatprep.subr.msk.bf16.mxu1 %vm9964_vm7, %v9203_v37 }
0x174d   : > { %9208 = vmatpush3.bf16.xpose.msk.msra.mxu1 %vm9964_vm7, %v9203_v37 }
0x174e   : > { %9222 = vmatprep.subr.bf16.mxu1 %v10018_v2 }
0x1750   : > { %v8695_v59 = vpop.f32.mrb[24].mxu0 }
0x1751   : > { %v4240_v44 = vadd.f32 %v9579_v45, %v8695_v59  ;;  %v4234_v3 = vpop.f32.mrb[25].mxu0 }
0x1752   : > { %v4235_v31 = vadd.f32 %v9579_v45, %v4234_v3 }
0x1754   : > { %v9209_v60 = vpack.c.bf16 %v4240_v44, %v4235_v31  ;;  %8701 = vmatmul.mubr.msk.f32.vlgmr.msra.gmra.mrb[30].mxu1 %vm1855_vm6, %v4090_v4 }
0x1755   : > { %9224 = vmatpush3.bf16.msra.mxu1 %v10018_v2  ;;  %8733 = vmatprep.mubr.msk.f32.mxu1 %vm1590_vm5, %v10386_v1 }
0x1756   : > { %9210 = vmatprep.subr.bf16.mxu0 %v9209_v60  ;;  %9226 = vmatprep.subr.bf16.mxu1 %v10024_v13 }
0x1757   : > { %9212 = vmatpush3.bf16.msra.mxu0 %v9209_v60 }
0x1758   : > { %9214 = vmatprep.subr.bf16.mxu0 %v9969_v11 }
0x1759   : > { %9228 = vmatpush3.bf16.msra.mxu1 %v10024_v13 }
0x175a   : > { %8731 = vmatprep.subr.msk.mxu1 %vm1291_vm1, %v10032_v14 }
0x175d   : > { %8732 = vmatpush3.msk.msra.mxu1 %vm1291_vm1, %v10032_v14 }
0x175e   : > { %8734 = vmatmul.mubr.msk.f32.vlgmr.msra.gmra.mrb[32].mxu1 %vm1590_vm5, %v10393_v36 }
0x1827   : > { %v8702_v2 = vpop.f32.mrb[30].mxu1 }
0x1828   : > { %v4331_v39 = vmul.f32 0.33333334, %v8702_v2  ;;  %v4321_v57 = vpop.f32.mrb[31].mxu1 }
0x1829   : > { %v4330_v48 = vmul.f32 0.33333334, %v4321_v57 }
0x182a   : > { %v4335_v62 = vsel %vm1945_vm8, %v4331_v39, -inf }
0x182b   : > { %4336 = vmax.xlane.f32.xlu0 %v4335_v62  ;;  %v4332_v55 = vsel %vm1945_vm8, %v4330_v48, -inf }
0x182c   : > { %4333 = vmax.xlane.f32.xlu1 %v4332_v55 }
0x1831   : > { %v8735_v13 = vpop.f32.mrb[32].mxu1 }
0x1832   : > { %v4582_v43 = vadd.f32 %v8735_v13, %v10051_v19  ;;  %v4576_v16 = vpop.f32.mrb[33].mxu1 }
0x1833   : > { %v4577_v35 = vadd.f32 %v10051_v19, %v4576_v16 }
0x1835   : > { %v9237_v14 = vpack.c.bf16 %v4582_v43, %v4577_v35  ;;  %v9580_v43 = vld [vmem:[%s9731_s4 + $0x48] sm:$0xf] }
0x1837   : > { %9239 = vmatprep.subr.msk.bf16.mxu1 %vm9964_vm7, %v9237_v14 }
0x1838   : > { %9242 = vmatpush3.bf16.xpose.msk.msra.mxu1 %vm9964_vm7, %v9237_v14 }
0x1839   : > { %9249 = vmatprep.subr.msk.bf16.mxu1 %vm10074_vm11, %v10072_v58 }
0x18b8   : > { %v4337_v37 = vpop.xlane.xlu0 %4336 }
0x18b9   : > { %v4339_v59 = vsub.f32 %v4331_v39, %v4337_v37  ;;  %v4334_v45 = vpop.xlane.xlu1 %4333 }
0x18ba   : > { %v4338_v44 = vsub.f32 %v4330_v48, %v4334_v45 }
0x18bb   : > { %v4342_v3 = vmul.f32 1.442695, %v4339_v59  ;;  %v9582_v59 = vld [vmem:[%s11161_s26 + $0x1] ss:$0 sm:$0xff] }
0x18bc   : > { %v4340_v4 = vmul.f32 1.442695, %v4338_v44 }
0x18bd   : > { %9498 = vpow2.f32 %v4342_v3 }
0x18be   : > { %9500 = vpow2.f32 %v4340_v4 }
0x18c7   : > { %v9499_v19 = vpop.eup %9498 }
0x18c8   : > { %v9501_v31 = vpop.eup %9500  ;;  %v4347_v60 = vsel %vm1945_vm8, %v9499_v19, 0.0 }
0x18c9   : > { %4348 = vadd.xlane.f32.xlu0 %v4347_v60  ;;  %v4344_v2 = vsel %vm1945_vm8, %v9501_v31, 0.0 }
0x18ca   : > { %4345 = vadd.xlane.f32.xlu1 %v4344_v2 }
0x1956   : > { %v4349_v57 = vpop.xlane.xlu0 %4348 }
0x1957   : > { %9502 = vrcp.f32 %v4349_v57  ;;  %v4346_v62 = vpop.xlane.xlu1 %4345 }
0x1958   : > { %9504 = vrcp.f32 %v4346_v62 }
0x1961   : > { %v9503_v39 = vpop.eup %9502 }
0x1962   : > { %v9505_v55 = vpop.eup %9504  ;;  %v4353_v13 = vmul.f32 %v9503_v39, %v9499_v19 }
0x1963   : > { %v4352_v48 = vmul.f32 %v9505_v55, %v9501_v31 }
0x1965   : > { %8707 = vmatprep.mubr.msk.f32.mxu0 %vm1945_vm8, %v4352_v48 }
0x1966   : > { %8708 = vmatmul.mubr.msk.f32.vlgmr.msra.gmra.mrb[26].mxu0 %vm1945_vm8, %v4353_v13 }
0x1967   : > { %9216 = vmatpush3.bf16.msra.mxu0 %v9969_v11  ;;  %8720 = vmatprep.mubr.msk.f32.mxu0 %vm1590_vm5, %v10386_v1  ;;  %v9581_v11 = vld [vmem:[%s9751_s30 + $0x48] sm:$0xf] }
0x1968   : > { %9218 = vmatprep.subr.bf16.mxu0 %v9979_v20 }
0x196b   : > { %9220 = vmatpush3.bf16.msra.mxu0 %v9979_v20 }
0x196c   : > { %8718 = vmatprep.subr.msk.mxu0 %vm1291_vm1, %v9580_v43 }
0x196f   : > { %8719 = vmatpush3.msk.msra.mxu0 %vm1291_vm1, %v9580_v43 }
0x1970   : > { %8721 = vmatmul.mubr.msk.f32.vlgmr.msra.gmra.mrb[28].mxu0 %vm1590_vm5, %v10393_v36  ;;  %9230 = vmatprep.subr.bf16.mxu0 %v9993_v27 }
0x1971   : > { %9232 = vmatpush3.bf16.msra.mxu0 %v9993_v27  ;;  %8746 = vmatprep.mubr.msk.f32.mxu0 %vm1590_vm5, %v10386_v1 }
0x1972   : > { %9234 = vmatprep.subr.bf16.mxu0 %v9995_v28 }
0x1975   : > { %9236 = vmatpush3.bf16.msra.mxu0 %v9995_v28 }
0x1976   : > { %8744 = vmatprep.subr.msk.mxu0 %vm1291_vm1, %v9581_v11 }
0x1979   : > { %8745 = vmatpush3.msk.msra.mxu0 %vm1291_vm1, %v9581_v11 }
0x197a   : > { %8747 = vmatmul.mubr.msk.f32.vlgmr.msra.gmra.mrb[30].mxu0 %vm1590_vm5, %v10393_v36 }
0x1a39   : > { %v10471_v20 = vpop.f32.mrb[26].mxu0 }
0x1a3a   : > { %v10473_v16 = vpop.f32.mrb[27].mxu0 }
0x1a43   : > { %v8722_v27 = vpop.f32.mrb[28].mxu0 }
0x1a44   : > { %v4501_v35 = vpop.f32.mrb[29].mxu0  ;;  %v4507_v37 = vadd.f32 %v8722_v27, %v10036_v15 }
0x1a45   : > { %v4502_v14 = vadd.f32 %v10036_v15, %v4501_v35 }
0x1a47   : > { %8753 = vmatprep.mubr.msk.f32.mxu1 %vm1855_vm6, %v4502_v14 }
0x1a48   : > { %8754 = vmatmul.mubr.msk.f32.vlgmr.msra.gmra.mrb[34].mxu1 %vm1855_vm6, %v4507_v37 }
0x1a49   : > { %9252 = vmatpush3.bf16.msk.msra.mxu1 %vm10074_vm11, %v10072_v58 }
0x1a4a   : > { %9255 = vmatprep.subr.msk.bf16.mxu1 %vm10074_vm11, %v10129_v29 }
0x1a4d   : > { %v8748_v28 = vpop.f32.mrb[30].mxu0 }
0x1a4e   : > { %v4657_v45 = vadd.f32 %v9582_v59, %v8748_v28  ;;  %v4651_v44 = vpop.f32.mrb[31].mxu0 }
0x1a4f   : > { %v4652_v3 = vadd.f32 %v9582_v59, %v4651_v44 }
0x1a51   : > { %v9243_v4 = vpack.c.bf16 %v4657_v45, %v4652_v3 }
0x1a53   : > { %9244 = vmatprep.subr.bf16.mxu0 %v9243_v4 }
0x1a54   : > { %9246 = vmatpush3.bf16.msra.mxu0 %v9243_v4 }
0x1a55   : > { %9260 = vmatprep.subr.bf16.mxu0 %v10067_v54 }
0x1b1b   : > { %v8755_v15 = vpop.f32.mrb[34].mxu1 }
0x1b1c   : > { %v4748_v19 = vmul.f32 0.33333334, %v8755_v15  ;;  %v4738_v31 = vpop.f32.mrb[35].mxu1 }
0x1b1d   : > { %v4747_v60 = vmul.f32 0.33333334, %v4738_v31 }
0x1b1e   : > { %v4752_v58 = vsel %vm1945_vm8, %v4748_v19, -inf }
0x1b1f   : > { %4753 = vmax.xlane.f32.xlu0 %v4752_v58  ;;  %v4749_v2 = vsel %vm1945_vm8, %v4747_v60, -inf }
0x1b20   : > { %4750 = vmax.xlane.f32.xlu1 %v4749_v2 }
0x1bac   : > { %v4754_v57 = vpop.xlane.xlu0 %4753 }
0x1bad   : > { %v4756_v62 = vsub.f32 %v4748_v19, %v4754_v57  ;;  %v4751_v39 = vpop.xlane.xlu1 %4750 }
0x1bae   : > { %v4755_v55 = vsub.f32 %v4747_v60, %v4751_v39 }
0x1baf   : > { %v4759_v48 = vmul.f32 1.442695, %v4756_v62 }
0x1bb0   : > { %v4757_v13 = vmul.f32 1.442695, %v4755_v55 }
0x1bb1   : > { %9506 = vpow2.f32 %v4759_v48 }
0x1bb2   : > { %9508 = vpow2.f32 %v4757_v13 }
0x1bbb   : > { %v9507_v43 = vpop.eup %9506 }
0x1bbc   : > { %v9509_v11 = vpop.eup %9508  ;;  %v4764_v27 = vsel %vm1945_vm8, %v9507_v43, 0.0 }
0x1bbd   : > { %4765 = vadd.xlane.f32.xlu0 %v4764_v27  ;;  %v4761_v35 = vsel %vm1945_vm8, %v9509_v11, 0.0 }
0x1bbe   : > { %4762 = vadd.xlane.f32.xlu1 %v4761_v35 }
0x1c4a   : > { %v4766_v14 = vpop.xlane.xlu0 %4765 }
0x1c4b   : > { %9510 = vrcp.f32 %v4766_v14  ;;  %v4763_v37 = vpop.xlane.xlu1 %4762 }
0x1c4c   : > { %9512 = vrcp.f32 %v4763_v37 }
0x1c55   : > { %v9511_v28 = vpop.eup %9510 }
0x1c56   : > { %v9513_v59 = vpop.eup %9512  ;;  %v4770_v44 = vmul.f32 %v9511_v28, %v9507_v43 }
0x1c57   : > { %v4769_v45 = vmul.f32 %v9513_v59, %v9509_v11 }
0x1c59   : > { %8760 = vmatprep.mubr.msk.f32.mxu0 %vm1945_vm8, %v4769_v45 }
0x1c5a   : > { %8761 = vmatmul.mubr.msk.f32.vlgmr.msra.gmra.mrb[32].mxu0 %vm1945_vm8, %v4770_v44 }
0x1c5b   : > { %9262 = vmatpush3.bf16.msra.mxu0 %v10067_v54  ;;  %8787 = vmatprep.mubr.msk.f32.mxu0 %vm1590_vm5, %v10386_v1 }
0x1c5c   : > { %9264 = vmatprep.subr.bf16.mxu0 %v10087_v7 }
0x1c5f   : > { %9266 = vmatpush3.bf16.msra.mxu0 %v10087_v7 }
0x1c60   : > { %8785 = vmatprep.subr.msk.mxu0 %vm1291_vm1, %v10095_v8 }
0x1c63   : > { %8786 = vmatpush3.msk.msra.mxu0 %vm1291_vm1, %v10095_v8 }
0x1c64   : > { %8788 = vmatmul.mubr.msk.f32.vlgmr.msra.gmra.mrb[34].mxu0 %vm1590_vm5, %v10393_v36  ;;  %9276 = vmatprep.subr.bf16.mxu0 %v10104_v22 }
0x1c65   : > { %9278 = vmatpush3.bf16.msra.mxu0 %v10104_v22  ;;  %8813 = vmatprep.mubr.msk.f32.mxu0 %vm1590_vm5, %v10386_v1 }
0x1c66   : > { %9280 = vmatprep.subr.bf16.mxu0 %v10106_v23 }
0x1c69   : > { %9282 = vmatpush3.bf16.msra.mxu0 %v10106_v23 }
0x1c6a   : > { %8811 = vmatprep.subr.msk.mxu0 %vm1291_vm1, %v10118_v24 }
0x1c6d   : > { %8812 = vmatpush3.msk.msra.mxu0 %vm1291_vm1, %v10118_v24 }
0x1c6e   : > { %8814 = vmatmul.mubr.msk.f32.vlgmr.msra.gmra.mrb[36].mxu0 %vm1590_vm5, %v10393_v36 }
0x1d2d   : > { %v8762_v54 = vpop.f32.mrb[32].mxu0 }
0x1d2e   : > { %v4843_v7 = vpop.f32.mrb[33].mxu0 }
0x1d2f   : > { %8767 = vmatprep.mubr.msk.f32.mxu1 %vm1855_vm6, %v4843_v7 }
0x1d30   : > { %8768 = vmatmul.mubr.msk.f32.vlgmr.msra.gmra.mrb[36].mxu1 %vm1855_vm6, %v8762_v54 }
0x1d31   : > { %9258 = vmatpush3.bf16.msk.msra.mxu1 %vm10074_vm11, %v10129_v29  ;;  %8774 = vmatprep.mubr.msk.f32.mxu1 %vm1855_vm6, %v10473_v16 }
0x1d32   : > { %9268 = vmatprep.subr.bf16.mxu1 %v10136_v34 }
0x1d37   : > { %v8789_v8 = vpop.f32.mrb[34].mxu0 }
0x1d38   : > { %v5080_v22 = vpop.f32.mrb[35].mxu0  ;;  %8775 = vmatmul.mubr.msk.f32.vlgmr.msra.gmra.mrb[36].mxu1 %vm1855_vm6, %v10471_v20 }
0x1d39   : > { %9270 = vmatpush3.bf16.msra.mxu1 %v10136_v34  ;;  %8800 = vmatprep.mubr.msk.f32.mxu1 %vm1590_vm5, %v10386_v1  ;;  %v5081_v23 = vadd.f32 %v10161_v18, %v5080_v22 }
0x1d3a   : > { %9272 = vmatprep.subr.bf16.mxu1 %v10148_v41 }
0x1d3d   : > { %9274 = vmatpush3.bf16.msra.mxu1 %v10148_v41 }
0x1d3e   : > { %8798 = vmatprep.subr.msk.mxu1 %vm1291_vm1, %v10157_v46 }
0x1d41   : > { %8799 = vmatpush3.msk.msra.mxu1 %vm1291_vm1, %v10157_v46  ;;  %v8815_v24 = vpop.f32.mrb[36].mxu0 }
0x1d42   : > { %v5236_v29 = vadd.f32 %v8815_v24, %v10166_v47  ;;  %8801 = vmatmul.mubr.msk.f32.vlgmr.msra.gmra.mrb[38].mxu1 %vm1590_vm5, %v10393_v36  ;;  %v5230_v34 = vpop.f32.mrb[37].mxu0 }
0x1d43   : > { %v5231_v20 = vadd.f32 %v10166_v47, %v5230_v34  ;;  %8820 = vmatprep.mubr.msk.f32.mxu1 %vm1855_vm6, %v5081_v23  ;;  %v5086_v47 = vadd.f32 %v8789_v8, %v10161_v18 }
0x1d45   : > { %v9289_v41 = vpack.c.bf16 %v5236_v29, %v5231_v20 }
0x1d47   : > { %9290 = vmatprep.subr.bf16.mxu0 %v9289_v41 }
0x1d48   : > { %9292 = vmatpush3.bf16.msra.mxu0 %v9289_v41 }
0x1d49   : > { %9300 = vmatprep.subr.bf16.mxu0 %v10193_v49 }
0x1e15   : > { %v8802_v16 = vpop.f32.mrb[38].mxu1 }
0x1e16   : > { %v5161_v3 = vadd.f32 %v8802_v16, %v10177_v56  ;;  %v5155_v46 = vpop.f32.mrb[39].mxu1 }
0x1e17   : > { %v5156_v4 = vadd.f32 %v10177_v56, %v5155_v46 }
0x1e19   : > { %v9283_v15 = vpack.c.bf16 %v5161_v3, %v5156_v4 }
0x1e1b   : > { %9285 = vmatprep.subr.msk.bf16.mxu1 %vm9964_vm7, %v9283_v15 }
0x1e1c   : > { %9288 = vmatpush3.bf16.xpose.msk.msra.mxu1 %vm9964_vm7, %v9283_v15 }
0x1e1d   : > { %9295 = vmatprep.subr.msk.bf16.mxu1 %vm10074_vm11, %v10198_v52 }
0x1e23   : > { %8821 = vmatmul.mubr.msk.f32.vlgmr.msra.gmra.mrb[40].mxu1 %vm1855_vm6, %v5086_v47 }
0x1e24   : > { %9298 = vmatpush3.bf16.msk.msra.mxu1 %vm10074_vm11, %v10198_v52 }
0x1e25   : > { %9308 = vmatprep.subr.bf16.mxu1 %v10251_v33 }
0x1ef6   : > { %v8822_v56 = vpop.f32.mrb[40].mxu1 }
0x1ef7   : > { %v5327_v19 = vmul.f32 0.33333334, %v8822_v56  ;;  %v5317_v31 = vpop.f32.mrb[41].mxu1 }
0x1ef8   : > { %v5326_v60 = vmul.f32 0.33333334, %v5317_v31 }
0x1ef9   : > { %v5331_v58 = vsel %vm1945_vm8, %v5327_v19, -inf }
0x1efa   : > { %5332 = vmax.xlane.f32.xlu0 %v5331_v58  ;;  %v5328_v2 = vsel %vm1945_vm8, %v5326_v60, -inf }
0x1efb   : > { %5329 = vmax.xlane.f32.xlu1 %v5328_v2  ;;  %v9634_v2 = vmov 0.0  }
0x1f87   : > { %v5333_v57 = vpop.xlane.xlu0 %5332 }
0x1f88   : > { %v5335_v18 = vsub.f32 %v5327_v19, %v5333_v57  ;;  %v5330_v62 = vpop.xlane.xlu1 %5329  ;;  %v11133_v57 = vmov 0.0|0.0  }
0x1f89   : > { %v5334_v39 = vsub.f32 %v5326_v60, %v5330_v62 }
0x1f8a   : > { %v5338_v55 = vmul.f32 1.442695, %v5335_v18 }
0x1f8b   : > { %v5336_v48 = vmul.f32 1.442695, %v5334_v39  ;;  %v6245_v39 = vld [vmem:[%s11177_s28 + $0x8] sm:$0xff] }
0x1f8c   : > { %9514 = vpow2.f32 %v5338_v55 }
0x1f8d   : > { %9516 = vpow2.f32 %v5336_v48  ;;  %v6246_v48 = vld [vmem:[%s11177_s28 + $0x10] sm:$0xff] }
0x1f96   : > { %v9515_v52 = vpop.eup %9514 }
0x1f97   : > { %v9517_v13 = vpop.eup %9516  ;;  %v5343_v43 = vsel %vm1945_vm8, %v9515_v52, 0.0 }
0x1f98   : > { %5344 = vadd.xlane.f32.xlu0 %v5343_v43  ;;  %v5340_v11 = vsel %vm1945_vm8, %v9517_v13, 0.0 }
0x1f99   : > { %5341 = vadd.xlane.f32.xlu1 %v5340_v11 }
0x2025   : > { %v5345_v27 = vpop.xlane.xlu0 %5344 }
0x2026   : > { %9518 = vrcp.f32 %v5345_v27  ;;  %v5342_v35 = vpop.xlane.xlu1 %5341 }
0x2027   : > { %9520 = vrcp.f32 %v5342_v35 }
0x2030   : > { %v9519_v14 = vpop.eup %9518 }
0x2031   : > { %v9521_v37 = vpop.eup %9520  ;;  %v5349_v59 = vmul.f32 %v9519_v14, %v9515_v52  ;;  %v6247_v52 = vld [vmem:[%s11177_s28 + $0x18] sm:$0xff]  ;;  %v8016_v14 = vld [vmem:[%s11178_s2] ss:$0 sm:$0xff]  ;;  %s11179_s2 = sld [smem:[#allocation8_spill]] }
0x2032   : > { %v5348_v28 = vmul.f32 %v9521_v37, %v9517_v13  ;;  %v9351_v13 = vpack.c.bf16 %v6247_v52, %v6246_v48 }
0x2034   : > { %8827 = vmatprep.mubr.msk.f32.mxu0 %vm1945_vm8, %v5348_v28 }
0x2035   : > { %8828 = vmatmul.mubr.msk.f32.vlgmr.msra.gmra.mrb[38].mxu0 %vm1945_vm8, %v5349_v59 }
0x2036   : > { %9302 = vmatpush3.bf16.msra.mxu0 %v10193_v49  ;;  %8847 = vmatprep.mubr.msk.f32.mxu0 %vm1590_vm5, %v10386_v1 }
0x2037   : > { %9304 = vmatprep.subr.bf16.mxu0 %v10209_v5 }
0x203a   : > { %9306 = vmatpush3.bf16.msra.mxu0 %v10209_v5 }
0x203b   : > { %8845 = vmatprep.subr.msk.mxu0 %vm1291_vm1, %v10217_v6 }
0x203e   : > { %8846 = vmatpush3.msk.msra.mxu0 %vm1291_vm1, %v10217_v6 }
0x203f   : > { %8848 = vmatmul.mubr.msk.f32.vlgmr.msra.gmra.mrb[40].mxu0 %vm1590_vm5, %v10393_v36  ;;  %9316 = vmatprep.subr.bf16.mxu0 %v10226_v25 }
0x2040   : > { %9318 = vmatpush3.bf16.msra.mxu0 %v10226_v25  ;;  %8873 = vmatprep.mubr.msk.f32.mxu0 %vm1590_vm5, %v10386_v1 }
0x2041   : > { %9320 = vmatprep.subr.bf16.mxu0 %v10228_v26 }
0x2044   : > { %9322 = vmatpush3.bf16.msra.mxu0 %v10228_v26 }
0x2045   : > { %8871 = vmatprep.subr.msk.mxu0 %vm1291_vm1, %v10240_v30 }
0x2048   : > { %8872 = vmatpush3.msk.msra.mxu0 %vm1291_vm1, %v10240_v30 }
0x2049   : > { %8874 = vmatmul.mubr.msk.f32.vlgmr.msra.gmra.mrb[42].mxu0 %vm1590_vm5, %v10393_v36 }
0x2108   : > { %v8829_v49 = vpop.f32.mrb[38].mxu0 }
0x2109   : > { %v5422_v5 = vpop.f32.mrb[39].mxu0 }
0x210a   : > { %8834 = vmatprep.mubr.msk.f32.mxu1 %vm1855_vm6, %v5422_v5 }
0x210b   : > { %8835 = vmatmul.mubr.msk.f32.vlgmr.msra.gmra.mrb[36].mxu1 %vm1855_vm6, %v8829_v49 }
0x210c   : > { %9310 = vmatpush3.bf16.msra.mxu1 %v10251_v33  ;;  %8860 = vmatprep.mubr.msk.f32.mxu1 %vm1590_vm5, %v10386_v1 }
0x210d   : > { %9312 = vmatprep.subr.bf16.mxu1 %v10256_v17 }
0x2110   : > { %9314 = vmatpush3.bf16.msra.mxu1 %v10256_v17 }
0x2111   : > { %8858 = vmatprep.subr.msk.mxu1 %vm1291_vm1, %v10265_v50 }
0x2112   : > { %v8849_v6 = vpop.f32.mrb[40].mxu0 }
0x2113   : > { %v5580_v25 = vpop.f32.mrb[41].mxu0 }
0x2114   : > { %v5581_v26 = vadd.f32 %v10269_v51, %v5580_v25  ;;  %8859 = vmatpush3.msk.msra.mxu1 %vm1291_vm1, %v10265_v50  ;;  %v9360_v25 = vpack.c.bf16 %v10389_v21, %v10382_v42 }
0x2115   : > { %8861 = vmatmul.mubr.msk.f32.vlgmr.msra.gmra.mrb[42].mxu1 %vm1590_vm5, %v10393_v36 }
0x2116   : > { %8880 = vmatprep.mubr.msk.f32.mxu1 %vm1855_vm6, %v5581_v26 }
0x211c   : > { %v8875_v30 = vpop.f32.mrb[42].mxu0 }
0x211d   : > { %v5736_v33 = vadd.f32 %v8875_v30, %v10280_v63  ;;  %v5730_v45 = vpop.f32.mrb[43].mxu0 }
0x211e   : > { %v5731_v17 = vadd.f32 %v10280_v63, %v5730_v45  ;;  %v5586_v63 = vadd.f32 %v8849_v6, %v10269_v51  ;;  %v6497_v45 = vlaneseq }
0x2120   : > { %v9329_v44 = vpack.c.bf16 %v5736_v33, %v5731_v17  ;;  %v6498_v17 = vshrl.u32 %v6497_v45, 7 }
0x2122   : > { %9330 = vmatprep.subr.bf16.mxu0 %v9329_v44 }
0x2123   : > { %9332 = vmatpush3.bf16.msra.mxu0 %v9329_v44  ;;  %v6714_v44 = vand.u32 127, %v6497_v45 }
0x2124   : > { %9340 = vmatprep.subr.bf16.mxu0 %v10335_v32 }
0x21e8   : > { %v8862_v54 = vpop.f32.mrb[42].mxu1 }
0x21e9   : > { %v5661_v7 = vadd.f32 %v8862_v54, %v10285_v12  ;;  %v5655_v50 = vpop.f32.mrb[43].mxu1  ;;  %v10677_v54 = vsub.s32 %v6714_v44, %v6498_v17 }
0x21ea   : > { %v5656_v8 = vadd.f32 %v10285_v12, %v5655_v50 }
0x21ec   : > { %v9323_v22 = vpack.c.bf16 %v5661_v7, %v5656_v8  ;;  %v6719_v7 = vadd.s32 4294967288, %v6714_v44  ;;  %v6414_v44 = vstv %s6413_s24  ;;  %s11187_s24 = sld [smem:[#allocation20_spill]] }
0x21ee   : > { %9325 = vmatprep.subr.msk.bf16.mxu1 %vm9964_vm7, %v9323_v22  ;;  %v10679_v50 = vsub.s32 %v6719_v7, %v6498_v17  ;;  %v6415_v7 = vmul.f32 1.442695, %v6414_v44 }
0x21ef   : > { %9328 = vmatpush3.bf16.xpose.msk.msra.mxu1 %vm9964_vm7, %v9323_v22 }
0x21f0   : > { %9335 = vmatprep.subr.msk.bf16.mxu1 %vm10074_vm11, %v10301_v0 }
0x21f6   : > { %8881 = vmatmul.mubr.msk.f32.vlgmr.msra.gmra.mrb[44].mxu1 %vm1855_vm6, %v5586_v63 }
0x21f7   : > { %9338 = vmatpush3.bf16.msk.msra.mxu1 %vm10074_vm11, %v10301_v0 }
0x21f8   : > { %8910 = vmatprep.subr.mxu1 %v9634_v2 }
0x22c9   : > { %v8882_v12 = vpop.f32.mrb[44].mxu1 }
0x22ca   : > { %v5827_v23 = vmul.f32 0.33333334, %v8882_v12  ;;  %v5817_v24 = vpop.f32.mrb[45].mxu1 }
0x22cb   : > { %v5826_v29 = vmul.f32 0.33333334, %v5817_v24 }
0x22cc   : > { %v5831_v34 = vsel %vm1945_vm8, %v5827_v23, -inf }
0x22cd   : > { %5832 = vmax.xlane.f32.xlu0 %v5831_v34  ;;  %v5828_v9 = vsel %vm1945_vm8, %v5826_v29, -inf }
0x22ce   : > { %5829 = vmax.xlane.f32.xlu1 %v5828_v9 }
0x235a   : > { %v5833_v20 = vpop.xlane.xlu0 %5832 }
0x235b   : > { %v5835_v41 = vsub.f32 %v5827_v23, %v5833_v20  ;;  %v5830_v16 = vpop.xlane.xlu1 %5829 }
0x235c   : > { %v5834_v51 = vsub.f32 %v5826_v29, %v5830_v16  ;;  %v10685_v16 = vsub.s32 0, %v6498_v17 }
0x235d   : > { %v5838_v3 = vmul.f32 1.442695, %v5835_v41  ;;  %v9637_v41 = vmov 0  }
0x235e   : > { %v5836_v46 = vmul.f32 1.442695, %v5834_v51  ;;  %9457 = vset.pattern.permute.xlu1 %v9637_v41  ;;  %9456 = vset.pattern.permute.xlu0 %v9637_v41 }
0x235f   : > { %9522 = vpow2.f32 %v5838_v3 }
0x2360   : > { %9524 = vpow2.f32 %v5836_v46 }
0x2369   : > { %v9523_v61 = vpop.eup %9522 }
0x236a   : > { %v9525_v0 = vpop.eup %9524  ;;  %v5843_v4 = vsel %vm1945_vm8, %v9523_v61, 0.0 }
0x236b   : > { %5844 = vadd.xlane.f32.xlu0 %v5843_v4  ;;  %v5840_v15 = vsel %vm1945_vm8, %v9525_v0, 0.0  ;;  %v10690_v4 = vsub.s32 1, %v6498_v17 }
0x236c   : > { %5841 = vadd.xlane.f32.xlu1 %v5840_v15 }
0x23f8   : > { %v5845_v47 = vpop.xlane.xlu0 %5844 }
0x23f9   : > { %9526 = vrcp.f32 %v5845_v47  ;;  %v5842_v56 = vpop.xlane.xlu1 %5841 }
0x23fa   : > { %9528 = vrcp.f32 %v5842_v56  ;;  %v10694_v56 = vsub.s32 3, %v6498_v17 }
0x2403   : > { %v9527_v19 = vpop.eup %9526 }
0x2404   : > { %v9529_v31 = vpop.eup %9528  ;;  %v5849_v58 = vmul.f32 %v9527_v19, %v9523_v61 }
0x2405   : > { %v5848_v60 = vmul.f32 %v9529_v31, %v9525_v0  ;;  %v10688_v0 = vsub.s32 2, %v6498_v17  ;;  %v10697_v31 = vsub.s32 4, %v6498_v17 }
0x2407   : > { %8887 = vmatprep.mubr.msk.f32.mxu0 %vm1945_vm8, %v5848_v60 }
0x2408   : > { %8888 = vmatmul.mubr.msk.f32.vlgmr.msra.gmra.mrb[44].mxu0 %vm1945_vm8, %v5849_v58  ;;  %v10700_v58 = vsub.s32 5, %v6498_v17 }
0x2409   : > { %9342 = vmatpush3.bf16.msra.mxu0 %v10335_v32  ;;  %v6159_v32 = vld [vmem:[%s11175_s5] sm:$0xf]  ;;  %s11180_s5 = sld [smem:[#allocation7_spill]] }
0x240a   : > { %9344 = vmatprep.subr.bf16.mxu0 %v10341_v38 }
0x240d   : > { %9346 = vmatpush3.bf16.msra.mxu0 %v10341_v38  ;;  %v6244_v38 = vld [vmem:[%s11177_s28] sm:$0xff] }
0x240e   : > { %8905 = vmatprep.subr.msk.mxu0 %vm1291_vm1, %v10344_v40  ;;  %v9348_v55 = vpack.c.bf16 %v6245_v39, %v6244_v38  ;;  %v10706_v38 = vsub.s32 7, %v6498_v17 }
0x2411   : > { %8906 = vmatpush3.msk.msra.mxu0 %vm1291_vm1, %v10344_v40  ;;  %v1195_v40 = vld [vmem:[%s1186_s7] sm:$0xff]  ;;  %s11182_s7 = sld [smem:[#allocation21_spill]] }
0x2412   : > { %9353 = vmatprep.subr.bf16.mxu0 %v11133_v57 }
0x24db   : > { %v8889_v18 = vpop.f32.mrb[44].mxu0 }
0x24dc   : > { %v5922_v62 = vpop.f32.mrb[45].mxu0 }
0x24dd   : > { %8894 = vmatprep.mubr.msk.f32.mxu1 %vm1855_vm6, %v5922_v62  ;;  %v10703_v62 = vsub.s32 6, %v6498_v17 }
0x24de   : > { %8895 = vmatmul.mubr.msk.f32.vlgmr.msra.gmra.mrb[36].mxu1 %vm1855_vm6, %v8889_v18  ;;  %vm6801_vm6 = vcmask 1047559  }
0x24df   : > { %8911 = vmatpush3.msk.msra.mxu1 %vm1291_vm1, %v6159_v32  ;;  %8912 = vmatprep.mubr.msk.f32.mxu1 %vm9636_vm12, %v9634_v2  ;;  %vm6793_vm1 = vcmask 1043459  }
0x24e0   : > { %9347 = vmatprep.subr.bf16.mxu1 %v11133_v57 }
0x24e2   : > { %8913 = vmatmul.mubr.msk.f32.vlgmr.msra.gmra.mrb[46].mxu1 %vm1284_vm3, %v1195_v40 }
0x24e3   : > { %9349 = vmatpush3.bf16.msra.mxu1 %v9348_v55  ;;  %8923 = vmatprep.mubr.msk.f32.mxu1 %vm9636_vm12, %v9634_v2 }
0x24e4   : > { %9350 = vmatprep.subr.bf16.mxu1 %v11133_v57 }
0x24e7   : > { %9352 = vmatpush3.bf16.msra.mxu1 %v9351_v13 }
0x24e8   : > { %9359 = vmatprep.subr.bf16.mxu1 %v11133_v57 }
0x25b1   : > { %v8896_v43 = vpop.f32.mrb[36].mxu1 }
0x25b2   : > { %v6015_v11 = vadd.f32 %v8896_v43, %v10323_v53  ;;  %v6003_v27 = vpop.f32.mrb[37].mxu1 }
0x25b3   : > { %v6014_v35 = vadd.f32 %v10323_v53, %v6003_v27  ;;  %v6418_v53 = vmul.f32 %v10389_v21, %v10389_v21 }
0x25b4   : > { %v6017_v37 = vadd.f32 %v6015_v11, %v10393_v36 }
0x25b5   : > { %v6239_v28 = vpop.f32.mrb[46].mxu1  ;;  %v6016_v59 = vadd.f32 %v6014_v35, %v10386_v1  ;;  %v6417_v1 = vmul.f32 %v10382_v42, %v10382_v42  ;;  %v6422_v36 = vsel %vm1284_vm3, %v6418_v53, 0.0 }
0x25b6   : > { %v6240_v49 = vadd.f32 %v8016_v14, %v6239_v28  ;;  %v8914_v5 = vpop.f32.mrb[47].mxu1  ;;  %v6021_v6 = vsel %vm1590_vm5, %v6017_v37, 0.0 }
0x25b7   : > { %6022 = vadd.xlane.f32.xlu0 %v6021_v6  ;;  %v6018_v26 = vsel %vm1590_vm5, %v6016_v59, 0.0  ;;  %v6419_v33 = vsel %vm1284_vm3, %v6417_v1, 0.0  ;;  %v6330_v5 = vld [vmem:[%s11179_s2 + $0x8] sm:$0xff]  ;;  %v6331_v1 = vld [vmem:[%s11179_s2 + $0x10] sm:$0xff] }
0x25b8   : > { %v6243_v30 = vmax.f32 %v6240_v49, 0.0  ;;  %6019 = vadd.xlane.f32.xlu1 %v6018_v26  ;;  %v6329_v49 = vld [vmem:[%s11179_s2] sm:$0xff] }
0x25ba   : > { %8924 = vmatmul.mubr.msk.f32.vlgmr.msra.gmra.mrb[48].mxu1 %vm1392_vm4, %v6243_v30  ;;  %v9354_v30 = vpack.c.bf16 %v6330_v5, %v6329_v49 }
0x25bb   : > { %9362 = vmatpush3.bf16.xpose.msk.msra.mxu1 %vm9361_vm13, %v9360_v25  ;;  %8941 = vmatprep.mubr.msk.f32.mxu1 %vm9636_vm12, %v9634_v2  ;;  %v11181_v25 = vld [vmem:[#allocation24_spill] sm:$0xff] }
0x25bc   : > { %9366 = vmatprep.subr.bf16.mxu1 %v11133_v57  ;;  %6423 = vadd.xlane.f32.xlu0 %v6422_v36  ;;  %v6332_v36 = vld [vmem:[%s11179_s2 + $0x18] sm:$0xff] }
0x25bd   : > { %6420 = vadd.xlane.f32.xlu1 %v6419_v33  ;;  %v8019_v33 = vld [vmem:[%s11180_s5] ss:$0 sm:$0xff]  ;;  %v9357_v45 = vpack.c.bf16 %v6332_v36, %v6331_v1  ;;  %s11183_s5 = sld [smem:[#allocation9_spill]] }
0x25c2   : > { %8942 = vmatmul.mubr.msk.f32.vlgmr.msra.gmra.mrb[50].mxu1 %vm1284_vm3, %v1195_v40  ;;  %vm6797_vm3 = vcmask 1045509  }
0x25c3   : > { %8959 = vmatprep.mubr.msk.f32.mxu1 %vm9636_vm12, %v9634_v2 }
0x2644   : > { %v6023_v8 = vpop.xlane.xlu0 %6022 }
0x2645   : > { %v6025_v22 = vmul.f32 0.027777778, %v6023_v8  ;;  %v6020_v21 = vpop.xlane.xlu1 %6019 }
0x2646   : > { %v6024_v63 = vmul.f32 0.027777778, %v6020_v21 }
0x2647   : > { %v6027_v12 = vsub.f32 %v6017_v37, %v6025_v22 }
0x2648   : > { %v6026_v42 = vsub.f32 %v6016_v59, %v6024_v63 }
0x2649   : > { %v6029_v23 = vmul.f32 %v6027_v12, %v6027_v12  ;;  %v10709_v40 = vpop.xlane.xlu0 %6423 }
0x264a   : > { %v6028_v24 = vmul.f32 %v6026_v42, %v6026_v42  ;;  %v10711_v55 = vpop.xlane.xlu1 %6420 }
0x264b   : > { %v6033_v29 = vsel %vm1590_vm5, %v6029_v23, 0.0 }
0x264c   : > { %6034 = vadd.xlane.f32.xlu0 %v6033_v29  ;;  %v6030_v34 = vsel %vm1590_vm5, %v6028_v24, 0.0 }
0x264d   : > { %6031 = vadd.xlane.f32.xlu1 %v6030_v34 }
0x268d   : > { %v10683_v9 = vpop.f32.mrb[48].mxu1 }
0x268e   : > { %v8925_v20 = vpop.f32.mrb[49].mxu1  ;;  %v6325_v17 = vadd.f32 %v8019_v33, %v10683_v9 }
0x2695   : > { %v6491_v51 = vpop.f32.mrb[50].mxu1 }
0x2696   : > { %v6495_v3 = vmul.f32 2.0, %v6491_v51  ;;  %v8943_v46 = vpop.f32.mrb[51].mxu1 }
0x2698   : > { %v6500_v61 = vrot.slane %v6495_v3, %v10685_v16  ;;  %v6522_v15 = vrot.slane %v6495_v3, %v10688_v0  ;;  %v6511_v47 = vrot.slane %v6495_v3, %v10690_v4  ;;  %v6533_v19 = vrot.slane %v6495_v3, %v10694_v56 }
0x2699   : > { %v6544_v60 = vrot.slane %v6495_v3, %v10697_v31  ;;  %v6555_v18 = vrot.slane %v6495_v3, %v10700_v58  ;;  %v6566_v32 = vrot.slane %v6495_v3, %v10703_v62  ;;  %v6577_v39 = vrot.slane %v6495_v3, %v10706_v38 }
0x269a   : > { %6506 = vbcast.lane.b32.xlu0 %v6500_v61, 264  ;;  %6502 = vbcast.lane.b32.xlu1 %v6500_v61, 256 }
0x269e   : > { %6524 = vbcast.lane.b32.xlu0 %v6522_v15, 256  ;;  %6513 = vbcast.lane.b32.xlu1 %v6511_v47, 256 }
0x26a2   : > { %6535 = vbcast.lane.b32.xlu0 %v6533_v19, 256  ;;  %6517 = vbcast.lane.b32.xlu1 %v6511_v47, 264 }
0x26a6   : > { %6546 = vbcast.lane.b32.xlu0 %v6544_v60, 256  ;;  %6528 = vbcast.lane.b32.xlu1 %v6522_v15, 264 }
0x26aa   : > { %6557 = vbcast.lane.b32.xlu0 %v6555_v18, 256  ;;  %6539 = vbcast.lane.b32.xlu1 %v6533_v19, 264 }
0x26ae   : > { %6568 = vbcast.lane.b32.xlu0 %v6566_v32, 256  ;;  %6550 = vbcast.lane.b32.xlu1 %v6544_v60, 264 }
0x26b2   : > { %6579 = vbcast.lane.b32.xlu0 %v6577_v39, 256  ;;  %6561 = vbcast.lane.b32.xlu1 %v6555_v18, 264 }
0x26b6   : > { %6572 = vbcast.lane.b32.xlu1 %v6566_v32, 264 }
0x26ba   : > { %6583 = vbcast.lane.b32.xlu1 %v6577_v39, 264 }
0x26d9   : > { %v6035_v48 = vpop.xlane.xlu0 %6034 }
0x26da   : > { %v6037_v52 = vmul.f32 0.027777778, %v6035_v48  ;;  %v6032_v13 = vpop.xlane.xlu1 %6031 }
0x26db   : > { %v6036_v43 = vmul.f32 0.027777778, %v6032_v13 }
0x26dc   : > { %v6039_v11 = vadd.f32 1e-05, %v6037_v52 }
0x26dd   : > { %v6038_v27 = vadd.f32 1e-05, %v6036_v43 }
0x26de   : > { %9530 = vrsqrt.f32 %v6039_v11 }
0x26df   : > { %9532 = vrsqrt.f32 %v6038_v27 }
0x26e0   : > { %9534 = vpow2.f32 %v6415_v7 }
0x26e8   : > { %v9531_v35 = vpop.eup %9530 }
0x26e9   : > { %v9533_v14 = vpop.eup %9532  ;;  %v6043_v37 = vmul.f32 %v9531_v35, %v6027_v12 }
0x26ea   : > { %v6042_v28 = vmul.f32 %v9533_v14, %v6026_v42  ;;  %v10732_v8 = vpop.eup %9534 }
0x26eb   : > { %v6045_v59 = vmul.f32 %v10354_v10, %v6043_v37 }
0x26ec   : > { %v6044_v6 = vmul.f32 %v10354_v10, %v6042_v28  ;;  %v6328_v10 = vmax.f32 %v6325_v17, 0.0 }
0x26ed   : > { %v6047_v53 = vadd.f32 %v11181_v25, %v6045_v59 }
0x26ee   : > { %v6046_v26 = vadd.f32 %v11181_v25, %v6044_v6 }
0x26f0   : > { %8907 = vmatprep.mubr.msk.f32.mxu0 %vm1590_vm5, %v6046_v26 }
0x26f1   : > { %8908 = vmatmul.mubr.msk.f32.vlgmr.msra.gmra.mrb[46].mxu0 %vm1590_vm5, %v6047_v53  ;;  %vm6799_vm5 = vcmask 1046534  }
0x26f2   : > { %9355 = vmatpush3.bf16.msra.mxu0 %v9354_v30  ;;  %8934 = vmatprep.mubr.msk.f32.mxu0 %vm9636_vm12, %v9634_v2 }
0x26f3   : > { %9356 = vmatprep.subr.bf16.mxu0 %v11133_v57 }
0x26f6   : > { %9358 = vmatpush3.bf16.msra.mxu0 %v9357_v45 }
0x26f7   : > { %9363 = vmatprep.subr.bf16.mxu0 %v11133_v57 }
0x26f9   : > { %8935 = vmatmul.mubr.msk.f32.vlgmr.msra.gmra.mrb[48].mxu0 %vm1392_vm4, %v6328_v10 }
0x26fa   : > { %8948 = vmatprep.mubr.msk.f32.mxu0 %vm9636_vm12, %v9634_v2 }
0x270c   : > { %v6507_v22 = vpop.permute.xlu0 %6506  ;;  %v6503_v21 = vpop.permute.xlu1 %6502 }
0x270d   : > { %v6602_v63 = vsub.f32 %v10709_v40, %v6507_v22  ;;  %v6601_v12 = vsub.f32 %v10711_v55, %v6503_v21 }
0x270f   : > { %v10737_v42 = vmul.f32 %v10732_v8, %v6602_v63  ;;  %v10740_v23 = vmul.f32 %v10732_v8, %v6601_v12 }
0x2710   : > { %v6525_v24 = vpop.permute.xlu0 %6524  ;;  %v6514_v29 = vpop.permute.xlu1 %6513 }
0x2711   : > { %v6634_v34 = vsub.f32 0.0, %v10737_v42  ;;  %v6633_v9 = vsub.f32 0.0, %v10740_v23  ;;  %v6605_v20 = vsub.f32 %v10711_v55, %v6525_v24  ;;  %v6603_v41 = vsub.f32 %v10711_v55, %v6514_v29 }
0x2713   : > { %v10747_v51 = vmul.f32 %v10732_v8, %v6603_v41  ;;  %6669 = vperm.xlu1 %9457, %v6634_v34   ;;  %6666 = vperm.xlu0 %9456, %v6633_v9   ;;  %v10754_v61 = vmul.f32 %v10732_v8, %v6605_v20 }
0x2714   : > { %v6536_v3 = vpop.permute.xlu0 %6535  ;;  %v6518_v46 = vpop.permute.xlu1 %6517 }
0x2715   : > { %v6635_v15 = vsub.f32 0.0, %v10747_v51  ;;  %v6607_v47 = vsub.f32 %v10711_v55, %v6536_v3  ;;  %v6604_v19 = vsub.f32 %v10709_v40, %v6518_v46  ;;  %v6637_v48 = vsub.f32 0.0, %v10754_v61 }
0x2717   : > { %v10760_v60 = vmul.f32 %v10732_v8, %v6604_v19  ;;  %6672 = vperm.xlu1 %9457, %v6635_v15   ;;  %v10765_v18 = vmul.f32 %v10732_v8, %v6607_v47 }
0x2718   : > { %v6547_v32 = vpop.permute.xlu0 %6546  ;;  %v6529_v39 = vpop.permute.xlu1 %6528 }
0x2719   : > { %v6636_v52 = vsub.f32 0.0, %v10760_v60  ;;  %v6609_v13 = vsub.f32 %v10711_v55, %v6547_v32  ;;  %v6606_v43 = vsub.f32 %v10709_v40, %v6529_v39  ;;  %v6639_v27 = vsub.f32 0.0, %v10765_v18 }
0x271b   : > { %v10772_v11 = vmul.f32 %v10732_v8, %v6606_v43  ;;  %6678 = vperm.xlu1 %9457, %v6637_v48   ;;  %6675 = vperm.xlu0 %9456, %v6636_v52   ;;  %v10780_v37 = vmul.f32 %v10732_v8, %v6609_v13  ;;  %v7320_v13 = vld [vmem:[%s11182_s7] sm:$0xff]  ;;  %v7321_v43 = vld [vmem:[%s11182_s7 + $0x8] sm:$0xff] }
0x271c   : > { %v6558_v35 = vpop.permute.xlu0 %6557  ;;  %v6540_v14 = vpop.permute.xlu1 %6539 }
0x271d   : > { %v6638_v28 = vsub.f32 0.0, %v10772_v11  ;;  %v6611_v59 = vsub.f32 %v10711_v55, %v6558_v35  ;;  %v6608_v49 = vsub.f32 %v10709_v40, %v6540_v14  ;;  %v6641_v30 = vsub.f32 0.0, %v10780_v37 }
0x271e   : > { %v9367_v35 = vpack.c.bf16 %v7321_v43, %v7320_v13 }
0x271f   : > { %v10786_v5 = vmul.f32 %v10732_v8, %v6608_v49  ;;  %6684 = vperm.xlu1 %9457, %v6639_v27   ;;  %6681 = vperm.xlu0 %9456, %v6638_v28   ;;  %v10793_v6 = vmul.f32 %v10732_v8, %v6611_v59 }
0x2720   : > { %v6569_v25 = vpop.permute.xlu0 %6568  ;;  %v6551_v26 = vpop.permute.xlu1 %6550  ;;  %9368 = vmatpush3.bf16.msra.mxu1 %v9367_v35 }
0x2721   : > { %v6640_v53 = vsub.f32 0.0, %v10786_v5  ;;  %v6613_v1 = vsub.f32 %v10711_v55, %v6569_v25  ;;  %v6610_v36 = vsub.f32 %v10709_v40, %v6551_v26  ;;  %v6643_v45 = vsub.f32 0.0, %v10793_v6  ;;  %9369 = vmatprep.subr.bf16.mxu1 %v11133_v57 }
0x2723   : > { %v10800_v33 = vmul.f32 %v10732_v8, %v6610_v36  ;;  %6690 = vperm.xlu1 %9457, %v6641_v30   ;;  %6687 = vperm.xlu0 %9456, %v6640_v53   ;;  %v10808_v44 = vmul.f32 %v10732_v8, %v6613_v1 }
0x2724   : > { %v6580_v17 = vpop.permute.xlu0 %6579  ;;  %v6562_v10 = vpop.permute.xlu1 %6561 }
0x2725   : > { %v6642_v7 = vsub.f32 0.0, %v10800_v33  ;;  %v6615_v22 = vsub.f32 %v10711_v55, %v6580_v17  ;;  %v6612_v21 = vsub.f32 %v10709_v40, %v6562_v10  ;;  %v6645_v24 = vsub.f32 0.0, %v10808_v44 }
0x2727   : > { %v10814_v63 = vmul.f32 %v10732_v8, %v6612_v21  ;;  %6696 = vperm.xlu1 %9457, %v6643_v45   ;;  %6693 = vperm.xlu0 %9456, %v6642_v7   ;;  %v10822_v29 = vmul.f32 %v10732_v8, %v6615_v22 }
0x2728   : > { %v6573_v12 = vpop.permute.xlu1 %6572 }
0x2729   : > { %v6644_v55 = vsub.f32 0.0, %v10814_v63  ;;  %v6614_v20 = vsub.f32 %v10709_v40, %v6573_v12  ;;  %v6647_v46 = vsub.f32 0.0, %v10822_v29 }
0x272b   : > { %v10827_v41 = vmul.f32 %v10732_v8, %v6614_v20  ;;  %6702 = vperm.xlu1 %9457, %v6645_v24   ;;  %6699 = vperm.xlu0 %9456, %v6644_v55  }
0x272c   : > { %v6584_v3 = vpop.permute.xlu1 %6583 }
0x272d   : > { %v11136_v47 = vsub.f32 0.0, %v10827_v41  ;;  %v6616_v19 = vsub.f32 %v10709_v40, %v6584_v3  ;;  %v7322_v40 = vld [vmem:[%s11182_s7 + $0x10] sm:$0xff] }
0x272f   : > { %v10837_v32 = vmul.f32 %v10732_v8, %v6616_v19  ;;  %6708 = vperm.xlu1 %9457, %v6647_v46   ;;  %6705 = vperm.xlu0 %9456, %v11136_v47   ;;  %v7323_v8 = vld [vmem:[%s11182_s7 + $0x18] sm:$0xff] }
0x2730   : > { %v9370_v14 = vpack.c.bf16 %v7323_v8, %v7322_v40 }
0x2731   : > { %v11135_v39 = vsub.f32 0.0, %v10837_v32 }
0x2732   : > { %9371 = vmatpush3.bf16.msra.mxu1 %v9370_v14 }
0x2733   : > { %6711 = vperm.xlu0 %9456, %v11135_v39   ;;  %9378 = vmatprep.subr.bf16.mxu1 %v11133_v57 }
0x2792   : > { %v6670_v59 = vpop.permute.xlu1 %6669  ;;  %v6667_v49 = vpop.permute.xlu0 %6666 }
0x2793   : > { %v6718_v43 = vrot.slane %v6667_v49, %v10677_v54  ;;  %v6723_v35 = vrot.slane %v6670_v59, %v10679_v50 }
0x2796   : > { %v6673_v25 = vpop.permute.xlu1 %6672 }
0x2797   : > { %v6729_v40 = vrot.slane %v6673_v25, %v10677_v54 }
0x279a   : > { %v6676_v26 = vpop.permute.xlu0 %6675  ;;  %v6679_v1 = vpop.permute.xlu1 %6678 }
0x279b   : > { %v6733_v20 = vrot.slane %v6676_v26, %v10679_v50  ;;  %v6738_v14 = vrot.slane %v6679_v1, %v10677_v54 }
0x279d   : > { %v6734_v26 = vsel %vm6724_vm14, %v6733_v20, %v6729_v40 }
0x279e   : > { %v6682_v36 = vpop.permute.xlu0 %6681  ;;  %v6685_v17 = vpop.permute.xlu1 %6684 }
0x279f   : > { %v6742_v3 = vrot.slane %v6682_v36, %v10679_v50  ;;  %v6747_v36 = vrot.slane %v6685_v17, %v10677_v54 }
0x27a1   : > { %v6743_v49 = vsel %vm6724_vm14, %v6742_v3, %v6738_v14 }
0x27a2   : > { %v6688_v10 = vpop.permute.xlu0 %6687  ;;  %v6691_v22 = vpop.permute.xlu1 %6690 }
0x27a3   : > { %v6751_v8 = vrot.slane %v6688_v10, %v10679_v50  ;;  %v6756_v59 = vrot.slane %v6691_v22, %v10677_v54  ;;  %v6725_v10 = vsel %vm6724_vm14, %v6723_v35, %v6718_v43 }
0x27a4   : > { %v6790_v20 = vsel %vm6789_vm15, %v6734_v26, %v6725_v10 }
0x27a5   : > { %v6752_v1 = vsel %vm6724_vm14, %v6751_v8, %v6747_v36  ;;  %v6792_v40 = vsel %vm6791_vm0, %v6743_v49, %v6790_v20 }
0x27a6   : > { %v6694_v21 = vpop.permute.xlu0 %6693  ;;  %v6697_v12 = vpop.permute.xlu1 %6696  ;;  %v6794_v43 = vsel %vm6793_vm1, %v6752_v1, %v6792_v40 }
0x27a7   : > { %v6760_v57 = vrot.slane %v6694_v21, %v10679_v50  ;;  %v6765_v21 = vrot.slane %v6697_v12, %v10677_v54 }
0x27a9   : > { %v6761_v17 = vsel %vm6724_vm14, %v6760_v57, %v6756_v59 }
0x27aa   : > { %v6700_v19 = vpop.permute.xlu0 %6699  ;;  %v6703_v13 = vpop.permute.xlu1 %6702  ;;  %v6796_v8 = vsel %vm6795_vm2, %v6761_v17, %v6794_v43 }
0x27ab   : > { %v6769_v39 = vrot.slane %v6700_v19, %v10679_v50  ;;  %v6774_v19 = vrot.slane %v6703_v13, %v10677_v54 }
0x27ad   : > { %v6770_v22 = vsel %vm6724_vm14, %v6769_v39, %v6765_v21 }
0x27ae   : > { %v6706_v25 = vpop.permute.xlu0 %6705  ;;  %v6709_v3 = vpop.permute.xlu1 %6708  ;;  %v6798_v13 = vsel %vm6797_vm3, %v6770_v22, %v6796_v8 }
0x27af   : > { %v6778_v47 = vrot.slane %v6706_v25, %v10679_v50  ;;  %v6783_v14 = vrot.slane %v6709_v3, %v10677_v54  ;;  %v8021_v25 = vld [vmem:[%s11183_s5] ss:$0 sm:$0xff]  ;;  %s11188_s5 = sld [smem:[#allocation23_spill]] }
0x27b1   : > { %v6779_v12 = vsel %vm6724_vm14, %v6778_v47, %v6774_v19 }
0x27b2   : > { %v6712_v35 = vpop.permute.xlu0 %6711  ;;  %v6800_v39 = vsel %vm6799_vm5, %v6779_v12, %v6798_v13 }
0x27b3   : > { %v6787_v57 = vrot.slane %v6712_v35, %v10679_v50 }
0x27b5   : > { %v6788_v26 = vsel %vm6724_vm14, %v6787_v57, %v6783_v14 }
0x27b6   : > { %v6802_v36 = vsel %vm6801_vm6, %v6788_v26, %v6800_v39 }
0x27b7   : > { %v6804_v49 = vsel %vm1945_vm8, %v6802_v36, -inf }
0x27b8   : > { %6805 = vmax.xlane.f32.xlu1 %v6804_v49 }
0x27c4   : > { %v10884_v47 = vpop.f32.mrb[46].mxu0 }
0x27c5   : > { %v10886_v59 = vpop.f32.mrb[47].mxu0 }
0x27cc   : > { %v6409_v10 = vpop.f32.mrb[48].mxu0 }
0x27cd   : > { %v6410_v1 = vadd.f32 %v8021_v25, %v6409_v10  ;;  %v8936_v21 = vpop.f32.mrb[49].mxu0 }
0x27cf   : > { %8960 = vmatmul.mubr.msk.f32.vlgmr.msra.gmra.mrb[52].mxu1 %vm1392_vm4, %v6410_v1 }
0x27d0   : > { %8981 = vmatprep.mubr.msk.f32.mxu1 %vm9636_vm12, %v9634_v2 }
0x2845   : > { %v6806_v20 = vpop.xlane.xlu1 %6805 }
0x2846   : > { %v6811_v17 = vrot.slane %v6806_v20, %v10685_v16  ;;  %v6815_v3 = vrot.slane %v6806_v20, %v10690_v4  ;;  %v6827_v22 = vrot.slane %v6806_v20, %v10697_v31  ;;  %v6839_v14 = vrot.slane %v6806_v20, %v10706_v38 }
0x2847   : > { %v6819_v23 = vrot.slane %v6806_v20, %v10688_v0  ;;  %v6823_v60 = vrot.slane %v6806_v20, %v10694_v56  ;;  %v6835_v37 = vrot.slane %v6806_v20, %v10703_v62 }
0x2848   : > { %v6848_v19 = vsub.f32 %v6633_v9, %v6811_v17  ;;  %v6849_v40 = vsub.f32 %v6634_v34, %v6811_v17  ;;  %v6850_v12 = vsub.f32 %v6635_v15, %v6815_v3  ;;  %v6857_v8 = vsub.f32 %v6642_v7, %v6827_v22 }
0x2849   : > { %v6851_v9 = vsub.f32 %v6636_v52, %v6815_v3  ;;  %v6862_v57 = vsub.f32 %v6647_v46, %v6839_v14  ;;  %v6852_v51 = vsub.f32 %v6637_v48, %v6819_v23  ;;  %v6853_v52 = vsub.f32 %v6638_v28, %v6819_v23 }
0x284a   : > { %v6864_v43 = vmul.f32 1.442695, %v6848_v19  ;;  %v6866_v35 = vmul.f32 1.442695, %v6849_v40  ;;  %v6868_v42 = vmul.f32 1.442695, %v6850_v12  ;;  %v6854_v61 = vsub.f32 %v6639_v27, %v6823_v60 }
0x284b   : > { %v6882_v34 = vmul.f32 1.442695, %v6857_v8  ;;  %v6870_v15 = vmul.f32 1.442695, %v6851_v9  ;;  %v6892_v7 = vmul.f32 1.442695, %v6862_v57  ;;  %v6855_v11 = vsub.f32 %v6640_v53, %v6823_v60 }
0x284c   : > { %9536 = vpow2.f32 %v6864_v43  ;;  %v6872_v13 = vmul.f32 1.442695, %v6852_v51  ;;  %v6874_v48 = vmul.f32 1.442695, %v6853_v52  ;;  %v6876_v28 = vmul.f32 1.442695, %v6854_v61 }
0x284d   : > { %9538 = vpow2.f32 %v6866_v35  ;;  %v6831_v27 = vrot.slane %v6806_v20, %v10700_v58  ;;  %v6856_v36 = vsub.f32 %v6641_v30, %v6827_v22  ;;  %v6878_v49 = vmul.f32 1.442695, %v6855_v11  ;;  %v9583_v12 = vld [vmem:[%s11171_s11] ss:$0 sm:$0xff] }
0x284e   : > { %9540 = vpow2.f32 %v6868_v42  ;;  %v6860_v6 = vsub.f32 %v6645_v24, %v6835_v37  ;;  %v11184_v20 = vsub.f32 0.0, %v10827_v41  ;;  %v11185_v3 = vsub.f32 0.0, %v10837_v32 }
0x284f   : > { %9542 = vpow2.f32 %v6882_v34  ;;  %v6858_v53 = vsub.f32 %v6643_v45, %v6831_v27  ;;  %v6880_v25 = vmul.f32 1.442695, %v6856_v36  ;;  %v6859_v30 = vsub.f32 %v6644_v55, %v6831_v27 }
0x2850   : > { %9544 = vpow2.f32 %v6870_v15  ;;  %v6861_v19 = vsub.f32 %v11184_v20, %v6835_v37  ;;  %v6888_v63 = vmul.f32 1.442695, %v6860_v6  ;;  %v6863_v44 = vsub.f32 %v11185_v3, %v6839_v14 }
0x2851   : > { %9546 = vpow2.f32 %v6892_v7  ;;  %v6884_v1 = vmul.f32 1.442695, %v6858_v53  ;;  %v6886_v45 = vmul.f32 1.442695, %v6859_v30  ;;  %v10976_v32 = vadd.f32 %v9583_v12, %v10886_v59 }
0x2852   : > { %9548 = vpow2.f32 %v6872_v13  ;;  %v6890_v24 = vmul.f32 1.442695, %v6861_v19  ;;  %v6894_v22 = vmul.f32 1.442695, %v6863_v44  ;;  %v6126_v42 = vadd.f32 %v9583_v12, %v10884_v47 }
0x2853   : > { %9550 = vpow2.f32 %v6874_v48  ;;  %v6129_v8 = vsel %vm1392_vm4, %v10976_v32, 0.0 }
0x2854   : > { %9552 = vpow2.f32 %v6876_v28  ;;  %v6132_v59 = vsel %vm1392_vm4, %v6126_v42, 0.0 }
0x2855   : > { %9554 = vpow2.f32 %v6878_v49 }
0x2856   : > { %v10911_v33 = vpop.eup %9536  ;;  %9556 = vpow2.f32 %v6880_v25 }
0x2857   : > { %6913 = vperm.xlu0 %9456, %v10911_v33   ;;  %v10917_v29 = vpop.eup %9538  ;;  %9558 = vpow2.f32 %v6884_v1 }
0x2858   : > { %v10922_v46 = vpop.eup %9540  ;;  %9560 = vpow2.f32 %v6886_v45 }
0x2859   : > { %v10924_v26 = vpop.eup %9542  ;;  %9562 = vpow2.f32 %v6888_v63 }
0x285a   : > { %6940 = vperm.xlu1 %9457, %v10924_v26   ;;  %v10930_v39 = vpop.eup %9544  ;;  %9564 = vpow2.f32 %v6890_v24 }
0x285b   : > { %6916 = vperm.xlu0 %9456, %v10917_v29   ;;  %v10933_v18 = vpop.eup %9546  ;;  %9566 = vpow2.f32 %v6894_v22 }
0x285c   : > { %v10939_v5 = vpop.eup %9548 }
0x285d   : > { %v10944_v10 = vpop.eup %9550 }
0x285e   : > { %6955 = vperm.xlu1 %9457, %v10933_v18   ;;  %v10950_v21 = vpop.eup %9552 }
0x285f   : > { %6919 = vperm.xlu0 %9456, %v10922_v46   ;;  %v10955_v17 = vpop.eup %9554 }
0x2860   : > { %v10960_v55 = vpop.eup %9556 }
0x2861   : > { %v10965_v40 = vpop.eup %9558 }
0x2862   : > { %v10968_v41 = vpop.eup %9560 }
0x2863   : > { %6922 = vperm.xlu0 %9456, %v10930_v39   ;;  %v10971_v43 = vpop.eup %9562 }
0x2864   : > { %v10978_v35 = vpop.eup %9564 }
0x2865   : > { %v10983_v14 = vpop.eup %9566 }
0x2867   : > { %6925 = vperm.xlu0 %9456, %v10939_v5  }
0x286b   : > { %6928 = vperm.xlu0 %9456, %v10944_v10  }
0x286f   : > { %6931 = vperm.xlu0 %9456, %v10950_v21  }
0x2873   : > { %6934 = vperm.xlu0 %9456, %v10955_v17  }
0x2877   : > { %6937 = vperm.xlu0 %9456, %v10960_v55  }
0x287b   : > { %6943 = vperm.xlu0 %9456, %v10965_v40  }
0x287f   : > { %6946 = vperm.xlu0 %9456, %v10968_v41  }
0x2882   : > { %6130 = vadd.xlane.f32.xlu1 %v6129_v8 }
0x2883   : > { %6949 = vperm.xlu0 %9456, %v10971_v43  }
0x2887   : > { %6952 = vperm.xlu0 %9456, %v10978_v35  }
0x288b   : > { %6958 = vperm.xlu0 %9456, %v10983_v14  }
0x28a2   : > { %v10986_v23 = vpop.f32.mrb[52].mxu1 }
0x28a3   : > { %v8961_v9 = vpop.f32.mrb[53].mxu1 }
0x28aa   : > { %6133 = vadd.xlane.f32.xlu0 %v6132_v59 }
0x28d6   : > { %v6914_v34 = vpop.permute.xlu0 %6913 }
0x28d7   : > { %v6963_v1 = vrot.slane %v6914_v34, %v10677_v54 }
0x28d9   : > { %v6941_v27 = vpop.permute.xlu1 %6940 }
0x28da   : > { %v6917_v57 = vpop.permute.xlu0 %6916  ;;  %v7003_v19 = vrot.slane %v6941_v27, %v10679_v50 }
0x28db   : > { %v6967_v49 = vrot.slane %v6917_v57, %v10679_v50 }
0x28dd   : > { %v6968_v44 = vsel %vm6724_vm14, %v6967_v49, %v6963_v1  ;;  %v6956_v8 = vpop.permute.xlu1 %6955 }
0x28de   : > { %v6920_v51 = vpop.permute.xlu0 %6919 }
0x28df   : > { %v6972_v53 = vrot.slane %v6920_v51, %v10677_v54 }
0x28e2   : > { %v6923_v15 = vpop.permute.xlu0 %6922 }
0x28e3   : > { %v6976_v28 = vrot.slane %v6923_v15, %v10679_v50 }
0x28e5   : > { %v6977_v6 = vsel %vm6724_vm14, %v6976_v28, %v6972_v53 }
0x28e6   : > { %v6926_v7 = vpop.permute.xlu0 %6925  ;;  %v7032_v9 = vsel %vm6789_vm15, %v6977_v6, %v6968_v44 }
0x28e7   : > { %v6981_v37 = vrot.slane %v6926_v7, %v10677_v54 }
0x28ea   : > { %v6929_v60 = vpop.permute.xlu0 %6928 }
0x28eb   : > { %v6985_v36 = vrot.slane %v6929_v60, %v10679_v50 }
0x28ed   : > { %v6986_v63 = vsel %vm6724_vm14, %v6985_v36, %v6981_v37 }
0x28ee   : > { %v6932_v52 = vpop.permute.xlu0 %6931  ;;  %v7033_v57 = vsel %vm6791_vm0, %v6986_v63, %v7032_v9 }
0x28ef   : > { %v6990_v45 = vrot.slane %v6932_v52, %v10677_v54  ;;  %v7026_v52 = vrot.slane %v6956_v8, %v10677_v54 }
0x28f2   : > { %v6935_v13 = vpop.permute.xlu0 %6934 }
0x28f3   : > { %v6994_v25 = vrot.slane %v6935_v13, %v10679_v50 }
0x28f5   : > { %v6995_v24 = vsel %vm6724_vm14, %v6994_v25, %v6990_v45 }
0x28f6   : > { %v6938_v61 = vpop.permute.xlu0 %6937  ;;  %v7034_v15 = vsel %vm6793_vm1, %v6995_v24, %v7033_v57 }
0x28f7   : > { %v6999_v30 = vrot.slane %v6938_v61, %v10677_v54 }
0x28f9   : > { %v7004_v59 = vsel %vm6724_vm14, %v7003_v19, %v6999_v30 }
0x28fa   : > { %v6944_v48 = vpop.permute.xlu0 %6943  ;;  %v7035_v13 = vsel %vm6795_vm2, %v7004_v59, %v7034_v15 }
0x28fb   : > { %v7008_v22 = vrot.slane %v6944_v48, %v10677_v54 }
0x28fe   : > { %v6947_v11 = vpop.permute.xlu0 %6946 }
0x28ff   : > { %v7012_v20 = vrot.slane %v6947_v11, %v10679_v50 }
0x2901   : > { %v7013_v51 = vsel %vm6724_vm14, %v7012_v20, %v7008_v22 }
0x2902   : > { %v6950_v47 = vpop.permute.xlu0 %6949  ;;  %v7036_v48 = vsel %vm6797_vm3, %v7013_v51, %v7035_v13  ;;  %v9584_v51 = vld [vmem:[%s11173_s0] ss:$0 sm:$0xff] }
0x2903   : > { %v7017_v34 = vrot.slane %v6950_v47, %v10677_v54 }
0x2906   : > { %v6953_v3 = vpop.permute.xlu0 %6952 }
0x2907   : > { %v7021_v12 = vrot.slane %v6953_v3, %v10679_v50 }
0x2909   : > { %v7022_v7 = vsel %vm6724_vm14, %v7021_v12, %v7017_v34 }
0x290a   : > { %v6959_v60 = vpop.permute.xlu0 %6958  ;;  %v7037_v28 = vsel %vm6799_vm5, %v7022_v7, %v7036_v48 }
0x290b   : > { %v7030_v61 = vrot.slane %v6959_v60, %v10679_v50  ;;  %v9585_v60 = vld [vmem:[%s11174_s18] ss:$0 sm:$0xff] }
0x290d   : > { %v7031_v11 = vsel %vm6724_vm14, %v7030_v61, %v7026_v52  ;;  %v11186_v61 = vmov 0.0|0.0  }
0x290e   : > { %v7038_v27 = vsel %vm6801_vm6, %v7031_v11, %v7037_v28 }
0x290f   : > { %v7040_v36 = vsel %vm1945_vm8, %v7038_v27, 0.0  ;;  %v6131_v47 = vpop.xlane.xlu1 %6130 }
0x2910   : > { %7041 = vadd.xlane.f32.xlu0 %v7040_v36  ;;  %v6135_v49 = vmul.f32 0.03125, %v6131_v47 }
0x2912   : > { %v6137_v53 = vsub.f32 %v10976_v32, %v6135_v49 }
0x2914   : > { %v6139_v25 = vmul.f32 %v6137_v53, %v6137_v53 }
0x2916   : > { %v6141_v37 = vsel %vm1392_vm4, %v6139_v25, 0.0 }
0x2917   : > { %6142 = vadd.xlane.f32.xlu1 %v6141_v37 }
0x2937   : > { %v6134_v30 = vpop.xlane.xlu0 %6133 }
0x2938   : > { %v6136_v1 = vmul.f32 0.03125, %v6134_v30 }
0x293a   : > { %v6138_v6 = vsub.f32 %v6126_v42, %v6136_v1 }
0x293c   : > { %v6140_v45 = vmul.f32 %v6138_v6, %v6138_v6 }
0x293e   : > { %v6144_v20 = vsel %vm1392_vm4, %v6140_v45, 0.0 }
0x293f   : > { %6145 = vadd.xlane.f32.xlu0 %v6144_v20 }
0x299d   : > { %v7042_v19 = vpop.xlane.xlu0 %7041 }
0x299e   : > { %9568 = vrcp.f32 %v7042_v19 }
0x29a4   : > { %v6143_v9 = vpop.xlane.xlu1 %6142 }
0x29a8   : > { %v9569_v63 = vpop.eup %9568 }
0x29a9   : > { %v7048_v3 = vrot.slane %v9569_v63, %v10685_v16  ;;  %v7056_v24 = vrot.slane %v9569_v63, %v10688_v0  ;;  %v7052_v22 = vrot.slane %v9569_v63, %v10690_v4  ;;  %v7060_v8 = vrot.slane %v9569_v63, %v10694_v56 }
0x29ab   : > { %v7086_v44 = vmul.f32 %v10917_v29, %v7048_v3  ;;  %v7085_v32 = vmul.f32 %v10911_v33, %v7048_v3  ;;  %v7089_v42 = vmul.f32 %v10939_v5, %v7056_v24  ;;  %v7087_v12 = vmul.f32 %v10922_v46, %v7052_v22 }
0x29ac   : > { %v7091_v16 = vmul.f32 %v10950_v21, %v7060_v8  ;;  %v7088_v29 = vmul.f32 %v10930_v39, %v7052_v22  ;;  %v7064_v33 = vrot.slane %v9569_v63, %v10697_v31  ;;  %v7090_v4 = vmul.f32 %v10944_v10, %v7056_v24 }
0x29ad   : > { %7121 = vperm.xlu0 %9456, %v7086_v44   ;;  %7118 = vperm.xlu1 %9457, %v7085_v32   ;;  %v7068_v5 = vrot.slane %v9569_v63, %v10700_v58  ;;  %v7092_v46 = vmul.f32 %v10955_v17, %v7060_v8  ;;  %v7072_v21 = vrot.slane %v9569_v63, %v10703_v62  ;;  %v6147_v58 = vmul.f32 0.03125, %v6143_v9  ;;  %v7317_v9 = vld [vmem:[%s11187_s24 + $0x8] sm:$0xff] }
0x29ae   : > { %v7093_v0 = vmul.f32 %v10960_v55, %v7064_v33  ;;  %v7094_v39 = vmul.f32 %v10924_v26, %v7064_v33  ;;  %v7076_v55 = vrot.slane %v9569_v63, %v10706_v38 }
0x29af   : > { %v7095_v56 = vmul.f32 %v10965_v40, %v7068_v5  ;;  %v7097_v31 = vmul.f32 %v10971_v43, %v7072_v21  ;;  %v7096_v40 = vmul.f32 %v10968_v41, %v7068_v5  ;;  %v6149_v62 = vadd.f32 1e-05, %v6147_v58 }
0x29b0   : > { %v7099_v10 = vmul.f32 %v10933_v18, %v7076_v55  ;;  %v7098_v17 = vmul.f32 %v10978_v35, %v7072_v21  ;;  %v7100_v26 = vmul.f32 %v10983_v14, %v7076_v55  ;;  %v7316_v55 = vld [vmem:[%s11187_s24] sm:$0xff] }
0x29b1   : > { %7130 = vperm.xlu0 %9456, %v7089_v42   ;;  %7124 = vperm.xlu1 %9457, %v7087_v12   ;;  %9570 = vrsqrt.f32 %v6149_v62 }
0x29b5   : > { %7136 = vperm.xlu0 %9456, %v7091_v16   ;;  %7127 = vperm.xlu1 %9457, %v7088_v29  }
0x29b9   : > { %7142 = vperm.xlu0 %9456, %v7093_v0   ;;  %7133 = vperm.xlu1 %9457, %v7090_v4  }
0x29bb   : > { %v9571_v34 = vpop.eup %9570 }
0x29bc   : > { %v6153_v18 = vmul.f32 %v9571_v34, %v6137_v53 }
0x29bd   : > { %7148 = vperm.xlu0 %9456, %v7095_v56   ;;  %7139 = vperm.xlu1 %9457, %v7092_v46  }
0x29be   : > { %v6155_v15 = vmul.f32 %v9584_v51, %v6153_v18  ;;  %v7318_v18 = vld [vmem:[%s11187_s24 + $0x10] sm:$0xff] }
0x29c0   : > { %v6157_v52 = vadd.f32 %v9585_v60, %v6155_v15  ;;  %v7479_v15 = vld [vmem:[%s11188_s5] sm:$0xff] }
0x29c1   : > { %7154 = vperm.xlu0 %9456, %v7097_v31   ;;  %7145 = vperm.xlu1 %9457, %v7094_v39  }
0x29c5   : > { %7160 = vperm.xlu0 %9456, %v7099_v10   ;;  %7151 = vperm.xlu1 %9457, %v7096_v40  }
0x29c9   : > { %7157 = vperm.xlu1 %9457, %v7098_v17  }
0x29cc   : > { %v6146_v38 = vpop.xlane.xlu0 %6145 }
0x29cd   : > { %v6148_v43 = vmul.f32 0.03125, %v6146_v38  ;;  %7163 = vperm.xlu1 %9457, %v7100_v26  }
0x29cf   : > { %v6150_v59 = vadd.f32 1e-05, %v6148_v43  ;;  %v9373_v43 = vpack.c.bf16 %v7317_v9, %v7316_v55 }
0x29d1   : > { %9572 = vrsqrt.f32 %v6150_v59 }
0x29db   : > { %v9573_v57 = vpop.eup %9572 }
0x29dc   : > { %v6154_v41 = vmul.f32 %v9573_v57, %v6138_v6  ;;  %v7319_v57 = vld [vmem:[%s11187_s24 + $0x18] sm:$0xff] }
0x29de   : > { %v6156_v7 = vmul.f32 %v9584_v51, %v6154_v41 }
0x29e0   : > { %v6158_v35 = vadd.f32 %v9585_v60, %v6156_v7  ;;  %v7480_v7 = vld [vmem:[%s11188_s5 + $0x8] sm:$0xff]  ;;  %v7481_v60 = vld [vmem:[%s11188_s5 + $0x10] sm:$0xff] }
0x29e2   : > { %v9364_v13 = vpack.c.bf16 %v6158_v35, %v6157_v52  ;;  %v9379_v52 = vpack.c.bf16 %v7480_v7, %v7479_v15  ;;  %v7482_v35 = vld [vmem:[%s11188_s5 + $0x18] sm:$0xff] }
0x29e4   : > { %9365 = vmatpush3.bf16.msra.mxu0 %v9364_v13  ;;  %v7564_v13 = vld [vmem:[%s9826_s1] sm:$0xff]  ;;  %9380 = vmatpush3.bf16.msra.mxu1 %v9379_v52 }
0x29e5   : > { %9372 = vmatprep.subr.bf16.mxu0 %v11186_v61  ;;  %9381 = vmatprep.subr.bf16.mxu1 %v11186_v61 }
0x2a2c   : > { %v7119_v14 = vpop.permute.xlu1 %7118  ;;  %v7122_v48 = vpop.permute.xlu0 %7121 }
0x2a2d   : > { %v7168_v20 = vrot.slane %v7119_v14, %v10677_v54  ;;  %v7172_v19 = vrot.slane %v7122_v48, %v10679_v50  ;;  %v7565_v14 = vld [vmem:[%s9826_s1 + $0x8] sm:$0xff]  ;;  %v9382_v48 = vpack.c.bf16 %v7482_v35, %v7481_v60 }
0x2a2f   : > { %v7173_v29 = vsel %vm6724_vm14, %v7172_v19, %v7168_v20  ;;  %9383 = vmatpush3.bf16.msra.mxu1 %v9382_v48  ;;  %v8032_v20 = vld [vmem:[%s9831_s10] ss:$0 sm:$0xff] }
0x2a30   : > { %v7125_v11 = vpop.permute.xlu1 %7124  ;;  %v7131_v28 = vpop.permute.xlu0 %7130 }
0x2a31   : > { %v7177_v63 = vrot.slane %v7125_v11, %v10677_v54  ;;  %v7186_v44 = vrot.slane %v7131_v28, %v10677_v54  ;;  %v9385_v11 = vpack.c.bf16 %v7565_v14, %v7564_v13  ;;  %v8029_v28 = vld [vmem:[%s11189_s6] ss:$0 sm:$0xff]  ;;  %s11190_s6 = sshll.u32 %s11192_s15, 3 }
0x2a32   : > { %s1190_s0 = scalar_lea.vmem %s9836_s16, %s11190_s6 }
0x2a34   : > { %v7128_v27 = vpop.permute.xlu1 %7127  ;;  %v7137_v36 = vpop.permute.xlu0 %7136 }
0x2a35   : > { %v7181_v30 = vrot.slane %v7128_v27, %v10679_v50  ;;  %v7195_v22 = vrot.slane %v7137_v36, %v10677_v54 }
0x2a37   : > { %v7182_v24 = vsel %vm6724_vm14, %v7181_v30, %v7177_v63  ;;  %v8030_v30 = vld [vmem:[%s9821_s17] ss:$0 sm:$0xff] }
0x2a38   : > { %v7134_v47 = vpop.permute.xlu1 %7133  ;;  %v7143_v49 = vpop.permute.xlu0 %7142  ;;  %v7237_v5 = vsel %vm6789_vm15, %v7182_v24, %v7173_v29 }
0x2a39   : > { %v7190_v1 = vrot.slane %v7134_v47, %v10679_v50  ;;  %v7204_v8 = vrot.slane %v7143_v49, %v10677_v54 }
0x2a3b   : > { %v7191_v12 = vsel %vm6724_vm14, %v7190_v1, %v7186_v44 }
0x2a3c   : > { %v7140_v53 = vpop.permute.xlu1 %7139  ;;  %v7149_v25 = vpop.permute.xlu0 %7148  ;;  %v7238_v31 = vsel %vm6791_vm0, %v7191_v12, %v7237_v5 }
0x2a3d   : > { %v7199_v3 = vrot.slane %v7140_v53, %v10679_v50  ;;  %v7213_v0 = vrot.slane %v7149_v25, %v10677_v54  ;;  %v7566_v53 = vld [vmem:[%s9826_s1 + $0x10] sm:$0xff]  ;;  %v7567_v25 = vld [vmem:[%s9826_s1 + $0x18] sm:$0xff] }
0x2a3f   : > { %v7200_v33 = vsel %vm6724_vm14, %v7199_v3, %v7195_v22 }
0x2a40   : > { %v7146_v37 = vpop.permute.xlu1 %7145  ;;  %v7155_v6 = vpop.permute.xlu0 %7154  ;;  %v7239_v58 = vsel %vm6793_vm1, %v7200_v33, %v7238_v31 }
0x2a41   : > { %v7208_v32 = vrot.slane %v7146_v37, %v10679_v50  ;;  %v7222_v46 = vrot.slane %v7155_v6, %v10677_v54  ;;  %v9388_v37 = vpack.c.bf16 %v7567_v25, %v7566_v53 }
0x2a43   : > { %v7209_v56 = vsel %vm6724_vm14, %v7208_v32, %v7204_v8 }
0x2a44   : > { %v7152_v45 = vpop.permute.xlu1 %7151  ;;  %v7161_v21 = vpop.permute.xlu0 %7160  ;;  %v7240_v62 = vsel %vm6795_vm2, %v7209_v56, %v7239_v58 }
0x2a45   : > { %v7217_v42 = vrot.slane %v7152_v45, %v10679_v50  ;;  %v7231_v17 = vrot.slane %v7161_v21, %v10677_v54  ;;  %v9376_v54 = vpack.c.bf16 %v7319_v57, %v7318_v18 }
0x2a47   : > { %v7218_v39 = vsel %vm6724_vm14, %v7217_v42, %v7213_v0 }
0x2a48   : > { %v7158_v16 = vpop.permute.xlu1 %7157  ;;  %v7241_v38 = vsel %vm6797_vm3, %v7218_v39, %v7240_v62 }
0x2a49   : > { %v7226_v4 = vrot.slane %v7158_v16, %v10679_v50 }
0x2a4b   : > { %v7227_v10 = vsel %vm6724_vm14, %v7226_v4, %v7222_v46 }
0x2a4c   : > { %v7164_v40 = vpop.permute.xlu1 %7163  ;;  %v7242_v59 = vsel %vm6799_vm5, %v7227_v10, %v7241_v38 }
0x2a4d   : > { %v7235_v26 = vrot.slane %v7164_v40, %v10679_v50 }
0x2a4f   : > { %v7236_v34 = vsel %vm6724_vm14, %v7235_v26, %v7231_v17 }
0x2a50   : > { %v7243_v41 = vsel %vm6801_vm6, %v7236_v34, %v7242_v59 }
0x2a51   : > { %8949 = vmatmul.mubr.msk.f32.vlgmr.msra.gmra.mrb[50].mxu0 %vm1945_vm8, %v7243_v41 }
0x2a52   : > { %9374 = vmatpush3.bf16.msra.mxu0 %v9373_v43  ;;  %8970 = vmatprep.mubr.msk.f32.mxu0 %vm9636_vm12, %v9634_v2 }
0x2a53   : > { %9375 = vmatprep.subr.bf16.mxu0 %v11186_v61 }
0x2a56   : > { %9377 = vmatpush3.bf16.msra.mxu0 %v9376_v54 }
0x2a57   : > { %9384 = vmatprep.subr.bf16.mxu0 %v11186_v61 }
0x2b24   : > { %v7312_v50 = vpop.f32.mrb[50].mxu0 }
0x2b25   : > { %v8950_v51 = vpop.f32.mrb[51].mxu0  ;;  %8971 = vmatmul.mubr.msk.f32.vlgmr.msra.gmra.mrb[52].mxu0 %vm1392_vm4, %v7312_v50 }
0x2b26   : > { %8992 = vmatprep.mubr.msk.f32.mxu0 %vm9636_vm12, %v9634_v2  ;;  %9386 = vmatpush3.bf16.msra.mxu0 %v9385_v11 }
0x2b27   : > { %9387 = vmatprep.subr.bf16.mxu0 %v11186_v61 }
0x2b2a   : > { %9389 = vmatpush3.bf16.msra.mxu0 %v9388_v37 }
0x2bf8   : > { %v7466_v2 = vpop.f32.mrb[52].mxu0 }
0x2bf9   : > { %v7467_v27 = vadd.f32 %v7466_v2, %v10986_v23  ;;  %v8972_v36 = vpop.f32.mrb[53].mxu0 }
0x2bfb   : > { %v7477_v47 = vadd.f32 %v8029_v28, %v7467_v27 }
0x2bfd   : > { %v7478_v49 = vmax.f32 %v7477_v47, 0.0 }
0x2bff   : > { %8982 = vmatmul.mubr.msk.f32.vlgmr.msra.gmra.mrb[54].mxu1 %vm1392_vm4, %v7478_v49 }
0x2cd2   : > { %v7559_v1 = vpop.f32.mrb[54].mxu1 }
0x2cd3   : > { %v7560_v61 = vadd.f32 %v8030_v30, %v7559_v1  ;;  %v8983_v6 = vpop.f32.mrb[55].mxu1 }
0x2cd5   : > { %v7563_v45 = vmax.f32 %v7560_v61, 0.0 }
0x2cd7   : > { %8993 = vmatmul.mubr.msk.f32.vlgmr.msra.gmra.mrb[54].mxu0 %vm1392_vm4, %v7563_v45 }
0x2daa   : > { %v7644_v23 = vpop.f32.mrb[54].mxu0 }
0x2dab   : > { %v7645_v19 = vadd.f32 %v8032_v20, %v7644_v23  ;;  %v8994_v63 = vpop.f32.mrb[55].mxu0 }
0x2dad   : > { %7648 = vst [vmem:[%s1190_s0] sm:$0xff] %v7645_v19 }
0x2dae PF: > { %s88_s23 = sadd.s32 1, %s9592_s23  }
0x2daf   : > { %p85_p4 = scmp.ge.s32.totalorder %s88_s23, 4  }
0x2db1   :  { %87 = sbr.rel (!%p85_p4) target bundleno = 63 (0x3f), region = 267 }

</bundles_post_ra>
